<compile_context>
chip_gen: v6e
topology: v6e:2x2x1
jax: 0.10.0
libtpu: 0.0.40
codegen_flags: <defaults>
</compile_context>

<pallas_src>
import jax
import jax.numpy as jnp
import numpy as np
from jax.experimental import pallas as pl
from jax.experimental.pallas import tpu as pltpu

GROUP_IN = 16   # lanes per point in the packed input (10 used, 6 aux/padding)


def pfn_kernel(raw_ref, inv_ref, wbig_ref, sel_mean_ref, sel_mask_ref,
               sel_max_ref, out_ref):
    """One tile of pillars (TR rows = pillars; lane-dense in and out).

    raw_ref      : (TR, N*16) per point:
                   [m*x, m*y, m*z, m*i, x, y, z, m*fx, m*fy, m, m, m, 0,0,0, 1]
    inv_ref      : (TR, 1)     1 / num_voxels per pillar
    wbig_ref     : (N*16, N*2U) block-diagonal PFN weight; BN scale folded into
                   rows 0..8, BN bias in row 15 (pairs with the constant-1 lane)
    sel_mean_ref : (1, N*16)   1.0 at lanes == 4,5,6  (mod 16)  (f_cluster)
    sel_mask_ref : (1, N*16)   1.0 at lanes == 9,10,11 (mod 16) (mask copies)
    sel_max_ref  : (1, N*2U)   1.0 at the max-half output columns
    out_ref      : (TR, N*2U)  per point: [act(U) | max_over_points(U)]
    """
    CL = raw_ref.shape[1]
    OL = out_ref.shape[1]
    n_points = CL // GROUP_IN
    units = (OL // n_points) // 2

    raw = raw_ref[...]                  # (TR, CL)
    inv_nv = inv_ref[...]               # (TR, 1)
    sel_mean = sel_mean_ref[...]        # (1, CL)

    # Per-pillar unmasked xyz sums: cyclic roll+add tree over the lane axis.
    # Afterwards lane j holds sum_n raw[:, n*16 + (j % 16)] for either roll
    # direction (the cyclic offsets cover every residue-16 classmate once).
    s = raw
    shift = GROUP_IN
    while shift < CL:
        s = s + pltpu.roll(s, shift, 1)
        shift *= 2
    # Pillar xyz means, placed only at the f_cluster lanes (4,5,6 per group).
    sub = s * inv_nv * sel_mean                       # (TR, CL)

    # Broadcast each point's mask onto its f_cluster lanes.  The wrapper packs
    # three mask copies at lanes 9,10,11; rolling the isolated copies by +/-5
    # lands one set exactly on lanes 4,5,6 of the SAME group (whichever roll
    # direction Mosaic uses), the other set on lanes sel_mean discards.
    mcol = raw * sel_mask_ref[...]
    mb = pltpu.roll(mcol, 5, 1) + pltpu.roll(mcol, CL - 5, 1)
    mfac = 1.0 + sel_mean * (mb - 1.0)   # mask at lanes 4..6, exactly 1 elsewhere

    feats = (raw - sub) * mfac                        # (TR, CL)

    # PFN layer 0: block-diagonal Linear (BN scale + bias folded in) + ReLU.
    # Output columns are already laid out as [act(U) | zeros(U)] per point.
    z = jnp.dot(feats, wbig_ref[...], preferred_element_type=jnp.float32)
    act = jnp.maximum(z, 0.0)                         # (TR, OL)

    # Max over points: cyclic roll+max tree; every lane ends up holding
    # max_n act[:, n*2U + (j % U)] (act >= 0, so the zero columns never win).
    m = act
    shift = units
    while shift < OL:
        m = jnp.maximum(m, pltpu.roll(m, shift, 1))
        shift *= 2

    out_ref[...] = jnp.where(sel_max_ref[...] > 0.5, m, act).astype(out_ref.dtype)


def _fold_bn(params):
    scale = params["gamma"] / jnp.sqrt(params["rv"] + 1e-3)
    bias = params["beta"] - params["rm"] * scale
    return scale.astype(jnp.float32), bias.astype(jnp.float32)


def _pick_tile_rows(n_rows, cap):
    """Largest multiple-of-8 divisor of n_rows <= cap, preferring an even
    grid-step count (so the parallel axis splits evenly over 2 TensorCores)."""
    cap = min(cap, n_rows)
    cap -= cap % 8
    cap = max(cap, 8)
    fallback = None
    for tr in range(cap, 7, -8):
        if n_rows % tr:
            continue
        if (n_rows // tr) % 2 == 0:
            return tr
        if fallback is None:
            fallback = tr
    return fallback if fallback is not None else 8


def _tpu_budget():
    """(row_cap, vmem_limit_cap) for the attached TPU generation.

    v5e / v6e have 128 MiB VMEM per core -> allow 1024-row tiles and a large
    scoped-VMEM limit.  v7x has only 64 MiB per core (and unknown chips get the
    same conservative treatment): cap at 512 rows / ~44 MiB.
    """
    kind = ""
    try:
        kind = jax.devices()[0].device_kind.lower()
    except Exception:
        pass
    big_vmem = any(t in kind for t in
                   ("v5 lite", "v5e", "v5litepod", "v6 lite", "v6e", "v6lite"))
    if big_vmem:
        return 1024, 88 * 2**20
    return 512, 44 * 2**20


def pillar_feature_net(pillar_x, pillar_y, pillar_z, pillar_i, num_voxels,
                       x_sub_shaped, y_sub_shaped, mask, params,
                       *, tile_rows=None):
    B, _, P, N = pillar_x.shape
    R = B * P
    assert R % 8 == 0
    assert N >= 8 and N & (N - 1) == 0, "roll trees assume power-of-two N >= 8"

    w = params["w"].astype(jnp.float32)               # (9, units)
    c_in, units = w.shape
    assert c_in == 9
    assert units >= 8 and units & (units - 1) == 0
    out_c = 2 * units

    bn_scale, bn_bias = _fold_bn(params)
    wf = w * bn_scale[None, :]                        # BN scale folded into W

    # ---- pack the raw inputs lane-dense: 16 lanes per point ----
    def flat(a):
        return a.reshape(R, N).astype(jnp.float32)

    x, y, z = flat(pillar_x), flat(pillar_y), flat(pillar_z)
    inten = flat(pillar_i)
    msk = flat(mask)
    fx = (x - flat(x_sub_shaped)) * msk
    fy = (y - flat(y_sub_shaped)) * msk
    zero = jnp.zeros_like(x)
    one = jnp.ones_like(x)
    # Lanes 0-3,7,8 pre-masked (fuses into this packing elementwise graph);
    # lanes 4-6 stay unmasked (the pillar mean uses unmasked sums); lanes
    # 9-11 carry three mask copies for the in-kernel roll broadcast; lane 15
    # is the constant-1 bias lane.
    raw = jnp.stack([x * msk, y * msk, z * msk, inten * msk,
                     x, y, z, fx, fy,
                     msk, msk, msk, zero, zero, zero, one], axis=-1)
    raw = raw.reshape(R, N * GROUP_IN)                # (R, N*16)

    inv_nv = (1.0 / num_voxels.astype(jnp.float32)).reshape(1, P)
    inv_nv = jnp.broadcast_to(inv_nv, (B, P)).reshape(R, 1)

    # ---- block-diagonal weight + lane selectors (tiny, built once per call) ----
    blk = jnp.zeros((GROUP_IN, out_c), jnp.float32)
    blk = blk.at[:c_in, :units].set(wf)
    blk = blk.at[GROUP_IN - 1, :units].set(bn_bias)   # bias via constant-1 lane
    eye = jnp.eye(N, dtype=jnp.float32)
    w_big = (eye[:, None, :, None] * blk[None, :, None, :]
             ).reshape(N * GROUP_IN, N * out_c)

    CL = N * GROUP_IN
    OL = N * out_c
    lane_mod = np.arange(CL) % GROUP_IN
    sel_mean = jnp.asarray((lane_mod >= 4) & (lane_mod <= 6),
                           jnp.float32).reshape(1, CL)
    sel_mask = jnp.asarray((lane_mod >= 9) & (lane_mod <= 11),
                           jnp.float32).reshape(1, CL)
    sel_max = jnp.asarray(np.arange(OL) % out_c >= units,
                          jnp.float32).reshape(1, OL)

    row_cap, vmem_cap = _tpu_budget()
    requested = tile_rows if tile_rows is not None else row_cap
    TR = _pick_tile_rows(R, min(requested, row_cap))
    # ~96 KiB of VMEM per tile row covers streamed in/out double buffers plus
    # the compiler-materialized (TR, CL)/(TR, OL) f32 temporaries with margin.
    vmem_limit = int(min(vmem_cap, max(32 * 2**20, 4 * 2**20 + TR * 96 * 1024)))

    out = pl.pallas_call(
        pfn_kernel,
        out_shape=jax.ShapeDtypeStruct((R, OL), jnp.float32),
        grid_spec=pltpu.PrefetchScalarGridSpec(
            num_scalar_prefetch=0,
            grid=(R // TR,),
            in_specs=[
                pl.BlockSpec((TR, CL), lambda r: (r, 0)),
                pl.BlockSpec((TR, 1), lambda r: (r, 0)),
                pl.BlockSpec((CL, OL), lambda r: (0, 0)),
                pl.BlockSpec((1, CL), lambda r: (0, 0)),
                pl.BlockSpec((1, CL), lambda r: (0, 0)),
                pl.BlockSpec((1, OL), lambda r: (0, 0)),
            ],
            out_specs=pl.BlockSpec((TR, OL), lambda r: (r, 0)),
        ),
        compiler_params=pltpu.CompilerParams(
            dimension_semantics=("parallel",),
            vmem_limit_bytes=vmem_limit),
    )(raw, inv_nv, w_big, sel_mean, sel_mask, sel_max)

    return out.reshape(B, P, N, out_c)


def reference_forward(pillar_x, pillar_y, pillar_z, pillar_i, num_voxels,
                      x_sub_shaped, y_sub_shaped, mask, params):
    """Pure-JAX reference mirroring the PyTorch forward (eval-mode BN)."""
    pillar_xyz = jnp.concatenate([pillar_x, pillar_y, pillar_z], axis=1)
    points_mean = pillar_xyz.sum(axis=3, keepdims=True) / \
        num_voxels.reshape(1, 1, -1, 1)
    f_cluster = pillar_xyz - points_mean
    f_center = jnp.concatenate(
        [pillar_x - x_sub_shaped, pillar_y - y_sub_shaped], axis=1)
    pillar_xyzi = jnp.concatenate(
        [pillar_x, pillar_y, pillar_z, pillar_i], axis=1)
    features = jnp.concatenate([pillar_xyzi, f_cluster, f_center], axis=1)
    masked = features * mask
    inputs = jnp.transpose(masked, (0, 2, 3, 1))                   # (B,P,N,9)

    z = jnp.einsum("bpnc,cu->bpnu", inputs, params["w"],
                   precision=jax.lax.Precision.HIGHEST)
    scale = params["gamma"] / jnp.sqrt(params["rv"] + 1e-3)
    bias = params["beta"] - params["rm"] * scale
    x = jnp.maximum(z * scale + bias, 0.0)
    x_max = jnp.max(x, axis=2, keepdims=True)
    x_rep = jnp.broadcast_to(x_max, x.shape)
    return jnp.concatenate([x, x_rep], axis=3)


if __name__ == "__main__":
    key = jax.random.PRNGKey(0)
    B, P, N = 2, 64, 16          # batch, pillars, points-per-pillar
    C_IN, UNITS = 9, 32          # 4 raw + 5 derived feats; PFN0 units = 64//2

    ks = jax.random.split(key, 10)
    pillar_x = jax.random.normal(ks[0], (B, 1, P, N), jnp.float32)
    pillar_y = jax.random.normal(ks[1], (B, 1, P, N), jnp.float32)
    pillar_z = jax.random.normal(ks[2], (B, 1, P, N), jnp.float32)
    pillar_i = jax.random.uniform(ks[3], (B, 1, P, N), jnp.float32)
    x_sub_shaped = jax.random.normal(ks[4], (B, 1, P, N), jnp.float32)
    y_sub_shaped = jax.random.normal(ks[5], (B, 1, P, N), jnp.float32)
    mask = (jax.random.uniform(ks[6], (B, 1, P, N)) > 0.3).astype(jnp.float32)
    num_voxels = jax.random.randint(ks[7], (P,), 1, N + 1).astype(jnp.float32)

    params = {
        "w": 0.1 * jax.random.normal(ks[8], (C_IN, UNITS), jnp.float32),
        "gamma": 1.0 + 0.05 * jnp.arange(UNITS, dtype=jnp.float32),
        "beta": 0.01 * jnp.arange(UNITS, dtype=jnp.float32),
        "rm": 0.02 * jnp.arange(UNITS, dtype=jnp.float32),
        "rv": 1.0 + 0.1 * jnp.arange(UNITS, dtype=jnp.float32),
    }

    out = pillar_feature_net(pillar_x, pillar_y, pillar_z, pillar_i,
                             num_voxels, x_sub_shaped, y_sub_shaped, mask,
                             params)
    out = jax.block_until_ready(out)
    assert out.shape == (B, P, N, 2 * UNITS), out.shape

    ref = reference_forward(pillar_x, pillar_y, pillar_z, pillar_i,
                            num_voxels, x_sub_shaped, y_sub_shaped, mask,
                            params)
    np.testing.assert_allclose(np.asarray(out), np.asarray(ref),
                               rtol=1e-3, atol=1e-3)
    print("KERNEL_OK")
</pallas_src>

<mosaic_0001>
module attributes {stable_mosaic.version = 11 : i64} {
  func.func @pfn_kernel(%arg0: i32, %arg1: memref<64x256xf32, #tpu.memory_space<vmem>>, %arg2: memref<64x1xf32, #tpu.memory_space<vmem>>, %arg3: memref<256x1024xf32, #tpu.memory_space<vmem>>, %arg4: memref<1x256xf32, #tpu.memory_space<vmem>>, %arg5: memref<1x256xf32, #tpu.memory_space<vmem>>, %arg6: memref<1x1024xf32, #tpu.memory_space<vmem>>, %arg7: memref<64x1024xf32, #tpu.memory_space<vmem>>) attributes {dimension_semantics = [#tpu.dimension_semantics<parallel>], iteration_bounds = array<i64: 2>, scalar_prefetch = 0 : i64, scratch_operands = 0 : i64, tpu.core_type = #tpu.core_type<tc>, window_params = [{transform_indices = @transform_0, window_bounds = array<i64: 64, 256>}, {transform_indices = @transform_1, window_bounds = array<i64: 64, 1>}, {pipeline_mode = #tpu.pipeline_mode<synchronous>, transform_indices = @transform_2, window_bounds = array<i64: 256, 1024>}, {pipeline_mode = #tpu.pipeline_mode<synchronous>, transform_indices = @transform_3, window_bounds = array<i64: 1, 256>}, {pipeline_mode = #tpu.pipeline_mode<synchronous>, transform_indices = @transform_4, window_bounds = array<i64: 1, 256>}, {pipeline_mode = #tpu.pipeline_mode<synchronous>, transform_indices = @transform_5, window_bounds = array<i64: 1, 1024>}, {transform_indices = @transform_6, window_bounds = array<i64: 64, 1024>}]} {
    %c0 = arith.constant 0 : index
    %c0_0 = arith.constant 0 : index
    %0 = vector.load %arg1[%c0, %c0_0] : memref<64x256xf32, #tpu.memory_space<vmem>>, vector<64x256xf32>
    %c0_1 = arith.constant 0 : index
    %c0_2 = arith.constant 0 : index
    %1 = vector.load %arg2[%c0_1, %c0_2] : memref<64x1xf32, #tpu.memory_space<vmem>>, vector<64x1xf32>
    %c0_3 = arith.constant 0 : index
    %c0_4 = arith.constant 0 : index
    %2 = vector.load %arg4[%c0_3, %c0_4] : memref<1x256xf32, #tpu.memory_space<vmem>>, vector<1x256xf32>
    %c16_i32 = arith.constant 16 : i32
    %3 = tpu.dynamic_rotate %0 by %c16_i32 dim 1 : vector<64x256xf32>, i32 -> vector<64x256xf32>
    %4 = arith.addf %0, %3 : vector<64x256xf32>
    %c32_i32 = arith.constant 32 : i32
    %5 = tpu.dynamic_rotate %4 by %c32_i32 dim 1 : vector<64x256xf32>, i32 -> vector<64x256xf32>
    %6 = arith.addf %4, %5 : vector<64x256xf32>
    %c64_i32 = arith.constant 64 : i32
    %7 = tpu.dynamic_rotate %6 by %c64_i32 dim 1 : vector<64x256xf32>, i32 -> vector<64x256xf32>
    %8 = arith.addf %6, %7 : vector<64x256xf32>
    %c128_i32 = arith.constant 128 : i32
    %9 = tpu.dynamic_rotate %8 by %c128_i32 dim 1 : vector<64x256xf32>, i32 -> vector<64x256xf32>
    %10 = arith.addf %8, %9 : vector<64x256xf32>
    %11 = vector.broadcast %1 : vector<64x1xf32> to vector<64x256xf32>
    %12 = arith.mulf %10, %11 : vector<64x256xf32>
    %13 = vector.broadcast %2 : vector<1x256xf32> to vector<64x256xf32>
    %14 = arith.mulf %12, %13 : vector<64x256xf32>
    %c0_5 = arith.constant 0 : index
    %c0_6 = arith.constant 0 : index
    %15 = vector.load %arg5[%c0_5, %c0_6] : memref<1x256xf32, #tpu.memory_space<vmem>>, vector<1x256xf32>
    %16 = vector.broadcast %15 : vector<1x256xf32> to vector<64x256xf32>
    %17 = arith.mulf %0, %16 : vector<64x256xf32>
    %c5_i32 = arith.constant 5 : i32
    %18 = tpu.dynamic_rotate %17 by %c5_i32 dim 1 : vector<64x256xf32>, i32 -> vector<64x256xf32>
    %c251_i32 = arith.constant 251 : i32
    %19 = tpu.dynamic_rotate %17 by %c251_i32 dim 1 : vector<64x256xf32>, i32 -> vector<64x256xf32>
    %20 = arith.addf %18, %19 : vector<64x256xf32>
    %cst = arith.constant 1.000000e+00 : f32
    %21 = vector.broadcast %cst : f32 to vector<64x256xf32>
    %22 = arith.subf %20, %21 : vector<64x256xf32>
    %23 = vector.broadcast %2 : vector<1x256xf32> to vector<64x256xf32>
    %24 = arith.mulf %23, %22 : vector<64x256xf32>
    %cst_7 = arith.constant 1.000000e+00 : f32
    %25 = vector.broadcast %cst_7 : f32 to vector<64x256xf32>
    %26 = arith.addf %25, %24 : vector<64x256xf32>
    %27 = arith.subf %0, %14 : vector<64x256xf32>
    %28 = arith.mulf %27, %26 : vector<64x256xf32>
    %c0_8 = arith.constant 0 : index
    %c0_9 = arith.constant 0 : index
    %29 = vector.load %arg3[%c0_8, %c0_9] : memref<256x1024xf32, #tpu.memory_space<vmem>>, vector<256x1024xf32>
    %cst_10 = arith.constant dense<0.000000e+00> : vector<64x1024xf32>
    %30 = tpu.matmul %28, %29, %cst_10 {dimension_numbers = #tpu.dot_dimension_numbers<[1], [0], [0], [1], [0, 0, 1, 1], [], []>} : vector<64x256xf32>, vector<256x1024xf32>, vector<64x1024xf32> -> vector<64x1024xf32>
    %cst_11 = arith.constant 0.000000e+00 : f32
    %31 = vector.broadcast %cst_11 : f32 to vector<64x1024xf32>
    %32 = arith.maximumf %30, %31 : vector<64x1024xf32>
    %c32_i32_12 = arith.constant 32 : i32
    %33 = tpu.dynamic_rotate %32 by %c32_i32_12 dim 1 : vector<64x1024xf32>, i32 -> vector<64x1024xf32>
    %34 = arith.maximumf %32, %33 : vector<64x1024xf32>
    %c64_i32_13 = arith.constant 64 : i32
    %35 = tpu.dynamic_rotate %34 by %c64_i32_13 dim 1 : vector<64x1024xf32>, i32 -> vector<64x1024xf32>
    %36 = arith.maximumf %34, %35 : vector<64x1024xf32>
    %c128_i32_14 = arith.constant 128 : i32
    %37 = tpu.dynamic_rotate %36 by %c128_i32_14 dim 1 : vector<64x1024xf32>, i32 -> vector<64x1024xf32>
    %38 = arith.maximumf %36, %37 : vector<64x1024xf32>
    %c256_i32 = arith.constant 256 : i32
    %39 = tpu.dynamic_rotate %38 by %c256_i32 dim 1 : vector<64x1024xf32>, i32 -> vector<64x1024xf32>
    %40 = arith.maximumf %38, %39 : vector<64x1024xf32>
    %c512_i32 = arith.constant 512 : i32
    %41 = tpu.dynamic_rotate %40 by %c512_i32 dim 1 : vector<64x1024xf32>, i32 -> vector<64x1024xf32>
    %42 = arith.maximumf %40, %41 : vector<64x1024xf32>
    %c0_15 = arith.constant 0 : index
    %c0_16 = arith.constant 0 : index
    %43 = vector.load %arg6[%c0_15, %c0_16] : memref<1x1024xf32, #tpu.memory_space<vmem>>, vector<1x1024xf32>
    %cst_17 = arith.constant 5.000000e-01 : f32
    %44 = vector.broadcast %cst_17 : f32 to vector<1x1024xf32>
    %45 = arith.cmpf ogt, %43, %44 : vector<1x1024xf32>
    %46 = vector.shape_cast %45 : vector<1x1024xi1> to vector<1x1024xi1>
    %47 = vector.broadcast %46 : vector<1x1024xi1> to vector<64x1024xi1>
    %48 = arith.select %47, %42, %32 : vector<64x1024xi1>, vector<64x1024xf32>
    %c0_18 = arith.constant 0 : index
    %c0_19 = arith.constant 0 : index
    %49 = vector.load %arg7[%c0_18, %c0_19] : memref<64x1024xf32, #tpu.memory_space<vmem>>, vector<64x1024xf32>
    tpu.vector_store %arg7[%c0_18, %c0_19], %48 {strides = array<i32>} : memref<64x1024xf32, #tpu.memory_space<vmem>>, vector<64x1024xf32>,
    return
  }
  func.func @transform_0(%arg0: i32) -> (i32, i32) {
    %c0_i32 = arith.constant 0 : i32
    %c0_i32_0 = arith.constant 0 : i32
    return %arg0, %c0_i32 : i32, i32
  }
  func.func @transform_1(%arg0: i32) -> (i32, i32) {
    %c0_i32 = arith.constant 0 : i32
    %c0_i32_0 = arith.constant 0 : i32
    return %arg0, %c0_i32 : i32, i32
  }
  func.func @transform_2(%arg0: i32) -> (i32, i32) {
    %c0_i32 = arith.constant 0 : i32
    %c0_i32_0 = arith.constant 0 : i32
    %c0_i32_1 = arith.constant 0 : i32
    return %c0_i32, %c0_i32_0 : i32, i32
  }
  func.func @transform_3(%arg0: i32) -> (i32, i32) {
    %c0_i32 = arith.constant 0 : i32
    %c0_i32_0 = arith.constant 0 : i32
    %c0_i32_1 = arith.constant 0 : i32
    return %c0_i32, %c0_i32_0 : i32, i32
  }
  func.func @transform_4(%arg0: i32) -> (i32, i32) {
    %c0_i32 = arith.constant 0 : i32
    %c0_i32_0 = arith.constant 0 : i32
    %c0_i32_1 = arith.constant 0 : i32
    return %c0_i32, %c0_i32_0 : i32, i32
  }
  func.func @transform_5(%arg0: i32) -> (i32, i32) {
    %c0_i32 = arith.constant 0 : i32
    %c0_i32_0 = arith.constant 0 : i32
    %c0_i32_1 = arith.constant 0 : i32
    return %c0_i32, %c0_i32_0 : i32, i32
  }
  func.func @transform_6(%arg0: i32) -> (i32, i32) {
    %c0_i32 = arith.constant 0 : i32
    %c0_i32_0 = arith.constant 0 : i32
    return %arg0, %c0_i32 : i32, i32
  }
}

</mosaic_0001>

<bundles_post_ra>
// kernel: tpu_custom_call.1
= control target key start
LH: loop header
LB: loop body
LE: loop exit
PB: predicated region body
PF: predicated region fallthrough
CT: control target
= control target key end

     0   :  { %11 = vsyncpa [#allocation3], 0  ;;  %s5427_s0 = inlined_call_operand.hbm [shape: f32[128,256], index: 0, kind: input, shape index: {}]   ;;  %s5428_s1 = inlined_call_operand.vmem [shape: f32[128,1], index: 1, kind: input, shape index: {}]   ;;  %s5429_s2 = inlined_call_operand.hbm [shape: f32[256,1024], index: 2, kind: input, shape index: {}]   ;;  %s5430_s3 = inlined_call_operand.vmem [shape: f32[1,256], index: 3, kind: input, shape index: {}]   ;;  %s5431_s4 = inlined_call_operand.vmem [shape: f32[1,256], index: 4, kind: input, shape index: {}]   ;;  %s5432_s5 = inlined_call_operand.vmem [shape: f32[1,1024], index: 5, kind: input, shape index: {}]   ;;  %s5433_s6 = inlined_call_operand.hbm [shape: f32[128,1024], index: 6, kind: output, shape index: {}]  }
   0x1   :  { %13 = vsyncpa [#allocation3 + $0x1], 0 }
   0x2   :  { %14 = vsyncpa [#allocation6], 0 }
   0x3   :  { %15 = vsyncpa [#allocation4], 0 }
   0x4   :  { %17 = vsyncpa [#allocation4 + $0x1], 0  ;;  %s2861_s21 = smov 0   ;;  %s2863_s22 = smov 0  }
   0x5   :  { %s2865_s23 = smov 0   ;;  %s2867_s24 = smov 0  }
   0x6 LB: > { %s2882_s25 = sadd.s32 4294967295, %s2810_s24   ;;  %s2562_s26 = sadd.s32 4294967294, %s2810_s24   ;;  %s2810_s24 = sphi %s2867_s24, %s5884_s24   ;;  %s2806_s23 = sphi %s2865_s23, %s5883_s23   ;;  %s2802_s22 = sphi %s2863_s22, %s5882_s22   ;;  %s2798_s21 = sphi %s2861_s21, %s5881_s21  }
   0x7   : > { %p43_p0 = scmp.ne.s32.totalorder %s2802_s22, %s2798_s21  ;;  %p5434_p1 = scmp.eq.s32.totalorder %s2882_s25, 0 }
   0x8   : > { %p183_p3 = scmp.eq.s32.totalorder %s2562_s26, 1  ;;  %p2563_p5 = scmp.ge.s32.totalorder %s2810_s24, 1 }
   0x9   : > { %p2891_p4 = por %p5434_p1, %p43_p0  ;;  %p190_p7 = scmp.lt.s32.totalorder %s2810_s24, 3 }
   0xa   : > { %p2896_p6 = por %p183_p3, %p43_p0  ;;  %s2812_s30 = smov [#allocation5]  }
   0xb   : > { %s5585_s27 = scalar_select %p2891_p4, 1, 0 }
   0xc   : > { %s5586_s28 = scalar_select %p2896_p6, 1, 0 }
   0xd   : > { %p2901_p8 = pnand %p2563_p5, %p190_p7  ;;  %s202_s7 = sshll.u32 %s2812_s30, 4  ;;  %s203_s7 = int_to_ptr.vmem [resolvable:$true] %s202_s7 }
   0xe   : > { %s2915_s9 = sadd.s32 1, %s2810_s24   ;;  %s30_s10 = sadd.s32 1, %s2806_s23 }
   0xf   : > { %s5587_s29 = scalar_select %p2901_p8, 1, 0 }
  0x10   : > { %p2610_p9 = pneg %p2901_p8  ;;  %s27_s11 = ssub.s32 %s2810_s24, %s2915_s9 }
  0x11   : > { %s2699_s12 = scalar_lea.vmem %s203_s7, 32768  ;;  %p2707_p5 = scmp.lt.s32.totalorder %s203_s7, %s203_s7 }
  0x12   : > { %p2910_p11 = pnand %p2610_p9, %p5434_p1  ;;  %p2700_p13 = scmp.ne.s32.totalorder %s203_s7, %s2699_s12 }
  0x13   : > { %p2708_p7 = scmp.lt.s32.totalorder %s2699_s12, %s2699_s12 }
  0x14   : > { %p2690_p12 = pneg %p2910_p11 }
  0x15   : > { %p2709_p10 = por %p2708_p7, %p2707_p5 }
  0x16   : > { %p2702_p0 = pnand %p2700_p13, %p2690_p12 }
  0x18   : > { %p2703_p3 = pneg %p2702_p0 }
  0x1a   : > { %p2710_p2 = pnand %p2709_p10, %p2703_p3 }
  0x1c   : > { %2713 = shalt.err (!%p2710_p2)
}
  0x1d   : > { %s2813_s13 = smov 1024   ;;  %s2814_s14 = smov 64  }
  0x1e   : > { %2613 = dma.hbm_to_vmem [thread:$0]  (!%p2910_p11), %s5429_s2, 32768, %s203_s7, [#allocation6], %s2813_s13, %s2813_s13, %s2814_s14  }
  0x1f   : > { %p28_p9 = scmp.eq.s32.totalorder %s27_s11, 0  ;;  %p37_p12 = scmp.ne.s32.totalorder %s2806_s23, %s2802_s22 }
  0x20   : > { %p38_p10 = scmp.eq.s32.totalorder %s2810_s24, 0  ;;  %p2623_p2 = scmp.lt.s32.totalorder %s2810_s24, 2 }
  0x21   : > { %s2932_s17 = scalar_select %p28_p9, %s2806_s23, %s30_s10  }
  0x22   : > { %p39_p13 = por %p38_p10, %p37_p12  ;;  %p5589_p0 = scmp.eq.s32.totalorder %s2882_s25, 1 }
  0x23   : > { %s225_s19 = sand.u32 1, %s2806_s23   ;;  %s2599_s20 = sshll.u32 %s2810_s24, 11 }
  0x24   : > { %p2936_p3 = por %p5589_p0, %p37_p12  ;;  %s2566_s26 = sshll.u32 %s225_s19, 7 }
  0x25   : > { %s2945_s12 = scalar_lea.hbm %s5427_s0, %s2599_s20  ;;  %s229_s7 = scalar_lea.vmem [#allocation2], %s2566_s26 }
  0x26   : > { %s5590_s18 = scalar_select %p2936_p3, 1, 0 }
  0x27   : > { %s237_s10 = sshll.u32 %s229_s7, 4  ;;  %p2947_p11 = pnand %p2623_p2, %p39_p13  ;;  %s2951_s10 = int_to_ptr.vmem [resolvable:$true] %s237_s10 }
  0x28   : > { %s2953_s13 = scalar_lea.sflag [#allocation3], %s225_s19  ;;  %s2714_s14 = scalar_lea.hbm %s2945_s12, 2048 }
  0x29   : > { %p2715_p5 = scmp.ne.s32.totalorder %s2945_s12, %s2714_s14  ;;  %p2716_p7 = pneg %p2947_p11 }
  0x2a   : > { %s2719_s20 = scalar_lea.hbm %s5427_s0, 4096  ;;  %p2720_p10 = scmp.lt.s32.totalorder %s2945_s12, %s5427_s0 }
  0x2b   : > { %p2717_p9 = pnand %p2716_p7, %p2715_p5  ;;  %p2721_p2 = scmp.lt.s32.totalorder %s2719_s20, %s2714_s14 }
  0x2d   : > { %p2718_p12 = pneg %p2717_p9  ;;  %p2722_p13 = por %p2721_p2, %p2720_p10 }
  0x2f   : > { %p2723_p0 = pnand %p2722_p13, %p2718_p12 }
  0x31   : > { %2726 = shalt.err (!%p2723_p0)
}
  0x32   : > { %s2727_s19 = scalar_lea.vmem %s2951_s10, 2048  ;;  %s2815_s8 = smov [#allocation2]  }
  0x33   : > { %p2728_p1 = scmp.ne.s32.totalorder %s2951_s10, %s2727_s19  ;;  %s2732_s7 = sshll.u32 %s2815_s8, 4  ;;  %s2733_s7 = int_to_ptr.vmem [resolvable:$false] %s2732_s7 }
  0x34   : > { %s2734_s15 = scalar_lea.vmem %s2733_s7, 4096  ;;  %p2735_p9 = scmp.lt.s32.totalorder %s2951_s10, %s2733_s7 }
  0x35   : > { %p2730_p6 = pnand %p2728_p1, %p2716_p7  ;;  %p2736_p3 = scmp.lt.s32.totalorder %s2734_s15, %s2727_s19 }
  0x37   : > { %p2731_p5 = pneg %p2730_p6  ;;  %p2737_p4 = por %p2736_p3, %p2735_p9 }
  0x39   : > { %p2738_p8 = pnand %p2737_p4, %p2731_p5 }
  0x3b   : > { %2741 = shalt.err (!%p2738_p8)
}
  0x3c   : > { %s2816_s14 = smov 256   ;;  %s2817_s16 = smov 16  }
  0x3d   : > { %2617 = dma.hbm_to_vmem [thread:$0]  (!%p2947_p11), %s2945_s12, 2048, %s2951_s10, %s2953_s13, %s2816_s14, %s2816_s14, %s2817_s16  }
  0x3e   : > { %p5592_p1 = scmp.ne.s32.totalorder %s5587_s29, 0 }
  0x40   : > { %258 = sbr.rel (%p5592_p1) target bundleno = 1099 (0x44b), region = 44 }
  0x45   : > { %s2977_s20 = sand.u32 1, %s2802_s22   ;;  %p5593_p4 = scmp.ne.s32.totalorder %s5585_s27, 0 }
  0x46   : > { %s2571_s26 = sshll.u32 %s2977_s20, 7  ;;  %s261_s30 = scalar_lea.sflag [#allocation3], %s2977_s20 }
  0x47   : > { %s2981_s19 = scalar_lea.vmem [#allocation2], %s2571_s26 }
  0x48   : > { %2785 = dma.done.wait (%p5593_p4), %s261_s30, 2048  }
  0x49   : > { %2787 = vsyncadd (%p5593_p4), %s261_s30, 4294965248  ;;  %p5594_p6 = scmp.eq.s32.totalorder %s2882_s25, 0 }
  0x4b   : > { %2789 = dma.done.wait (%p5594_p6), [#allocation6], 32768   ;;  %p5595_p8 = pmov %p5594_p6 }
  0x4c   : > { %v2818_v0 = vmov 0   ;;  %v2992_v1 = vld [vmem:[%s2981_s19] sm:$0xff]  ;;  %v2995_v2 = vld [vmem:[%s2981_s19 + $0x10] sm:$0xff]  ;;  %v367_v3 = vlaneseq  ;;  %s2819_s27 = smov 16   ;;  %v3002_v4 = vld [vmem:[%s2981_s19 + $0x8] sm:$0xff]  ;;  %s2574_s10 = sshll.u32 %s2882_s25, 3 }
  0x4d   : > { %2791 = vsyncadd (%p5595_p8), [#allocation6], 4294934528  ;;  %2670 = vset.pattern.permute.xlu0 %v2818_v0  ;;  %2671 = vset.pattern.permute.xlu1 %v2818_v0  ;;  %v3005_v5 = vld [vmem:[%s2981_s19 + $0x18] sm:$0xff]  ;;  %v3013_v7 = vld [vmem:[%s2981_s19 + $0x28] sm:$0xff]  ;;  %p304_p3 = scmp.lt.s32.totalorder %s2574_s10, 15  ;;  %s2820_s16 = smov 5  }
  0x4e   : > { %335 = vrot.lane.b32.xlu0 %v2992_v1, %s2819_s27  ;;  %337 = vrot.lane.b32.xlu1 %v2995_v2, %s2819_s27  ;;  %v590_v6 = vshrl.u32 %v367_v3, 7  ;;  %v3016_v8 = vld [vmem:[%s2981_s19 + $0x20] sm:$0xff]  ;;  %v3032_v19 = vld [vmem:[%s2981_s19 + $0x38] sm:$0xff]  ;;  %s2821_s26 = smov 123   ;;  %v3135_v46 = vand.u32 127, %v367_v3  ;;  %s2822_s30 = smov 32  }
  0x4f   : > { %v2281_v9 = vld [vmem:[%s5432_s5] sm:$0xff]  ;;  %v3035_v20 = vld [vmem:[%s2981_s19 + $0x30] sm:$0xff]  ;;  %v3065_v29 = vld [vmem:[%s2981_s19 + $0x48] sm:$0xff]  ;;  %s5886_s10 = smov (!%p304_p3, %s2574_s10), 15  ;;  %s2601_s11 = sshll.u32 %s2882_s25, 13 }
  0x50   : > { %v2294_v10 = vsub.s32 2, %v590_v6  ;;  %v2298_v11 = vsub.s32 3, %v590_v6  ;;  %v2302_v12 = vsub.s32 4, %v590_v6  ;;  %v2306_v13 = vsub.s32 5, %v590_v6  ;;  %v3068_v30 = vld [vmem:[%s2981_s19 + $0x40] sm:$0xff]  ;;  %v3075_v31 = vld [vmem:[%s2981_s19 + $0x58] sm:$0xff]  ;;  %s5349_s15 = scalar_lea.hbm %s5433_s6, %s2601_s11 }
  0x51   : > { %v2310_v14 = vsub.s32 6, %v590_v6  ;;  %v2314_v15 = vsub.s32 7, %v590_v6  ;;  %v3021_v16 = vsub.s32 0, %v590_v6  ;;  %v3023_v17 = vsub.s32 1, %v590_v6  ;;  %v3078_v32 = vld [vmem:[%s2981_s19 + $0x50] sm:$0xff]  ;;  %v3085_v33 = vld [vmem:[%s2981_s19 + $0x68] sm:$0xff] }
  0x52   : > { %351 = vrot.lane.b32.xlu0 %v3002_v4, %s2819_s27  ;;  %353 = vrot.lane.b32.xlu1 %v3005_v5, %s2819_s27  ;;  %vm2282_vm0 = vcmp.gt.f32.partialorder %v2281_v9, 0.5  ;;  %v3088_v34 = vld [vmem:[%s2981_s19 + $0x60] sm:$0xff]  ;;  %s2575_s8 = sshll.u32 %s5886_s10, 3  ;;  %v3101_v37 = vld [vmem:[%s2981_s19 + $0x78] sm:$0xff]  ;;  %vm369_vm1 = vcmp.lt.s32.totalorder %v3135_v46, 16  ;;  %vm434_vm2 = vcmp.lt.s32.totalorder %v3135_v46, 32 }
  0x53   : > { %5596 = vst [vmem:[#allocation11_spill] sm:$0xff] %v3021_v16  ;;  %5597 = vst [vmem:[#allocation12_spill] sm:$0xff] %v3023_v17  ;;  %v3029_v18 = vsel %vm2282_vm0, 1, %v2818_v0  ;;  %v615_v35 = vld [vmem:[%s5431_s4] sm:$0x3]  ;;  %v3104_v38 = vld [vmem:[%s2981_s19 + $0x70] sm:$0xff]  ;;  %s3109_s14 = scalar_lea.vmem %s5428_s1, %s2575_s8 }
  0x54   : > { %5598 = vst [vmem:[#allocation13_spill] sm:$0xff] %v3029_v18  ;;  %v3042_v23 = vrot.slane %v3029_v18, %v2294_v10  ;;  %v3045_v24 = vrot.slane %v3029_v18, %v2298_v11  ;;  %v3048_v25 = vrot.slane %v3029_v18, %v2302_v12  ;;  %v3051_v26 = vrot.slane %v3029_v18, %v2306_v13  ;;  %v326_v41 = vld [vmem:[%s3109_s14] sm:$0xff]  ;;  %v327_v43 = vld [vmem:[%s3109_s14 + $0x8] sm:$0xff]  ;;  %v328_v55 = vld [vmem:[%s3109_s14 + $0x10] sm:$0xff]  ;;  %s2453_s25 = scalar_lea.sflag [#allocation4], %s2977_s20  ;;  %p5878_p7 = scmp.ne.s32.totalorder %s5590_s18, 0 }
  0x55   : > { %v3054_v27 = vrot.slane %v3029_v18, %v2310_v14  ;;  %v3057_v28 = vrot.slane %v3029_v18, %v2314_v15  ;;  %v3098_v36 = vrot.slane %v615_v35, %v3021_v16  ;;  %v3116_v39 = vrot.slane %v615_v35, %v3023_v17  ;;  %v329_v58 = vld [vmem:[%s3109_s14 + $0x18] sm:$0xff]  ;;  %v330_v3 = vld [vmem:[%s3109_s14 + $0x20] sm:$0xff]  ;;  %v939_v21 = vld [vmem:[#allocation5 + $0x330] sm:$0xff] }
  0x56   : > { %355 = vrot.lane.b32.xlu1 %v3013_v7, %s2819_s27  ;;  %339 = vrot.lane.b32.xlu0 %v3016_v8, %s2819_s27  ;;  %5599 = vst [vmem:[#allocation14_spill] sm:$0xff] %v3042_v23  ;;  %5600 = vst [vmem:[#allocation15_spill] sm:$0xff] %v3045_v24  ;;  %vm675_vm3 = vcmp.lt.s32.totalorder %v3135_v46, 5  ;;  %vm724_vm4 = vcmp.lt.s32.totalorder %v3135_v46, 123  ;;  %vm499_vm5 = vcmp.lt.s32.totalorder %v3135_v46, 64 }
  0x57   : > { %5601 = vst [vmem:[#allocation16_spill] sm:$0xff] %v3048_v25  ;;  %5602 = vst [vmem:[#allocation17_spill] sm:$0xff] %v3051_v26  ;;  %v627_v40 = vmul.f32 %v3098_v36, %v2992_v1  ;;  %v628_v42 = vmul.f32 %v3116_v39, %v3002_v4  ;;  %v630_v44 = vmul.f32 %v3116_v39, %v3005_v5 }
  0x58   : > { %5603 = vst [vmem:[#allocation18_spill] sm:$0xff] %v3054_v27  ;;  %5604 = vst [vmem:[#allocation19_spill] sm:$0xff] %v3057_v28  ;;  %v629_v45 = vmul.f32 %v3098_v36, %v2995_v2  ;;  %v631_v53 = vmul.f32 %v3098_v36, %v3016_v8  ;;  %v632_v56 = vmul.f32 %v3116_v39, %v3013_v7 }
  0x59   : > { %v633_v59 = vmul.f32 %v3098_v36, %v3035_v20  ;;  %v634_v60 = vmul.f32 %v3116_v39, %v3032_v19 }
  0x5a   : > { %357 = vrot.lane.b32.xlu1 %v3032_v19, %s2819_s27  ;;  %341 = vrot.lane.b32.xlu0 %v3035_v20, %s2819_s27 }
  0x5e   : > { %359 = vrot.lane.b32.xlu1 %v3065_v29, %s2819_s27  ;;  %343 = vrot.lane.b32.xlu0 %v3068_v30, %s2819_s27 }
  0x62   : > { %361 = vrot.lane.b32.xlu1 %v3075_v31, %s2819_s27  ;;  %345 = vrot.lane.b32.xlu0 %v3078_v32, %s2819_s27 }
  0x66   : > { %363 = vrot.lane.b32.xlu1 %v3085_v33, %s2819_s27  ;;  %347 = vrot.lane.b32.xlu0 %v3088_v34, %s2819_s27 }
  0x6a   : > { %365 = vrot.lane.b32.xlu1 %v3101_v37, %s2819_s27  ;;  %349 = vrot.lane.b32.xlu0 %v3104_v38, %s2819_s27  ;;  %s2823_s27 = smov 64  }
  0x6e   : > { %542 = vperm.xlu0 %2670, %v326_v41   ;;  %643 = vrot.lane.b32.xlu1 %v627_v40, %s2820_s16 }
  0x72   : > { %692 = vrot.lane.b32.xlu0 %v627_v40, %s2821_s26  ;;  %659 = vrot.lane.b32.xlu1 %v628_v42, %s2820_s16 }
  0x76   : > { %547 = vperm.xlu0 %2670, %v327_v43   ;;  %708 = vrot.lane.b32.xlu1 %v628_v42, %s2821_s26 }
  0x7a   : > { %661 = vrot.lane.b32.xlu0 %v630_v44, %s2820_s16  ;;  %645 = vrot.lane.b32.xlu1 %v629_v45, %s2820_s16 }
  0xc0   : > { %v336_v47 = vpop.permute.xlu0 %335  ;;  %v338_v54 = vpop.permute.xlu1 %337 }
  0xc4   : > { %v352_v48 = vpop.permute.xlu0 %351  ;;  %v354_v57 = vpop.permute.xlu1 %353 }
  0xc5   : > { %v370_v49 = vsel %vm369_vm1, %v336_v47, %v352_v48  ;;  %v378_v50 = vsel %vm369_vm1, %v352_v48, %v336_v47  ;;  %v379_v6 = vsel %vm369_vm1, %v354_v57, %v338_v54 }
  0xc6   : > { %v3143_v51 = vadd.f32 %v378_v50, %v2992_v1  ;;  %v3146_v52 = vadd.f32 %v370_v49, %v3002_v4  ;;  %v3174_v1 = vmul.f32 %v3098_v36, %v3068_v30  ;;  %v371_v4 = vsel %vm369_vm1, %v338_v54, %v354_v57 }
  0xc7   : > { %v3184_v9 = vadd.f32 %v379_v6, %v2995_v2  ;;  %v3187_v10 = vadd.f32 %v371_v4, %v3005_v5  ;;  %v950_v4 = vld [vmem:[#allocation5 + $0x388] sm:$0xff]  ;;  %v952_v6 = vld [vmem:[#allocation5 + $0x398] sm:$0xff] }
  0xc8   : > { %402 = vrot.lane.b32.xlu0 %v3143_v51, %s2822_s30  ;;  %418 = vrot.lane.b32.xlu1 %v3146_v52, %s2822_s30  ;;  %v356_v61 = vpop.permute.xlu1 %355  ;;  %v340_v62 = vpop.permute.xlu0 %339 }
  0xc9   : > { %v372_v13 = vsel %vm369_vm1, %v340_v62, %v356_v61  ;;  %v380_v14 = vsel %vm369_vm1, %v356_v61, %v340_v62  ;;  %v958_v62 = vld [vmem:[#allocation5 + $0x3c8] sm:$0xff] }
  0xca   : > { %v3198_v2 = vadd.f32 %v380_v14, %v3016_v8  ;;  %v3201_v5 = vadd.f32 %v372_v13, %v3013_v7  ;;  %1093 = vmatprep.subr.mxu0 %v958_v62  ;;  %v942_v13 = vld [vmem:[#allocation5 + $0x348] sm:$0xff]  ;;  %v944_v14 = vld [vmem:[#allocation5 + $0x358] sm:$0xff]  ;;  %v909_v62 = vld [vmem:[#allocation5 + $0x240] sm:$0xff] }
  0xcc   : > { %710 = vrot.lane.b32.xlu0 %v630_v44, %s2821_s26  ;;  %694 = vrot.lane.b32.xlu1 %v629_v45, %s2821_s26  ;;  %v358_v63 = vpop.permute.xlu1 %357  ;;  %v342_v0 = vpop.permute.xlu0 %341 }
  0xcd   : > { %v373_v15 = vsel %vm369_vm1, %v342_v0, %v358_v63  ;;  %v381_v35 = vsel %vm369_vm1, %v358_v63, %v342_v0  ;;  %v960_v63 = vld [vmem:[#allocation5 + $0x3d8] sm:$0xff]  ;;  %v957_v0 = vld [vmem:[#allocation5 + $0x3c0] sm:$0xff] }
  0xce   : > { %v3212_v8 = vadd.f32 %v381_v35, %v3035_v20  ;;  %v3215_v7 = vadd.f32 %v373_v15, %v3032_v19  ;;  %1206 = vmatprep.subr.mxu1 %v960_v63  ;;  %1094 = vmatpush1.msra.mxu0 %v957_v0  ;;  %v941_v15 = vld [vmem:[#allocation5 + $0x340] sm:$0xff]  ;;  %v943_v35 = vld [vmem:[#allocation5 + $0x350] sm:$0xff]  ;;  %v902_v0 = vld [vmem:[#allocation5 + $0x208] sm:$0xff] }
  0xcf   : > { %1095 = vmatprep.subr.mxu0 %v950_v4  ;;  %v911_v63 = vld [vmem:[#allocation5 + $0x250] sm:$0xff]  ;;  %v901_v4 = vld [vmem:[#allocation5 + $0x200] sm:$0xff] }
  0xd0   : > { %647 = vrot.lane.b32.xlu0 %v631_v53, %s2820_s16  ;;  %552 = vperm.xlu1 %2671, %v328_v55   ;;  %v360_v11 = vpop.permute.xlu1 %359  ;;  %v344_v12 = vpop.permute.xlu0 %343 }
  0xd1   : > { %v374_v42 = vsel %vm369_vm1, %v344_v12, %v360_v11  ;;  %v382_v43 = vsel %vm369_vm1, %v360_v11, %v344_v12  ;;  %v949_v11 = vld [vmem:[#allocation5 + $0x380] sm:$0xff]  ;;  %v951_v12 = vld [vmem:[#allocation5 + $0x390] sm:$0xff] }
  0xd2   : > { %v3226_v44 = vadd.f32 %v382_v43, %v3068_v30  ;;  %v3229_v20 = vadd.f32 %v374_v42, %v3065_v29  ;;  %1096 = vmatpush1.msra.mxu0 %v949_v11  ;;  %v933_v42 = vld [vmem:[#allocation5 + $0x300] sm:$0xff]  ;;  %v935_v43 = vld [vmem:[#allocation5 + $0x310] sm:$0xff]  ;;  %v894_v11 = vld [vmem:[#allocation5 + $0x1c8] sm:$0xff] }
  0xd3   : > { %1097 = vmatprep.subr.mxu0 %v942_v13  ;;  %v893_v13 = vld [vmem:[#allocation5 + $0x1c0] sm:$0xff] }
  0xd4   : > { %696 = vrot.lane.b32.xlu0 %v631_v53, %s2821_s26  ;;  %663 = vrot.lane.b32.xlu1 %v632_v56, %s2820_s16  ;;  %v362_v40 = vpop.permute.xlu1 %361  ;;  %v346_v41 = vpop.permute.xlu0 %345 }
  0xd5   : > { %v375_v47 = vsel %vm369_vm1, %v346_v41, %v362_v40  ;;  %v383_v48 = vsel %vm369_vm1, %v362_v40, %v346_v41  ;;  %v934_v40 = vld [vmem:[#allocation5 + $0x308] sm:$0xff]  ;;  %v936_v41 = vld [vmem:[#allocation5 + $0x318] sm:$0xff]  ;;  %1098 = vmatpush1.msra.mxu0 %v941_v15 }
  0xd6   : > { %v3240_v30 = vadd.f32 %v383_v48, %v3078_v32  ;;  %v3243_v49 = vadd.f32 %v375_v47, %v3075_v31  ;;  %1099 = vmatprep.subr.mxu0 %v934_v40  ;;  %v925_v47 = vld [vmem:[#allocation5 + $0x2c0] sm:$0xff]  ;;  %v927_v48 = vld [vmem:[#allocation5 + $0x2d0] sm:$0xff]  ;;  %v886_v15 = vld [vmem:[#allocation5 + $0x188] sm:$0xff] }
  0xd7   : > { %1100 = vmatpush1.msra.mxu0 %v933_v42  ;;  %v885_v40 = vld [vmem:[#allocation5 + $0x180] sm:$0xff]  ;;  %v878_v42 = vld [vmem:[#allocation5 + $0x148] sm:$0xff] }
  0xd8   : > { %557 = vperm.xlu0 %2670, %v329_v58   ;;  %712 = vrot.lane.b32.xlu1 %v632_v56, %s2821_s26  ;;  %v364_v19 = vpop.permute.xlu1 %363  ;;  %v348_v45 = vpop.permute.xlu0 %347 }
  0xd9   : > { %v376_v50 = vsel %vm369_vm1, %v348_v45, %v364_v19  ;;  %v384_v53 = vsel %vm369_vm1, %v364_v19, %v348_v45  ;;  %v926_v19 = vld [vmem:[#allocation5 + $0x2c8] sm:$0xff]  ;;  %v928_v45 = vld [vmem:[#allocation5 + $0x2d8] sm:$0xff] }
  0xda   : > { %v3254_v56 = vadd.f32 %v384_v53, %v3088_v34  ;;  %v3257_v57 = vadd.f32 %v376_v50, %v3085_v33  ;;  %v918_v50 = vld [vmem:[#allocation5 + $0x288] sm:$0xff]  ;;  %v920_v53 = vld [vmem:[#allocation5 + $0x298] sm:$0xff]  ;;  %1101 = vmatprep.subr.mxu0 %v926_v19  ;;  %v877_v19 = vld [vmem:[#allocation5 + $0x140] sm:$0xff] }
  0xdb   : > { %1102 = vmatpush1.msra.mxu0 %v925_v47  ;;  %v870_v47 = vld [vmem:[#allocation5 + $0x108] sm:$0xff] }
  0xdc   : > { %649 = vrot.lane.b32.xlu1 %v633_v59, %s2820_s16  ;;  %665 = vrot.lane.b32.xlu0 %v634_v60, %s2820_s16  ;;  %v366_v54 = vpop.permute.xlu1 %365  ;;  %v350_v55 = vpop.permute.xlu0 %349 }
  0xdd   : > { %v377_v58 = vsel %vm369_vm1, %v350_v55, %v366_v54  ;;  %1103 = vmatprep.subr.mxu0 %v918_v50  ;;  %v869_v50 = vld [vmem:[#allocation5 + $0x100] sm:$0xff] }
  0xde   : > { %v3271_v61 = vadd.f32 %v377_v58, %v3101_v37  ;;  %v910_v58 = vld [vmem:[#allocation5 + $0x248] sm:$0xff] }
  0xe0   : > { %698 = vrot.lane.b32.xlu1 %v633_v59, %s2821_s26  ;;  %714 = vrot.lane.b32.xlu0 %v634_v60, %s2821_s26  ;;  %v385_v59 = vsel %vm369_vm1, %v366_v54, %v350_v55  ;;  %v917_v54 = vld [vmem:[#allocation5 + $0x280] sm:$0xff]  ;;  %v919_v55 = vld [vmem:[#allocation5 + $0x290] sm:$0xff] }
  0xe1   : > { %v3268_v60 = vadd.f32 %v385_v59, %v3104_v38  ;;  %v912_v59 = vld [vmem:[#allocation5 + $0x258] sm:$0xff]  ;;  %1104 = vmatpush1.msra.mxu0 %v917_v54  ;;  %v862_v54 = vld [vmem:[#allocation5 + $0xc8] sm:$0xff] }
  0xe2   : > { %1105 = vmatprep.subr.mxu0 %v910_v58  ;;  %v861_v58 = vld [vmem:[#allocation5 + $0xc0] sm:$0xff] }
  0xe3   : > { %1106 = vmatpush1.msra.mxu0 %v909_v62  ;;  %v854_v62 = vld [vmem:[#allocation5 + $0x88] sm:$0xff] }
  0xe4   : > { %562 = vperm.xlu1 %2671, %v330_v3   ;;  %651 = vrot.lane.b32.xlu0 %v3174_v1, %s2820_s16  ;;  %v959_v3 = vld [vmem:[#allocation5 + $0x3d0] sm:$0xff] }
  0xe5   : > { %1207 = vmatpush1.msra.mxu1 %v959_v3  ;;  %v904_v3 = vld [vmem:[#allocation5 + $0x218] sm:$0xff]  ;;  %1107 = vmatprep.subr.mxu0 %v902_v0  ;;  %v853_v0 = vld [vmem:[#allocation5 + $0x80] sm:$0xff] }
  0xe6   : > { %1208 = vmatprep.subr.mxu1 %v952_v6  ;;  %v903_v6 = vld [vmem:[#allocation5 + $0x210] sm:$0xff]  ;;  %1108 = vmatpush1.msra.mxu0 %v901_v4  ;;  %v846_v4 = vld [vmem:[#allocation5 + $0x48] sm:$0xff] }
  0xe7   : > { %1209 = vmatpush1.msra.mxu1 %v951_v12  ;;  %v896_v12 = vld [vmem:[#allocation5 + $0x1d8] sm:$0xff]  ;;  %1109 = vmatprep.subr.mxu0 %v894_v11  ;;  %v845_v11 = vld [vmem:[#allocation5 + $0x40] sm:$0xff] }
  0xe8   : > { %404 = vrot.lane.b32.xlu0 %v3184_v9, %s2822_s30  ;;  %420 = vrot.lane.b32.xlu1 %v3187_v10, %s2822_s30 }
  0xe9   : > { %1210 = vmatprep.subr.mxu1 %v944_v14  ;;  %v895_v14 = vld [vmem:[#allocation5 + $0x1d0] sm:$0xff]  ;;  %1110 = vmatpush1.msra.mxu0 %v893_v13  ;;  %v838_v13 = vld [vmem:[#allocation5 + $0x8] sm:$0xff] }
  0xea   : > { %1211 = vmatpush1.msra.mxu1 %v943_v35  ;;  %v888_v35 = vld [vmem:[#allocation5 + $0x198] sm:$0xff]  ;;  %1111 = vmatprep.subr.mxu0 %v886_v15  ;;  %v837_v15 = vld [vmem:[#allocation5] sm:$0xff] }
  0xeb   : > { %1212 = vmatprep.subr.mxu1 %v936_v41  ;;  %v887_v41 = vld [vmem:[#allocation5 + $0x190] sm:$0xff]  ;;  %1112 = vmatpush1.msra.mxu0 %v885_v40  ;;  %v1086_v40 = vld [vmem:[#allocation5 + $0x7c8] sm:$0xff] }
  0xec   : > { %406 = vrot.lane.b32.xlu0 %v3198_v2, %s2822_s30  ;;  %422 = vrot.lane.b32.xlu1 %v3201_v5, %s2822_s30 }
  0xed   : > { %1213 = vmatpush1.msra.mxu1 %v935_v43  ;;  %v880_v43 = vld [vmem:[#allocation5 + $0x158] sm:$0xff]  ;;  %1113 = vmatprep.subr.mxu0 %v878_v42  ;;  %v1085_v42 = vld [vmem:[#allocation5 + $0x7c0] sm:$0xff] }
  0xee   : > { %1214 = vmatprep.subr.mxu1 %v928_v45  ;;  %v879_v45 = vld [vmem:[#allocation5 + $0x150] sm:$0xff]  ;;  %1114 = vmatpush1.msra.mxu0 %v877_v19  ;;  %v1078_v19 = vld [vmem:[#allocation5 + $0x788] sm:$0xff] }
  0xef   : > { %1215 = vmatpush1.msra.mxu1 %v927_v48  ;;  %v872_v48 = vld [vmem:[#allocation5 + $0x118] sm:$0xff]  ;;  %1115 = vmatprep.subr.mxu0 %v870_v47  ;;  %v1077_v47 = vld [vmem:[#allocation5 + $0x780] sm:$0xff] }
  0xf0   : > { %408 = vrot.lane.b32.xlu0 %v3212_v8, %s2822_s30  ;;  %424 = vrot.lane.b32.xlu1 %v3215_v7, %s2822_s30 }
  0xf1   : > { %1216 = vmatprep.subr.mxu1 %v920_v53  ;;  %v871_v53 = vld [vmem:[#allocation5 + $0x110] sm:$0xff]  ;;  %1116 = vmatpush1.msra.mxu0 %v869_v50  ;;  %v1070_v50 = vld [vmem:[#allocation5 + $0x748] sm:$0xff] }
  0xf2   : > { %1217 = vmatpush1.msra.mxu1 %v919_v55  ;;  %v864_v55 = vld [vmem:[#allocation5 + $0xd8] sm:$0xff]  ;;  %1117 = vmatprep.subr.mxu0 %v862_v54  ;;  %v1069_v54 = vld [vmem:[#allocation5 + $0x740] sm:$0xff] }
  0xf3   : > { %1218 = vmatprep.subr.mxu1 %v912_v59  ;;  %v863_v59 = vld [vmem:[#allocation5 + $0xd0] sm:$0xff]  ;;  %1118 = vmatpush1.msra.mxu0 %v861_v58  ;;  %v1062_v58 = vld [vmem:[#allocation5 + $0x708] sm:$0xff] }
  0xf4   : > { %410 = vrot.lane.b32.xlu0 %v3226_v44, %s2822_s30  ;;  %426 = vrot.lane.b32.xlu1 %v3229_v20, %s2822_s30 }
  0xf5   : > { %1219 = vmatpush1.msra.mxu1 %v911_v63  ;;  %v856_v63 = vld [vmem:[#allocation5 + $0x98] sm:$0xff]  ;;  %1119 = vmatprep.subr.mxu0 %v854_v62  ;;  %v3277_v62 = vpop.permute.xlu1 %643 }
  0xf6   : > { %1220 = vmatprep.subr.mxu1 %v904_v3  ;;  %v855_v3 = vld [vmem:[#allocation5 + $0x90] sm:$0xff]  ;;  %1120 = vmatpush1.msra.mxu0 %v853_v0  ;;  %v1061_v0 = vld [vmem:[#allocation5 + $0x700] sm:$0xff] }
  0xf7   : > { %1221 = vmatpush1.msra.mxu1 %v903_v6  ;;  %v848_v6 = vld [vmem:[#allocation5 + $0x58] sm:$0xff]  ;;  %1121 = vmatprep.subr.mxu0 %v846_v4  ;;  %v1054_v4 = vld [vmem:[#allocation5 + $0x6c8] sm:$0xff] }
  0xf8   : > { %412 = vrot.lane.b32.xlu0 %v3240_v30, %s2822_s30  ;;  %428 = vrot.lane.b32.xlu1 %v3243_v49, %s2822_s30 }
  0xf9   : > { %1222 = vmatprep.subr.mxu1 %v896_v12  ;;  %v847_v12 = vld [vmem:[#allocation5 + $0x50] sm:$0xff]  ;;  %1122 = vmatpush1.msra.mxu0 %v845_v11  ;;  %v1053_v11 = vld [vmem:[#allocation5 + $0x6c0] sm:$0xff] }
  0xfa   : > { %1223 = vmatpush1.msra.mxu1 %v895_v14  ;;  %v840_v14 = vld [vmem:[#allocation5 + $0x18] sm:$0xff]  ;;  %1123 = vmatprep.subr.mxu0 %v838_v13  ;;  %v1046_v13 = vld [vmem:[#allocation5 + $0x688] sm:$0xff] }
  0xfb   : > { %1224 = vmatprep.subr.mxu1 %v888_v35  ;;  %v839_v35 = vld [vmem:[#allocation5 + $0x10] sm:$0xff]  ;;  %1124 = vmatpush1.msra.mxu0 %v837_v15  ;;  %v1045_v15 = vld [vmem:[#allocation5 + $0x680] sm:$0xff] }
  0xfc   : > { %414 = vrot.lane.b32.xlu0 %v3254_v56, %s2822_s30  ;;  %430 = vrot.lane.b32.xlu1 %v3257_v57, %s2822_s30 }
  0xfd   : > { %1225 = vmatpush1.msra.mxu1 %v887_v41  ;;  %v1088_v41 = vld [vmem:[#allocation5 + $0x7d8] sm:$0xff]  ;;  %1125 = vmatprep.subr.mxu0 %v1086_v40  ;;  %v1038_v40 = vld [vmem:[#allocation5 + $0x648] sm:$0xff] }
  0xfe   : > { %1226 = vmatprep.subr.mxu1 %v880_v43  ;;  %v1087_v43 = vld [vmem:[#allocation5 + $0x7d0] sm:$0xff]  ;;  %1126 = vmatpush2.msra.mxu0 %v1085_v42  ;;  %v3281_v42 = vpop.permute.xlu1 %659 }
  0xff   : > { %1227 = vmatpush1.msra.mxu1 %v879_v45  ;;  %v1080_v45 = vld [vmem:[#allocation5 + $0x798] sm:$0xff]  ;;  %1127 = vmatprep.subr.mxu0 %v1078_v19  ;;  %v1037_v19 = vld [vmem:[#allocation5 + $0x640] sm:$0xff] }
 0x100   : > { %416 = vrot.lane.b32.xlu0 %v3268_v60, %s2822_s30  ;;  %432 = vrot.lane.b32.xlu1 %v3271_v61, %s2822_s30 }
 0x101   : > { %1228 = vmatprep.subr.mxu1 %v872_v48  ;;  %v1079_v48 = vld [vmem:[#allocation5 + $0x790] sm:$0xff]  ;;  %1128 = vmatpush2.msra.mxu0 %v1077_v47  ;;  %v1030_v47 = vld [vmem:[#allocation5 + $0x608] sm:$0xff] }
 0x102   : > { %1229 = vmatpush1.msra.mxu1 %v871_v53  ;;  %v1072_v53 = vld [vmem:[#allocation5 + $0x758] sm:$0xff]  ;;  %1129 = vmatprep.subr.mxu0 %v1070_v50  ;;  %v1029_v50 = vld [vmem:[#allocation5 + $0x600] sm:$0xff] }
 0x103   : > { %1230 = vmatprep.subr.mxu1 %v864_v55  ;;  %v1071_v55 = vld [vmem:[#allocation5 + $0x750] sm:$0xff]  ;;  %1130 = vmatpush2.msra.mxu0 %v1069_v54  ;;  %v1022_v54 = vld [vmem:[#allocation5 + $0x5c8] sm:$0xff] }
 0x104   : > { %1231 = vmatpush1.msra.mxu1 %v863_v59  ;;  %v1064_v59 = vld [vmem:[#allocation5 + $0x718] sm:$0xff]  ;;  %1131 = vmatprep.subr.mxu0 %v1062_v58  ;;  %v1021_v58 = vld [vmem:[#allocation5 + $0x5c0] sm:$0xff] }
 0x105   : > { %1232 = vmatprep.subr.mxu1 %v856_v63  ;;  %v3279_v63 = vpop.permute.xlu0 %542  ;;  %1132 = vmatpush2.msra.mxu0 %v1061_v0  ;;  %v3285_v0 = vpop.permute.xlu1 %708 }
 0x106   : > { %1233 = vmatpush1.msra.mxu1 %v855_v3  ;;  %v1063_v3 = vld [vmem:[#allocation5 + $0x710] sm:$0xff]  ;;  %1133 = vmatprep.subr.mxu0 %v1054_v4  ;;  %v1014_v4 = vld [vmem:[#allocation5 + $0x588] sm:$0xff] }
 0x107   : > { %1234 = vmatprep.subr.mxu1 %v848_v6  ;;  %v1056_v6 = vld [vmem:[#allocation5 + $0x6d8] sm:$0xff]  ;;  %1134 = vmatpush2.msra.mxu0 %v1053_v11  ;;  %v1013_v11 = vld [vmem:[#allocation5 + $0x580] sm:$0xff] }
 0x108   : > { %1235 = vmatpush1.msra.mxu1 %v847_v12  ;;  %v1055_v12 = vld [vmem:[#allocation5 + $0x6d0] sm:$0xff]  ;;  %1135 = vmatprep.subr.mxu0 %v1046_v13  ;;  %v1006_v13 = vld [vmem:[#allocation5 + $0x548] sm:$0xff] }
 0x109   : > { %1236 = vmatprep.subr.mxu1 %v840_v14  ;;  %v1048_v14 = vld [vmem:[#allocation5 + $0x698] sm:$0xff]  ;;  %1136 = vmatpush2.msra.mxu0 %v1045_v15  ;;  %v1005_v15 = vld [vmem:[#allocation5 + $0x540] sm:$0xff] }
 0x10a   : > { %1237 = vmatpush1.msra.mxu1 %v839_v35  ;;  %v1047_v35 = vld [vmem:[#allocation5 + $0x690] sm:$0xff]  ;;  %1137 = vmatprep.subr.mxu0 %v1038_v40 }
 0x10b   : > { %1238 = vmatprep.subr.mxu1 %v1088_v41  ;;  %v1040_v41 = vld [vmem:[#allocation5 + $0x658] sm:$0xff]  ;;  %1138 = vmatpush2.msra.mxu0 %v1037_v19  ;;  %v998_v19 = vld [vmem:[#allocation5 + $0x508] sm:$0xff] }
 0x10c   : > { %1239 = vmatpush2.msra.mxu1 %v1087_v43  ;;  %v3283_v43 = vpop.permute.xlu0 %692  ;;  %1139 = vmatprep.subr.mxu0 %v1030_v47  ;;  %v997_v47 = vld [vmem:[#allocation5 + $0x500] sm:$0xff] }
 0x10d   : > { %1240 = vmatprep.subr.mxu1 %v1080_v45  ;;  %v1039_v45 = vld [vmem:[#allocation5 + $0x650] sm:$0xff]  ;;  %1140 = vmatpush2.msra.mxu0 %v1029_v50  ;;  %v990_v50 = vld [vmem:[#allocation5 + $0x4c8] sm:$0xff] }
 0x10e   : > { %1241 = vmatpush2.msra.mxu1 %v1079_v48  ;;  %v1032_v48 = vld [vmem:[#allocation5 + $0x618] sm:$0xff]  ;;  %1141 = vmatprep.subr.mxu0 %v1022_v54  ;;  %v989_v54 = vld [vmem:[#allocation5 + $0x4c0] sm:$0xff] }
 0x10f   : > { %1242 = vmatprep.subr.mxu1 %v1072_v53  ;;  %v1031_v53 = vld [vmem:[#allocation5 + $0x610] sm:$0xff]  ;;  %1142 = vmatpush2.msra.mxu0 %v1021_v58  ;;  %v982_v58 = vld [vmem:[#allocation5 + $0x488] sm:$0xff] }
 0x110   : > { %1243 = vmatpush2.msra.mxu1 %v1071_v55  ;;  %v1024_v55 = vld [vmem:[#allocation5 + $0x5d8] sm:$0xff]  ;;  %1143 = vmatprep.subr.mxu0 %v1014_v4  ;;  %v981_v4 = vld [vmem:[#allocation5 + $0x480] sm:$0xff] }
 0x111   : > { %1244 = vmatprep.subr.mxu1 %v1064_v59  ;;  %v1023_v59 = vld [vmem:[#allocation5 + $0x5d0] sm:$0xff]  ;;  %1144 = vmatpush2.msra.mxu0 %v1013_v11 }
 0x112   : > { %1245 = vmatpush2.msra.mxu1 %v1063_v3  ;;  %v3287_v3 = vpop.permute.xlu0 %547  ;;  %1145 = vmatprep.subr.mxu0 %v1006_v13  ;;  %v974_v13 = vld [vmem:[#allocation5 + $0x448] sm:$0xff] }
 0x113   : > { %1246 = vmatprep.subr.mxu1 %v1056_v6  ;;  %v1016_v6 = vld [vmem:[#allocation5 + $0x598] sm:$0xff]  ;;  %1146 = vmatpush2.msra.mxu0 %v1005_v15 }
 0x114   : > { %1247 = vmatpush2.msra.mxu1 %v1055_v12  ;;  %v1015_v12 = vld [vmem:[#allocation5 + $0x590] sm:$0xff]  ;;  %1147 = vmatprep.subr.mxu0 %v998_v19  ;;  %v973_v19 = vld [vmem:[#allocation5 + $0x440] sm:$0xff] }
 0x115   : > { %1248 = vmatprep.subr.mxu1 %v1048_v14  ;;  %v1008_v14 = vld [vmem:[#allocation5 + $0x558] sm:$0xff]  ;;  %1148 = vmatpush2.msra.mxu0 %v997_v47 }
 0x116   : > { %1249 = vmatpush2.msra.mxu1 %v1047_v35  ;;  %v1007_v35 = vld [vmem:[#allocation5 + $0x550] sm:$0xff]  ;;  %v3289_v40 = vpop.permute.xlu0 %661  ;;  %1149 = vmatprep.subr.mxu0 %v990_v50  ;;  %v966_v50 = vld [vmem:[#allocation5 + $0x408] sm:$0xff] }
 0x117   : > { %1250 = vmatprep.subr.mxu1 %v1040_v41  ;;  %v3291_v41 = vpop.permute.xlu1 %645  ;;  %1150 = vmatpush2.msra.mxu0 %v989_v54  ;;  %v965_v54 = vld [vmem:[#allocation5 + $0x400] sm:$0xff] }
 0x118   : > { %1251 = vmatpush2.msra.mxu1 %v1039_v45  ;;  %v1000_v45 = vld [vmem:[#allocation5 + $0x518] sm:$0xff]  ;;  %1151 = vmatprep.subr.mxu0 %v982_v58 }
 0x119   : > { %1252 = vmatprep.subr.mxu1 %v1032_v48  ;;  %v999_v48 = vld [vmem:[#allocation5 + $0x510] sm:$0xff]  ;;  %1152 = vmatpush2.msra.mxu0 %v981_v4 }
 0x11a   : > { %1253 = vmatpush2.msra.mxu1 %v1031_v53  ;;  %v992_v53 = vld [vmem:[#allocation5 + $0x4d8] sm:$0xff]  ;;  %1153 = vmatprep.subr.mxu0 %v974_v13 }
 0x11b   : > { %1254 = vmatprep.subr.mxu1 %v1024_v55  ;;  %v991_v55 = vld [vmem:[#allocation5 + $0x4d0] sm:$0xff]  ;;  %1154 = vmatpush2.msra.mxu0 %v973_v19 }
 0x11c   : > { %1255 = vmatpush2.msra.mxu1 %v1023_v59  ;;  %v984_v59 = vld [vmem:[#allocation5 + $0x498] sm:$0xff]  ;;  %1155 = vmatprep.subr.mxu0 %v966_v50 }
 0x11d   : > { %1256 = vmatprep.subr.mxu1 %v1016_v6  ;;  %v983_v6 = vld [vmem:[#allocation5 + $0x490] sm:$0xff]  ;;  %1156 = vmatpush2.msra.mxu0 %v965_v54  ;;  %v333_v50 = vld [vmem:[%s3109_s14 + $0x38] sm:$0xff] }
 0x11e   : > { %1257 = vmatpush2.msra.mxu1 %v1015_v12 }
 0x11f   : > { %1258 = vmatprep.subr.mxu1 %v1008_v14  ;;  %v976_v14 = vld [vmem:[#allocation5 + $0x458] sm:$0xff] }
 0x120   : > { %1259 = vmatpush2.msra.mxu1 %v1007_v35 }
 0x121   : > { %1260 = vmatprep.subr.mxu1 %v1000_v45  ;;  %v975_v45 = vld [vmem:[#allocation5 + $0x450] sm:$0xff] }
 0x122   : > { %1261 = vmatpush2.msra.mxu1 %v999_v48 }
 0x123   : > { %1262 = vmatprep.subr.mxu1 %v992_v53  ;;  %v968_v53 = vld [vmem:[#allocation5 + $0x418] sm:$0xff] }
 0x124   : > { %1263 = vmatpush2.msra.mxu1 %v991_v55  ;;  %v967_v55 = vld [vmem:[#allocation5 + $0x410] sm:$0xff] }
 0x125   : > { %1264 = vmatprep.subr.mxu1 %v984_v59  ;;  %v638_v59 = vmul.f32 %v3116_v39, %v3075_v31  ;;  %v639_v31 = vmul.f32 %v3098_v36, %v3088_v34 }
 0x126   : > { %1265 = vmatpush2.msra.mxu1 %v983_v6 }
 0x127   : > { %1266 = vmatprep.subr.mxu1 %v976_v14  ;;  %v332_v14 = vld [vmem:[%s3109_s14 + $0x30] sm:$0xff] }
 0x128   : > { %1267 = vmatpush2.msra.mxu1 %v975_v45 }
 0x129   : > { %1268 = vmatprep.subr.mxu1 %v968_v53  ;;  %v3355_v53 = vmul.f32 %v3116_v39, %v3101_v37 }
 0x12a   : > { %1269 = vmatpush2.msra.mxu1 %v967_v55 }
 0x13a   : > { %v403_v11 = vpop.permute.xlu0 %402  ;;  %v419_v12 = vpop.permute.xlu1 %418 }
 0x13b   : > { %v435_v15 = vsel %vm434_vm2, %v403_v11, %v419_v12  ;;  %v443_v35 = vsel %vm434_vm2, %v419_v12, %v403_v11  ;;  %v964_v11 = vld [vmem:[#allocation5 + $0x3f8] sm:$0xff] }
 0x13c   : > { %v3299_v47 = vadd.f32 %v443_v35, %v3143_v51  ;;  %v3302_v48 = vadd.f32 %v435_v15, %v3146_v52  ;;  %v636_v51 = vmul.f32 %v3116_v39, %v3065_v29  ;;  %v331_v52 = vld [vmem:[%s3109_s14 + $0x28] sm:$0xff]  ;;  %v637_v29 = vmul.f32 %v3098_v36, %v3078_v32  ;;  %1432 = vmatprep.subr.mxu1 %v964_v11 }
 0x13d   : > { %v640_v15 = vmul.f32 %v3116_v39, %v3085_v33  ;;  %v3359_v33 = vmul.f32 %v3098_v36, %v3104_v38 }
 0x13e   : > { %467 = vrot.lane.b32.xlu0 %v3299_v47, %s2823_s27  ;;  %483 = vrot.lane.b32.xlu1 %v3302_v48, %s2823_s27  ;;  %v3314_v58 = vpop.permute.xlu0 %710  ;;  %v3321_v4 = vpop.permute.xlu1 %694 }
 0x142   : > { %700 = vrot.lane.b32.xlu0 %v3174_v1, %s2821_s26  ;;  %667 = vrot.lane.b32.xlu1 %v636_v51, %s2820_s16  ;;  %v3323_v6 = vpop.permute.xlu0 %647  ;;  %v962_v1 = vld [vmem:[#allocation5 + $0x3e8] sm:$0xff] }
 0x143   : > { %1319 = vmatprep.subr.mxu0 %v962_v1 }
 0x146   : > { %567 = vperm.xlu0 %2670, %v331_v52   ;;  %716 = vrot.lane.b32.xlu1 %v636_v51, %s2821_s26  ;;  %v3333_v32 = vpop.permute.xlu0 %696 }
 0x14a   : > { %669 = vrot.lane.b32.xlu0 %v638_v59, %s2820_s16  ;;  %653 = vrot.lane.b32.xlu1 %v637_v29, %s2820_s16 }
 0x14b   : > { %v3327_v12 = vpop.permute.xlu1 %552 }
 0x14e   : > { %718 = vrot.lane.b32.xlu0 %v638_v59, %s2821_s26  ;;  %702 = vrot.lane.b32.xlu1 %v637_v29, %s2821_s26 }
 0x14f   : > { %v3335_v13 = vpop.permute.xlu1 %663 }
 0x152   : > { %655 = vrot.lane.b32.xlu0 %v639_v31, %s2820_s16  ;;  %572 = vperm.xlu1 %2671, %v332_v14  }
 0x153   : > { %v3341_v35 = vpop.permute.xlu0 %557  ;;  %v3343_v19 = vpop.permute.xlu1 %712 }
 0x154   : > { %v735_v23 = vsel %vm724_vm4, %v3343_v19, %v3333_v32 }
 0x156   : > { %704 = vrot.lane.b32.xlu0 %v639_v31, %s2821_s26  ;;  %671 = vrot.lane.b32.xlu1 %v640_v15, %s2820_s16 }
 0x157   : > { %v3347_v34 = vpop.permute.xlu0 %665  ;;  %v3349_v45 = vpop.permute.xlu1 %649 }
 0x15a   : > { %577 = vperm.xlu0 %2670, %v333_v50   ;;  %720 = vrot.lane.b32.xlu1 %v640_v15, %s2821_s26 }
 0x15b   : > { %v3361_v54 = vpop.permute.xlu0 %714  ;;  %v3363_v55 = vpop.permute.xlu1 %698 }
 0x15e   : > { %673 = vrot.lane.b32.xlu0 %v3355_v53, %s2820_s16  ;;  %657 = vrot.lane.b32.xlu1 %v3359_v33, %s2820_s16  ;;  %s2824_s16 = smov [#allocation7]  }
 0x15f   : > { %v3369_v51 = vpop.permute.xlu0 %651  ;;  %v3371_v52 = vpop.permute.xlu1 %562 }
 0x163   : > { %v405_v37 = vpop.permute.xlu0 %404  ;;  %v421_v39 = vpop.permute.xlu1 %420 }
 0x164   : > { %v436_v36 = vsel %vm434_vm2, %v405_v37, %v421_v39  ;;  %v444_v38 = vsel %vm434_vm2, %v421_v39, %v405_v37 }
 0x165   : > { %v3378_v59 = vadd.f32 %v444_v38, %v3184_v9  ;;  %v3381_v29 = vadd.f32 %v436_v36, %v3187_v10 }
 0x167   : > { %v407_v1 = vpop.permute.xlu0 %406  ;;  %469 = vrot.lane.b32.xlu0 %v3378_v59, %s2823_s27  ;;  %485 = vrot.lane.b32.xlu1 %v3381_v29, %s2823_s27  ;;  %v423_v11 = vpop.permute.xlu1 %422 }
 0x168   : > { %v437_v31 = vsel %vm434_vm2, %v407_v1, %v423_v11  ;;  %v445_v14 = vsel %vm434_vm2, %v423_v11, %v407_v1 }
 0x169   : > { %v3392_v9 = vadd.f32 %v445_v14, %v3198_v2  ;;  %v3395_v10 = vadd.f32 %v437_v31, %v3201_v5 }
 0x16b   : > { %v409_v15 = vpop.permute.xlu0 %408  ;;  %471 = vrot.lane.b32.xlu1 %v3392_v9, %s2823_s27  ;;  %487 = vrot.lane.b32.xlu0 %v3395_v10, %s2823_s27  ;;  %v425_v50 = vpop.permute.xlu1 %424 }
 0x16c   : > { %v438_v37 = vsel %vm434_vm2, %v409_v15, %v425_v50  ;;  %v446_v39 = vsel %vm434_vm2, %v425_v50, %v409_v15 }
 0x16d   : > { %v3406_v2 = vadd.f32 %v446_v39, %v3212_v8  ;;  %v3409_v5 = vadd.f32 %v438_v37, %v3215_v7 }
 0x16f   : > { %v411_v36 = vpop.permute.xlu0 %410  ;;  %473 = vrot.lane.b32.xlu0 %v3406_v2, %s2823_s27  ;;  %489 = vrot.lane.b32.xlu1 %v3409_v5, %s2823_s27  ;;  %v427_v38 = vpop.permute.xlu1 %426 }
 0x170   : > { %v439_v1 = vsel %vm434_vm2, %v411_v36, %v427_v38  ;;  %v447_v11 = vsel %vm434_vm2, %v427_v38, %v411_v36 }
 0x171   : > { %v3420_v8 = vadd.f32 %v447_v11, %v3226_v44  ;;  %v3423_v7 = vadd.f32 %v439_v1, %v3229_v20 }
 0x173   : > { %v413_v31 = vpop.permute.xlu0 %412  ;;  %475 = vrot.lane.b32.xlu1 %v3420_v8, %s2823_s27  ;;  %491 = vrot.lane.b32.xlu0 %v3423_v7, %s2823_s27  ;;  %v429_v14 = vpop.permute.xlu1 %428 }
 0x174   : > { %v440_v15 = vsel %vm434_vm2, %v413_v31, %v429_v14  ;;  %v448_v50 = vsel %vm434_vm2, %v429_v14, %v413_v31 }
 0x175   : > { %v3434_v44 = vadd.f32 %v448_v50, %v3240_v30  ;;  %v3437_v20 = vadd.f32 %v440_v15, %v3243_v49  ;;  %v334_v15 = vld [vmem:[%s5430_s3] sm:$0x3] }
 0x177   : > { %v415_v37 = vpop.permute.xlu0 %414  ;;  %477 = vrot.lane.b32.xlu0 %v3434_v44, %s2823_s27  ;;  %493 = vrot.lane.b32.xlu1 %v3437_v20, %s2823_s27  ;;  %v431_v39 = vpop.permute.xlu1 %430 }
 0x178   : > { %v441_v36 = vsel %vm434_vm2, %v415_v37, %v431_v39  ;;  %v449_v38 = vsel %vm434_vm2, %v431_v39, %v415_v37 }
 0x179   : > { %v3448_v30 = vadd.f32 %v449_v38, %v3254_v56  ;;  %v3451_v49 = vadd.f32 %v441_v36, %v3257_v57  ;;  %v3501_v36 = vrot.slane %v334_v15, %v3023_v17  ;;  %v873_v17 = vld [vmem:[#allocation5 + $0x120] sm:$0xff] }
 0x17b   : > { %v417_v1 = vpop.permute.xlu0 %416  ;;  %479 = vrot.lane.b32.xlu1 %v3448_v30, %s2823_s27  ;;  %495 = vrot.lane.b32.xlu0 %v3451_v49, %s2823_s27  ;;  %v433_v11 = vpop.permute.xlu1 %432 }
 0x17c   : > { %v442_v31 = vsel %vm434_vm2, %v417_v1, %v433_v11  ;;  %v450_v14 = vsel %vm434_vm2, %v433_v11, %v417_v1 }
 0x17d   : > { %v3462_v56 = vadd.f32 %v450_v14, %v3268_v60  ;;  %v3465_v57 = vadd.f32 %v442_v31, %v3271_v61  ;;  %v676_v60 = vsel %vm675_vm3, %v3277_v62, %v3281_v42  ;;  %v684_v61 = vsel %vm675_vm3, %v3281_v42, %v3277_v62 }
 0x17e   : > { %v3498_v42 = vrot.slane %v334_v15, %v3021_v16  ;;  %v875_v16 = vld [vmem:[#allocation5 + $0x130] sm:$0xff] }
 0x17f   : > { %481 = vrot.lane.b32.xlu0 %v3462_v56, %s2823_s27  ;;  %497 = vrot.lane.b32.xlu1 %v3465_v57, %s2823_s27 }
 0x183   : > { %722 = vrot.lane.b32.xlu0 %v3355_v53, %s2821_s26  ;;  %706 = vrot.lane.b32.xlu1 %v3359_v33, %s2821_s26  ;;  %v725_v53 = vsel %vm724_vm4, %v3283_v43, %v3285_v0  ;;  %v733_v33 = vsel %vm724_vm4, %v3285_v0, %v3283_v43  ;;  %s2746_s26 = sshll.u32 %s2824_s16, 4  ;;  %s2747_s26 = int_to_ptr.vmem [resolvable:$false] %s2746_s26 }
 0x184   : > { %v741_v50 = vadd.f32 %v725_v53, %v684_v61  ;;  %v742_v37 = vadd.f32 %v733_v33, %v676_v60 }
 0x186   : > { %v2576_v38 = vadd.f32 -1.0, %v741_v50  ;;  %v2577_v1 = vadd.f32 -1.0, %v742_v37  ;;  %v2672_v37 = vld [vmem:[%s2981_s19 + $0x8] sm:$0xff] }
 0x188   : > { %v773_v60 = vmul.f32 %v2576_v38, %v3498_v42  ;;  %v774_v61 = vmul.f32 %v2577_v1, %v3501_v36 }
 0x18a   : > { %v790_v50 = vadd.f32 1.0, %v774_v61  ;;  %v946_v61 = vld [vmem:[#allocation5 + $0x368] sm:$0xff] }
 0x1b0   : > { %v468_v39 = vpop.permute.xlu0 %467  ;;  %v484_v62 = vpop.permute.xlu1 %483 }
 0x1b1   : > { %v500_v43 = vsel %vm499_vm5, %v468_v39, %v484_v62  ;;  %v508_v0 = vsel %vm499_vm5, %v484_v62, %v468_v39  ;;  %v789_v62 = vadd.f32 1.0, %v773_v60  ;;  %v955_v60 = vld [vmem:[#allocation5 + $0x3b0] sm:$0xff] }
 0x1b2   : > { %v516_v11 = vadd.f32 %v508_v0, %v3299_v47  ;;  %v517_v31 = vadd.f32 %v500_v43, %v3302_v48  ;;  %v2673_v47 = vld [vmem:[%s2981_s19] sm:$0xff] }
 0x1b4   : > { %v532_v14 = vadd.f32 %v517_v31, %v516_v11  ;;  %v3512_v33 = vpop.permute.xlu1 %667  ;;  %v3522_v38 = vpop.permute.xlu0 %700  ;;  %v963_v11 = vld [vmem:[#allocation5 + $0x3f0] sm:$0xff]  ;;  %v954_v31 = vld [vmem:[#allocation5 + $0x3a8] sm:$0xff] }
 0x1b6   : > { %v580_v53 = vmul.f32 %v3279_v63, %v532_v14  ;;  %v961_v63 = vld [vmem:[#allocation5 + $0x3e0] sm:$0xff]  ;;  %v956_v14 = vld [vmem:[#allocation5 + $0x3b8] sm:$0xff] }
 0x1b8   : > { %v599_v15 = vmul.f32 %v3498_v42, %v580_v53  ;;  %v600_v39 = vmul.f32 %v3501_v36, %v580_v53  ;;  %v3524_v1 = vpop.permute.xlu1 %716  ;;  %v948_v53 = vld [vmem:[#allocation5 + $0x378] sm:$0xff] }
 0x1ba   : > { %v806_v22 = vsub.f32 %v2672_v37, %v600_v39  ;;  %v805_v0 = vsub.f32 %v2673_v47, %v599_v15  ;;  %v945_v39 = vld [vmem:[#allocation5 + $0x360] sm:$0xff]  ;;  %v940_v37 = vld [vmem:[#allocation5 + $0x338] sm:$0xff] }
 0x1bc   : > { %v3518_v48 = vmul.f32 %v806_v22, %v790_v50  ;;  %v3520_v43 = vmul.f32 %v805_v0, %v789_v62  ;;  %v953_v22 = vld [vmem:[#allocation5 + $0x3a0] sm:$0xff]  ;;  %v947_v62 = vld [vmem:[#allocation5 + $0x370] sm:$0xff]  ;;  %v938_v50 = vld [vmem:[#allocation5 + $0x328] sm:$0xff]  ;;  %v3532_v47 = vpop.permute.xlu1 %653 }
 0x1bd   : > { %v937_v0 = vld [vmem:[#allocation5 + $0x320] sm:$0xff] }
 0x1be   : > { %5605 = vst [vmem:[#allocation20_spill] sm:$0xff] %v3520_v43  ;;  %1157 = vmatprep.mubr.f32.mxu0 %v3518_v48  ;;  %1270 = vmatprep.mubr.f32.mxu1 %v3518_v48 }
 0x1bf   : > { %1158 = vmatmul.mubr.f32.vlgmr.msra.gmra.mxu0 %v3520_v43  ;;  %1271 = vmatmul.mubr.f32.vlgmr.msra.gmra.mxu1 %v3520_v43 }
 0x1c0   : > { %1320 = vmatpush1.msra.mxu0 %v961_v63  ;;  %1433 = vmatpush1.msra.mxu1 %v963_v11  ;;  %v930_v63 = vld [vmem:[#allocation5 + $0x2e8] sm:$0xff]  ;;  %v932_v11 = vld [vmem:[#allocation5 + $0x2f8] sm:$0xff]  ;;  %v3536_v27 = vpop.permute.xlu1 %702 }
 0x1c1   : > { %v3530_v15 = vpop.permute.xlu0 %567  ;;  %1321 = vmatprep.subr.mxu0 %v954_v31  ;;  %1434 = vmatprep.subr.mxu1 %v956_v14  ;;  %v929_v31 = vld [vmem:[#allocation5 + $0x2e0] sm:$0xff]  ;;  %v931_v14 = vld [vmem:[#allocation5 + $0x2f0] sm:$0xff] }
 0x1c2   : > { %1322 = vmatpush1.msra.mxu0 %v953_v22  ;;  %1435 = vmatpush1.msra.mxu1 %v955_v60  ;;  %v922_v22 = vld [vmem:[#allocation5 + $0x2a8] sm:$0xff]  ;;  %v924_v60 = vld [vmem:[#allocation5 + $0x2b8] sm:$0xff] }
 0x1c3   : > { %1323 = vmatprep.subr.mxu0 %v946_v61  ;;  %1436 = vmatprep.subr.mxu1 %v948_v53  ;;  %v921_v61 = vld [vmem:[#allocation5 + $0x2a0] sm:$0xff]  ;;  %v923_v53 = vld [vmem:[#allocation5 + $0x2b0] sm:$0xff] }
 0x1c4   : > { %1324 = vmatpush1.msra.mxu0 %v945_v39  ;;  %1437 = vmatpush1.msra.mxu1 %v947_v62  ;;  %v914_v39 = vld [vmem:[#allocation5 + $0x268] sm:$0xff]  ;;  %v916_v62 = vld [vmem:[#allocation5 + $0x278] sm:$0xff] }
 0x1c5   : > { %v3534_v28 = vpop.permute.xlu0 %669  ;;  %1325 = vmatprep.subr.mxu0 %v938_v50  ;;  %1438 = vmatprep.subr.mxu1 %v940_v37  ;;  %v913_v50 = vld [vmem:[#allocation5 + $0x260] sm:$0xff]  ;;  %v915_v37 = vld [vmem:[#allocation5 + $0x270] sm:$0xff] }
 0x1c6   : > { %1326 = vmatpush1.msra.mxu0 %v937_v0  ;;  %1439 = vmatpush1.msra.mxu1 %v939_v21  ;;  %v906_v21 = vld [vmem:[#allocation5 + $0x228] sm:$0xff]  ;;  %v908_v0 = vld [vmem:[#allocation5 + $0x238] sm:$0xff] }
 0x1c7   : > { %1327 = vmatprep.subr.mxu0 %v930_v63  ;;  %1440 = vmatprep.subr.mxu1 %v932_v11  ;;  %v905_v63 = vld [vmem:[#allocation5 + $0x220] sm:$0xff]  ;;  %v907_v11 = vld [vmem:[#allocation5 + $0x230] sm:$0xff] }
 0x1c8   : > { %1328 = vmatpush1.msra.mxu0 %v929_v31  ;;  %1441 = vmatpush1.msra.mxu1 %v931_v14  ;;  %v898_v31 = vld [vmem:[#allocation5 + $0x1e8] sm:$0xff]  ;;  %v900_v14 = vld [vmem:[#allocation5 + $0x1f8] sm:$0xff] }
 0x1c9   : > { %v3538_v26 = vpop.permute.xlu0 %718  ;;  %1329 = vmatprep.subr.mxu0 %v922_v22  ;;  %1442 = vmatprep.subr.mxu1 %v924_v60  ;;  %v897_v22 = vld [vmem:[#allocation5 + $0x1e0] sm:$0xff]  ;;  %v899_v60 = vld [vmem:[#allocation5 + $0x1f0] sm:$0xff] }
 0x1ca   : > { %1330 = vmatpush1.msra.mxu0 %v921_v61  ;;  %1443 = vmatpush1.msra.mxu1 %v923_v53  ;;  %v890_v61 = vld [vmem:[#allocation5 + $0x1a8] sm:$0xff]  ;;  %v892_v53 = vld [vmem:[#allocation5 + $0x1b8] sm:$0xff] }
 0x1cb   : > { %1331 = vmatprep.subr.mxu0 %v914_v39  ;;  %1444 = vmatprep.subr.mxu1 %v916_v62  ;;  %v889_v39 = vld [vmem:[#allocation5 + $0x1a0] sm:$0xff]  ;;  %v891_v62 = vld [vmem:[#allocation5 + $0x1b0] sm:$0xff] }
 0x1cc   : > { %1332 = vmatpush1.msra.mxu0 %v913_v50  ;;  %1445 = vmatpush1.msra.mxu1 %v915_v37  ;;  %v726_v50 = vsel %vm724_vm4, %v3321_v4, %v3314_v58  ;;  %v882_v37 = vld [vmem:[#allocation5 + $0x168] sm:$0xff] }
 0x1cd   : > { %v3540_v24 = vpop.permute.xlu0 %655  ;;  %v3542_v25 = vpop.permute.xlu1 %572  ;;  %1333 = vmatprep.subr.mxu0 %v906_v21  ;;  %1446 = vmatprep.subr.mxu1 %v908_v0  ;;  %v884_v21 = vld [vmem:[#allocation5 + $0x178] sm:$0xff]  ;;  %v734_v0 = vsel %vm724_vm4, %v3314_v58, %v3321_v4  ;;  %v874_v58 = vld [vmem:[#allocation5 + $0x128] sm:$0xff] }
 0x1ce   : > { %1334 = vmatpush1.msra.mxu0 %v905_v63  ;;  %1447 = vmatpush1.msra.mxu1 %v907_v11  ;;  %v876_v4 = vld [vmem:[#allocation5 + $0x138] sm:$0xff] }
 0x1cf   : > { %1335 = vmatprep.subr.mxu0 %v898_v31  ;;  %1448 = vmatprep.subr.mxu1 %v900_v14  ;;  %v881_v31 = vld [vmem:[#allocation5 + $0x160] sm:$0xff]  ;;  %v883_v14 = vld [vmem:[#allocation5 + $0x170] sm:$0xff] }
 0x1d0   : > { %1336 = vmatpush1.msra.mxu0 %v897_v22  ;;  %1449 = vmatpush1.msra.mxu1 %v899_v60  ;;  %v685_v22 = vsel %vm675_vm3, %v3289_v40, %v3291_v41  ;;  %v727_v60 = vsel %vm724_vm4, %v3333_v32, %v3343_v19  ;;  %v678_v32 = vsel %vm675_vm3, %v3323_v6, %v3335_v13 }
 0x1d1   : > { %v3552_v63 = vpop.permute.xlu0 %704  ;;  %v3554_v11 = vpop.permute.xlu1 %671  ;;  %1337 = vmatprep.subr.mxu0 %v890_v61  ;;  %1450 = vmatprep.subr.mxu1 %v892_v53  ;;  %v677_v61 = vsel %vm675_vm3, %v3291_v41, %v3289_v40  ;;  %v743_v53 = vadd.f32 %v726_v50, %v685_v22  ;;  %v728_v40 = vsel %vm724_vm4, %v3363_v55, %v3361_v54  ;;  %v866_v41 = vld [vmem:[#allocation5 + $0xe8] sm:$0xff] }
 0x1d2   : > { %1338 = vmatpush1.msra.mxu0 %v889_v39  ;;  %1451 = vmatpush1.msra.mxu1 %v891_v62  ;;  %v744_v18 = vadd.f32 %v734_v0, %v677_v61  ;;  %v686_v39 = vsel %vm675_vm3, %v3335_v13, %v3323_v6  ;;  %v868_v62 = vld [vmem:[#allocation5 + $0xf8] sm:$0xff]  ;;  %v736_v50 = vsel %vm724_vm4, %v3361_v54, %v3363_v55  ;;  %v865_v0 = vld [vmem:[#allocation5 + $0xe0] sm:$0xff]  ;;  %v858_v54 = vld [vmem:[#allocation5 + $0xa8] sm:$0xff] }
 0x1d3   : > { %1339 = vmatprep.subr.mxu0 %v882_v37  ;;  %1452 = vmatprep.subr.mxu1 %v884_v21  ;;  %v745_v19 = vadd.f32 %v727_v60, %v686_v39  ;;  %v687_v6 = vsel %vm675_vm3, %v3347_v34, %v3349_v45  ;;  %v729_v13 = vsel %vm724_vm4, %v3522_v38, %v3524_v1  ;;  %v860_v55 = vld [vmem:[#allocation5 + $0xb8] sm:$0xff] }
 0x1d4   : > { %1340 = vmatpush1.msra.mxu0 %v881_v31  ;;  %1453 = vmatpush1.msra.mxu1 %v883_v14  ;;  %v867_v31 = vld [vmem:[#allocation5 + $0xf0] sm:$0xff]  ;;  %v746_v14 = vadd.f32 %v735_v23, %v678_v32  ;;  %v679_v22 = vsel %vm675_vm3, %v3349_v45, %v3347_v34  ;;  %v747_v23 = vadd.f32 %v728_v40, %v687_v6  ;;  %v850_v34 = vld [vmem:[#allocation5 + $0x68] sm:$0xff]  ;;  %v852_v45 = vld [vmem:[#allocation5 + $0x78] sm:$0xff] }
 0x1d5   : > { %v3588_v37 = vpop.permute.xlu0 %577  ;;  %v3590_v21 = vpop.permute.xlu1 %720  ;;  %1341 = vmatprep.subr.mxu0 %v874_v58  ;;  %1454 = vmatprep.subr.mxu1 %v876_v4  ;;  %v737_v60 = vsel %vm724_vm4, %v3524_v1, %v3522_v38  ;;  %v857_v58 = vld [vmem:[#allocation5 + $0xa0] sm:$0xff]  ;;  %v859_v4 = vld [vmem:[#allocation5 + $0xb0] sm:$0xff]  ;;  %v748_v61 = vadd.f32 %v736_v50, %v679_v22  ;;  %v2578_v38 = vadd.f32 -1.0, %v743_v53  ;;  %v730_v39 = vsel %vm724_vm4, %v3536_v27, %v3538_v26  ;;  %v842_v50 = vld [vmem:[#allocation5 + $0x28] sm:$0xff] }
 0x1d6   : > { %1342 = vmatpush1.msra.mxu0 %v873_v17  ;;  %1455 = vmatpush1.msra.mxu1 %v875_v16  ;;  %v680_v16 = vsel %vm675_vm3, %v3369_v51, %v3512_v33  ;;  %v688_v17 = vsel %vm675_vm3, %v3512_v33, %v3369_v51  ;;  %v738_v40 = vsel %vm724_vm4, %v3538_v26, %v3536_v27  ;;  %v849_v51 = vld [vmem:[#allocation5 + $0x60] sm:$0xff]  ;;  %v851_v33 = vld [vmem:[#allocation5 + $0x70] sm:$0xff]  ;;  %v2579_v53 = vadd.f32 -1.0, %v744_v18 }
 0x1d7   : > { %1343 = vmatprep.subr.mxu0 %v866_v41  ;;  %1456 = vmatprep.subr.mxu1 %v868_v62  ;;  %v749_v1 = vadd.f32 %v729_v13, %v688_v17  ;;  %v750_v32 = vadd.f32 %v737_v60, %v680_v16  ;;  %v681_v26 = vsel %vm675_vm3, %v3532_v47, %v3534_v28  ;;  %v841_v6 = vld [vmem:[#allocation5 + $0x20] sm:$0xff]  ;;  %v843_v18 = vld [vmem:[#allocation5 + $0x30] sm:$0xff]  ;;  %v2581_v13 = vadd.f32 -1.0, %v746_v14  ;;  %v1092_v60 = vld [vmem:[#allocation5 + $0x7f8] sm:$0xff] }
 0x1d8   : > { %1344 = vmatpush1.msra.mxu0 %v865_v0  ;;  %1457 = vmatpush1.msra.mxu1 %v867_v31  ;;  %v844_v0 = vld [vmem:[#allocation5 + $0x38] sm:$0xff]  ;;  %v2580_v31 = vadd.f32 -1.0, %v745_v19  ;;  %v689_v27 = vsel %vm675_vm3, %v3534_v28, %v3532_v47  ;;  %v752_v22 = vadd.f32 %v738_v40, %v681_v26  ;;  %v1090_v19 = vld [vmem:[#allocation5 + $0x7e8] sm:$0xff]  ;;  %v1089_v28 = vld [vmem:[#allocation5 + $0x7e0] sm:$0xff] }
 0x1d9   : > { %v3624_v41 = vpop.permute.xlu0 %673  ;;  %v3626_v62 = vpop.permute.xlu1 %657  ;;  %1345 = vmatprep.subr.mxu0 %v858_v54  ;;  %1458 = vmatprep.subr.mxu1 %v860_v55  ;;  %v2582_v54 = vadd.f32 -1.0, %v747_v23  ;;  %v751_v55 = vadd.f32 %v730_v39, %v689_v27  ;;  %v2584_v16 = vadd.f32 -1.0, %v749_v1  ;;  %v1091_v47 = vld [vmem:[#allocation5 + $0x7f0] sm:$0xff]  ;;  %v2585_v14 = vadd.f32 -1.0, %v750_v32 }
 0x1da   : > { %1346 = vmatpush1.msra.mxu0 %v857_v58  ;;  %1459 = vmatpush1.msra.mxu1 %v859_v4  ;;  %v775_v58 = vmul.f32 %v2578_v38, %v3498_v42  ;;  %v2583_v4 = vadd.f32 -1.0, %v748_v61  ;;  %v1082_v38 = vld [vmem:[#allocation5 + $0x7a8] sm:$0xff]  ;;  %v1084_v61 = vld [vmem:[#allocation5 + $0x7b8] sm:$0xff]  ;;  %v3643_v1 = vmul.f32 %v2580_v31, %v3498_v42 }
 0x1db   : > { %1347 = vmatprep.subr.mxu0 %v850_v34  ;;  %1460 = vmatprep.subr.mxu1 %v852_v45  ;;  %v776_v34 = vmul.f32 %v2579_v53, %v3501_v36  ;;  %v3648_v53 = vmul.f32 %v2581_v13, %v3501_v36  ;;  %v2586_v32 = vadd.f32 -1.0, %v751_v55  ;;  %v1076_v31 = vld [vmem:[#allocation5 + $0x778] sm:$0xff]  ;;  %v1075_v13 = vld [vmem:[#allocation5 + $0x770] sm:$0xff] }
 0x1dc   : > { %1348 = vmatpush1.msra.mxu0 %v849_v51  ;;  %1461 = vmatpush1.msra.mxu1 %v851_v33  ;;  %v1081_v51 = vld [vmem:[#allocation5 + $0x7a0] sm:$0xff]  ;;  %v1083_v33 = vld [vmem:[#allocation5 + $0x7b0] sm:$0xff] }
 0x1dd   : > { %v470_v17 = vpop.permute.xlu0 %469  ;;  %v486_v43 = vpop.permute.xlu1 %485  ;;  %1349 = vmatprep.subr.mxu0 %v842_v50  ;;  %1462 = vmatprep.subr.mxu1 %v844_v0  ;;  %v2587_v50 = vadd.f32 -1.0, %v752_v22  ;;  %v1074_v0 = vld [vmem:[#allocation5 + $0x768] sm:$0xff] }
 0x1de   : > { %v501_v23 = vsel %vm499_vm5, %v470_v17, %v486_v43  ;;  %v509_v45 = vsel %vm499_vm5, %v486_v43, %v470_v17  ;;  %1350 = vmatpush1.msra.mxu0 %v841_v6  ;;  %1463 = vmatpush1.msra.mxu1 %v843_v18  ;;  %v3651_v43 = vmul.f32 %v2582_v54, %v3498_v42  ;;  %v1073_v18 = vld [vmem:[#allocation5 + $0x760] sm:$0xff] }
 0x1df   : > { %v518_v39 = vadd.f32 %v509_v45, %v3378_v59  ;;  %v519_v40 = vadd.f32 %v501_v23, %v3381_v29  ;;  %1351 = vmatprep.subr.mxu0 %v1090_v19  ;;  %1464 = vmatprep.subr.mxu1 %v1092_v60  ;;  %v3654_v59 = vmul.f32 %v2583_v4, %v3501_v36  ;;  %v1066_v19 = vld [vmem:[#allocation5 + $0x728] sm:$0xff]  ;;  %v1068_v60 = vld [vmem:[#allocation5 + $0x738] sm:$0xff] }
 0x1e0   : > { %1352 = vmatpush2.msra.mxu0 %v1089_v28  ;;  %1465 = vmatpush2.msra.mxu1 %v1091_v47  ;;  %v3657_v29 = vmul.f32 %v2584_v16, %v3498_v42  ;;  %v3660_v54 = vmul.f32 %v2585_v14, %v3501_v36  ;;  %v1065_v28 = vld [vmem:[#allocation5 + $0x720] sm:$0xff]  ;;  %v1067_v47 = vld [vmem:[#allocation5 + $0x730] sm:$0xff]  ;;  %v3670_v14 = vmul.f32 %v2586_v32, %v3498_v42  ;;  %v792_v32 = vadd.f32 1.0, %v776_v34 }
 0x1e1   : > { %v533_v26 = vadd.f32 %v519_v40, %v518_v39  ;;  %v488_v27 = vpop.permute.xlu0 %487  ;;  %v472_v6 = vpop.permute.xlu1 %471  ;;  %1353 = vmatprep.subr.mxu0 %v1082_v38  ;;  %1466 = vmatprep.subr.mxu1 %v1084_v61  ;;  %v3673_v23 = vmul.f32 %v2587_v50, %v3501_v36  ;;  %v3679_v45 = vsel %vm675_vm3, %v3540_v24, %v3554_v11 }
 0x1e2   : > { %v502_v55 = vsel %vm499_vm5, %v472_v6, %v488_v27  ;;  %v510_v22 = vsel %vm499_vm5, %v488_v27, %v472_v6  ;;  %1354 = vmatpush2.msra.mxu0 %v1081_v51  ;;  %1467 = vmatpush2.msra.mxu1 %v1083_v33  ;;  %v1060_v51 = vld [vmem:[#allocation5 + $0x6f8] sm:$0xff]  ;;  %v1057_v33 = vld [vmem:[#allocation5 + $0x6e0] sm:$0xff]  ;;  %v690_v50 = vsel %vm675_vm3, %v3554_v11, %v3540_v24  ;;  %v1050_v24 = vld [vmem:[#allocation5 + $0x6a8] sm:$0xff] }
 0x1e3   : > { %v581_v4 = vmul.f32 %v3287_v3, %v533_v26  ;;  %v520_v16 = vadd.f32 %v510_v22, %v3392_v9  ;;  %v521_v17 = vadd.f32 %v502_v55, %v3395_v10  ;;  %1355 = vmatprep.subr.mxu0 %v1074_v0  ;;  %1468 = vmatprep.subr.mxu1 %v1076_v31  ;;  %v1058_v3 = vld [vmem:[#allocation5 + $0x6e8] sm:$0xff]  ;;  %v791_v9 = vadd.f32 1.0, %v775_v58  ;;  %v1059_v31 = vld [vmem:[#allocation5 + $0x6f0] sm:$0xff]  ;;  %v2674_v6 = vld [vmem:[%s2981_s19 + $0x18] sm:$0xff] }
 0x1e4   : > { %1356 = vmatpush2.msra.mxu0 %v1073_v18  ;;  %1469 = vmatpush2.msra.mxu1 %v1075_v13  ;;  %v1052_v11 = vld [vmem:[#allocation5 + $0x6b8] sm:$0xff]  ;;  %v793_v13 = vadd.f32 1.0, %v3643_v1  ;;  %v731_v55 = vsel %vm724_vm4, %v3552_v63, %v3590_v21 }
 0x1e5   : > { %v601_v10 = vmul.f32 %v3498_v42, %v581_v4  ;;  %v602_v38 = vmul.f32 %v3501_v36, %v581_v4  ;;  %v534_v61 = vadd.f32 %v521_v17, %v520_v16  ;;  %v474_v39 = vpop.permute.xlu0 %473  ;;  %v490_v40 = vpop.permute.xlu1 %489  ;;  %1357 = vmatprep.subr.mxu0 %v1066_v19  ;;  %1470 = vmatprep.subr.mxu1 %v1068_v60  ;;  %v794_v17 = vadd.f32 1.0, %v3648_v53 }
 0x1e6   : > { %v503_v58 = vsel %vm499_vm5, %v474_v39, %v490_v40  ;;  %v511_v0 = vsel %vm499_vm5, %v490_v40, %v474_v39  ;;  %1358 = vmatpush2.msra.mxu0 %v1065_v28  ;;  %1471 = vmatpush2.msra.mxu1 %v1067_v47  ;;  %v1049_v47 = vld [vmem:[#allocation5 + $0x6a0] sm:$0xff]  ;;  %v796_v39 = vadd.f32 1.0, %v3654_v59  ;;  %v753_v40 = vadd.f32 %v731_v55, %v690_v50 }
 0x1e7   : > { %v582_v26 = vmul.f32 %v3327_v12, %v534_v61  ;;  %v522_v27 = vadd.f32 %v511_v0, %v3406_v2  ;;  %v523_v34 = vadd.f32 %v503_v58, %v3409_v5  ;;  %v808_v18 = vsub.f32 %v2674_v6, %v602_v38  ;;  %1359 = vmatprep.subr.mxu0 %v1058_v3  ;;  %v2675_v2 = vld [vmem:[%s2981_s19 + $0x10] sm:$0xff]  ;;  %v1041_v55 = vld [vmem:[#allocation5 + $0x660] sm:$0xff] }
 0x1e8   : > { %v739_v12 = vsel %vm724_vm4, %v3590_v21, %v3552_v63  ;;  %v807_v22 = vsub.f32 %v2675_v2, %v601_v10  ;;  %1472 = vmatprep.subr.mxu1 %v1060_v51  ;;  %1360 = vmatpush2.msra.mxu0 %v1057_v33  ;;  %v1051_v3 = vld [vmem:[#allocation5 + $0x6b0] sm:$0xff]  ;;  %v795_v10 = vadd.f32 1.0, %v3651_v43  ;;  %v2676_v51 = vld [vmem:[%s2981_s19 + $0x28] sm:$0xff]  ;;  %v2677_v33 = vld [vmem:[%s2981_s19 + $0x20] sm:$0xff] }
 0x1e9   : > { %v603_v5 = vmul.f32 %v3498_v42, %v582_v26  ;;  %v604_v19 = vmul.f32 %v3501_v36, %v582_v26  ;;  %v535_v60 = vadd.f32 %v523_v34, %v522_v27  ;;  %v492_v1 = vpop.permute.xlu0 %491  ;;  %v476_v4 = vpop.permute.xlu1 %475  ;;  %v3707_v16 = vmul.f32 %v808_v18, %v792_v32  ;;  %1473 = vmatpush2.msra.mxu1 %v1059_v31  ;;  %v1044_v32 = vld [vmem:[#allocation5 + $0x678] sm:$0xff] }
 0x1ea   : > { %v504_v28 = vsel %vm499_vm5, %v476_v4, %v492_v1  ;;  %v512_v63 = vsel %vm499_vm5, %v492_v1, %v476_v4  ;;  %v3714_v21 = vmul.f32 %v807_v22, %v791_v9  ;;  %1361 = vmatprep.subr.mxu0 %v1050_v24  ;;  %1474 = vmatprep.subr.mxu1 %v1052_v11  ;;  %v1042_v9 = vld [vmem:[#allocation5 + $0x668] sm:$0xff]  ;;  %v2678_v24 = vld [vmem:[%s2981_s19 + $0x38] sm:$0xff]  ;;  %v2588_v22 = vadd.f32 -1.0, %v753_v40 }
 0x1eb   : > { %v583_v38 = vmul.f32 %v3341_v35, %v535_v60  ;;  %v524_v53 = vadd.f32 %v512_v63, %v3420_v8  ;;  %v525_v61 = vadd.f32 %v504_v28, %v3423_v7  ;;  %1163 = vmatprep.mubr.f32.mxu0 %v3707_v16  ;;  %1276 = vmatprep.mubr.f32.mxu1 %v3707_v16  ;;  %v3728_v8 = vadd.f32 1.0, %v3657_v29 }
 0x1ec   : > { %1164 = vmatmul.mubr.f32.gmra.mxu0 %v3714_v21  ;;  %1277 = vmatmul.mubr.f32.gmra.mxu1 %v3714_v21  ;;  %v810_v43 = vsub.f32 %v2676_v51, %v604_v19  ;;  %v809_v35 = vsub.f32 %v2677_v33, %v603_v5  ;;  %v754_v2 = vadd.f32 %v739_v12, %v3679_v45  ;;  %v798_v5 = vadd.f32 1.0, %v3660_v54 }
 0x1ed   : > { %v605_v7 = vmul.f32 %v3498_v42, %v583_v38  ;;  %v606_v58 = vmul.f32 %v3501_v36, %v583_v38  ;;  %v536_v0 = vadd.f32 %v525_v61, %v524_v53  ;;  %v478_v59 = vpop.permute.xlu0 %477  ;;  %v494_v50 = vpop.permute.xlu1 %493  ;;  %1362 = vmatpush2.msra.mxu0 %v1049_v47  ;;  %1475 = vmatpush2.msra.mxu1 %v1051_v3  ;;  %v2680_v38 = vld [vmem:[%s2981_s19 + $0x48] sm:$0xff] }
 0x1ee   : > { %v505_v31 = vsel %vm499_vm5, %v478_v59, %v494_v50  ;;  %v513_v26 = vsel %vm499_vm5, %v494_v50, %v478_v59  ;;  %v3736_v27 = vmul.f32 %v810_v43, %v794_v17  ;;  %v3738_v29 = vmul.f32 %v809_v35, %v793_v13  ;;  %1363 = vmatprep.subr.mxu0 %v1042_v9  ;;  %v1034_v61 = vld [vmem:[#allocation5 + $0x628] sm:$0xff] }
 0x1ef   : > { %v584_v34 = vmul.f32 %v3371_v52, %v536_v0  ;;  %v526_v6 = vadd.f32 %v513_v26, %v3434_v44  ;;  %v527_v18 = vadd.f32 %v505_v31, %v3437_v20  ;;  %v812_v11 = vsub.f32 %v2678_v24, %v606_v58  ;;  %1476 = vmatprep.subr.mxu1 %v1044_v32  ;;  %v2679_v52 = vld [vmem:[%s2981_s19 + $0x30] sm:$0xff]  ;;  %v1026_v26 = vld [vmem:[#allocation5 + $0x5e8] sm:$0xff] }
 0x1f0   : > { %v3749_v13 = vsel %vm675_vm3, %v3626_v62, %v3624_v41  ;;  %1169 = vmatprep.mubr.f32.mxu0 %v3736_v27  ;;  %1282 = vmatprep.mubr.f32.mxu1 %v3736_v27  ;;  %v811_v44 = vsub.f32 %v2679_v52, %v605_v7  ;;  %v1043_v20 = vld [vmem:[#allocation5 + $0x670] sm:$0xff]  ;;  %v2589_v9 = vadd.f32 -1.0, %v754_v2  ;;  %v3772_v40 = vmul.f32 %v2588_v22, %v3498_v42 }
 0x1f1   : > { %v607_v19 = vmul.f32 %v3498_v42, %v584_v34  ;;  %v608_v45 = vmul.f32 %v3501_v36, %v584_v34  ;;  %v537_v12 = vadd.f32 %v527_v18, %v526_v6  ;;  %1170 = vmatmul.mubr.f32.gmra.mxu0 %v3738_v29  ;;  %1283 = vmatmul.mubr.f32.gmra.mxu1 %v3738_v29  ;;  %v496_v60 = vpop.permute.xlu0 %495  ;;  %v480_v1 = vpop.permute.xlu1 %479  ;;  %v1035_v31 = vld [vmem:[#allocation5 + $0x630] sm:$0xff]  ;;  %v800_v34 = vadd.f32 1.0, %v3673_v23  ;;  %v2682_v18 = vld [vmem:[%s2981_s19 + $0x58] sm:$0xff] }
 0x1f2   : > { %v506_v4 = vsel %vm499_vm5, %v480_v1, %v496_v60  ;;  %v514_v17 = vsel %vm499_vm5, %v496_v60, %v480_v1  ;;  %v3763_v54 = vmul.f32 %v812_v11, %v796_v39  ;;  %v3765_v28 = vmul.f32 %v811_v44, %v795_v10  ;;  %1364 = vmatpush2.msra.mxu0 %v1041_v55  ;;  %v1033_v39 = vld [vmem:[#allocation5 + $0x620] sm:$0xff]  ;;  %v2683_v11 = vld [vmem:[%s2981_s19 + $0x50] sm:$0xff] }
 0x1f3   : > { %v585_v63 = vmul.f32 %v3530_v15, %v537_v12  ;;  %v528_v47 = vadd.f32 %v514_v17, %v3448_v30  ;;  %v529_v3 = vadd.f32 %v506_v4, %v3451_v49  ;;  %v814_v53 = vsub.f32 %v2680_v38, %v608_v45  ;;  %1477 = vmatpush2.msra.mxu1 %v1043_v20  ;;  %v2681_v30 = vld [vmem:[%s2981_s19 + $0x40] sm:$0xff]  ;;  %v1036_v49 = vld [vmem:[#allocation5 + $0x638] sm:$0xff]  ;;  %v1018_v45 = vld [vmem:[#allocation5 + $0x5a8] sm:$0xff] }
 0x1f4   : > { %v691_v10 = vsel %vm675_vm3, %v3624_v41, %v3626_v62  ;;  %1175 = vmatprep.mubr.f32.mxu0 %v3763_v54  ;;  %1288 = vmatprep.mubr.f32.mxu1 %v3763_v54  ;;  %v813_v15 = vsub.f32 %v2681_v30, %v607_v19  ;;  %v786_v6 = vmul.f32 %v2589_v9, %v3501_v36  ;;  %v799_v52 = vadd.f32 1.0, %v3670_v14  ;;  %v1027_v19 = vld [vmem:[#allocation5 + $0x5f0] sm:$0xff]  ;;  %v1020_v17 = vld [vmem:[#allocation5 + $0x5b8] sm:$0xff]  ;;  %v2685_v38 = vld [vmem:[%s2981_s19 + $0x60] sm:$0xff] }
 0x1f5   : > { %v609_v51 = vmul.f32 %v3498_v42, %v585_v63  ;;  %v610_v43 = vmul.f32 %v3501_v36, %v585_v63  ;;  %v538_v33 = vadd.f32 %v529_v3, %v528_v47  ;;  %1176 = vmatmul.mubr.f32.gmra.mxu0 %v3765_v28  ;;  %1289 = vmatmul.mubr.f32.gmra.mxu1 %v3765_v28  ;;  %v482_v35 = vpop.permute.xlu0 %481  ;;  %v498_v32 = vpop.permute.xlu1 %497  ;;  %v1017_v63 = vld [vmem:[#allocation5 + $0x5a0] sm:$0xff]  ;;  %v2684_v47 = vld [vmem:[%s2981_s19 + $0x68] sm:$0xff] }
 0x1f6   : > { %v507_v41 = vsel %vm499_vm5, %v482_v35, %v498_v32  ;;  %v515_v62 = vsel %vm499_vm5, %v498_v32, %v482_v35  ;;  %v3789_v7 = vmul.f32 %v814_v53, %v798_v5  ;;  %v3792_v58 = vmul.f32 %v813_v15, %v3728_v8  ;;  %1365 = vmatprep.subr.mxu0 %v1034_v61  ;;  %v1028_v8 = vld [vmem:[#allocation5 + $0x5f8] sm:$0xff] }
 0x1f7   : > { %v586_v0 = vmul.f32 %v3542_v25, %v538_v33  ;;  %v530_v59 = vadd.f32 %v515_v62, %v3462_v56  ;;  %v531_v50 = vadd.f32 %v507_v41, %v3465_v57  ;;  %1478 = vmatprep.subr.mxu1 %v1036_v49  ;;  %1366 = vmatpush2.msra.mxu0 %v1033_v39  ;;  %v1025_v25 = vld [vmem:[#allocation5 + $0x5e0] sm:$0xff]  ;;  %v802_v14 = vadd.f32 1.0, %v786_v6  ;;  %v1012_v15 = vld [vmem:[#allocation5 + $0x578] sm:$0xff]  ;;  %v1011_v33 = vld [vmem:[#allocation5 + $0x570] sm:$0xff] }
 0x1f8   : > { %1181 = vmatprep.mubr.f32.mxu0 %v3789_v7  ;;  %1294 = vmatprep.mubr.f32.mxu1 %v3789_v7  ;;  %v816_v24 = vsub.f32 %v2682_v18, %v610_v43  ;;  %v815_v56 = vsub.f32 %v2683_v11, %v609_v51  ;;  %v1002_v41 = vld [vmem:[#allocation5 + $0x528] sm:$0xff]  ;;  %v1001_v62 = vld [vmem:[#allocation5 + $0x520] sm:$0xff]  ;;  %v995_v6 = vld [vmem:[#allocation5 + $0x4f0] sm:$0xff] }
 0x1f9   : > { %v611_v57 = vmul.f32 %v3498_v42, %v586_v0  ;;  %v612_v55 = vmul.f32 %v3501_v36, %v586_v0  ;;  %v539_v2 = vadd.f32 %v531_v50, %v530_v59  ;;  %1182 = vmatmul.mubr.f32.gmra.mxu0 %v3792_v58  ;;  %1295 = vmatmul.mubr.f32.gmra.mxu1 %v3792_v58  ;;  %v723_v23 = vpop.permute.xlu0 %722  ;;  %v707_v22 = vpop.permute.xlu1 %706  ;;  %v1003_v59 = vld [vmem:[#allocation5 + $0x530] sm:$0xff]  ;;  %v994_v50 = vld [vmem:[#allocation5 + $0x4e8] sm:$0xff]  ;;  %v988_v11 = vld [vmem:[#allocation5 + $0x4b8] sm:$0xff] }
 0x1fa   : > { %1479 = vmatpush2.msra.mxu1 %v1035_v31  ;;  %v732_v44 = vsel %vm724_vm4, %v707_v22, %v723_v23  ;;  %v740_v20 = vsel %vm724_vm4, %v723_v23, %v707_v22  ;;  %1367 = vmatprep.subr.mxu0 %v1026_v26  ;;  %v3812_v5 = vmul.f32 %v816_v24, %v800_v34  ;;  %v2686_v31 = vld [vmem:[%s2981_s19 + $0x78] sm:$0xff]  ;;  %v993_v34 = vld [vmem:[#allocation5 + $0x4e0] sm:$0xff]  ;;  %v2687_v24 = vld [vmem:[%s2981_s19 + $0x70] sm:$0xff]  ;;  %s2573_s19 = sshll.u32 %s2977_s20, 9 }
 0x1fb   : > { %v587_v12 = vmul.f32 %v3588_v37, %v539_v2  ;;  %v755_v60 = vadd.f32 %v732_v44, %v691_v10  ;;  %v756_v1 = vadd.f32 %v740_v20, %v3749_v13  ;;  %1480 = vmatprep.subr.mxu1 %v1028_v8  ;;  %1368 = vmatpush2.msra.mxu0 %v1025_v25  ;;  %v801_v37 = vadd.f32 1.0, %v3772_v40  ;;  %v1019_v13 = vld [vmem:[#allocation5 + $0x5b0] sm:$0xff]  ;;  %v1010_v10 = vld [vmem:[#allocation5 + $0x568] sm:$0xff]  ;;  %v1009_v40 = vld [vmem:[#allocation5 + $0x560] sm:$0xff]  ;;  %s4863_s10 = scalar_lea.vmem [#allocation7], %s2573_s19 }
 0x1fc   : > { %1187 = vmatprep.mubr.f32.mxu0 %v3812_v5  ;;  %1300 = vmatprep.mubr.f32.mxu1 %v3812_v5  ;;  %v3818_v4 = vmul.f32 %v815_v56, %v799_v52  ;;  %v818_v3 = vsub.f32 %v2684_v47, %v612_v55  ;;  %v817_v53 = vsub.f32 %v2685_v38, %v611_v57  ;;  %v986_v8 = vld [vmem:[#allocation5 + $0x4a8] sm:$0xff]  ;;  %v985_v56 = vld [vmem:[#allocation5 + $0x4a0] sm:$0xff]  ;;  %v987_v55 = vld [vmem:[#allocation5 + $0x4b0] sm:$0xff]  ;;  %s2467_s13 = sshll.u32 %s4863_s10, 4  ;;  %s5363_s13 = int_to_ptr.vmem [resolvable:$true] %s2467_s13 }
 0x1fd   : > { %v2590_v61 = vadd.f32 -1.0, %v755_v60  ;;  %v2591_v9 = vadd.f32 -1.0, %v756_v1  ;;  %1481 = vmatpush2.msra.mxu1 %v1027_v19  ;;  %1369 = vmatprep.subr.mxu0 %v1018_v45  ;;  %v614_v30 = vmul.f32 %v3501_v36, %v587_v12  ;;  %v613_v35 = vmul.f32 %v3498_v42, %v587_v12  ;;  %v978_v2 = vld [vmem:[#allocation5 + $0x468] sm:$0xff]  ;;  %v980_v23 = vld [vmem:[#allocation5 + $0x478] sm:$0xff]  ;;  %v977_v22 = vld [vmem:[#allocation5 + $0x460] sm:$0xff]  ;;  %s2742_s14 = scalar_lea.vmem %s5363_s13, 8192  ;;  %p2749_p2 = scmp.lt.s32.totalorder %s5363_s13, %s2747_s26 }
 0x1fe   : > { %1188 = vmatmul.mubr.f32.gmra.mxu0 %v3818_v4  ;;  %1301 = vmatmul.mubr.f32.gmra.mxu1 %v3818_v4  ;;  %v3826_v49 = vmul.f32 %v818_v3, %v802_v14  ;;  %v3830_v43 = vmul.f32 %v817_v53, %v801_v37  ;;  %v979_v52 = vld [vmem:[#allocation5 + $0x470] sm:$0xff]  ;;  %v970_v44 = vld [vmem:[#allocation5 + $0x428] sm:$0xff]  ;;  %v972_v20 = vld [vmem:[#allocation5 + $0x438] sm:$0xff]  ;;  %p2743_p11 = scmp.ne.s32.totalorder %s5363_s13, %s2742_s14 }
 0x1ff   : > { %v787_v39 = vmul.f32 %v2590_v61, %v3498_v42  ;;  %v788_v51 = vmul.f32 %v2591_v9, %v3501_v36  ;;  %1482 = vmatprep.subr.mxu1 %v1020_v17  ;;  %1370 = vmatpush2.msra.mxu0 %v1017_v63  ;;  %v1004_v36 = vld [vmem:[#allocation5 + $0x538] sm:$0xff]  ;;  %v820_v26 = vsub.f32 %v2686_v31, %v614_v30  ;;  %v969_v19 = vld [vmem:[#allocation5 + $0x420] sm:$0xff]  ;;  %v971_v45 = vld [vmem:[#allocation5 + $0x430] sm:$0xff] }
 0x200   : > { %1483 = vmatpush2.msra.mxu1 %v1019_v13  ;;  %1371 = vmatprep.subr.mxu0 %v1010_v10  ;;  %v996_v42 = vld [vmem:[#allocation5 + $0x4f8] sm:$0xff]  ;;  %v819_v25 = vsub.f32 %v2687_v24, %v613_v35  ;;  %v5606_v12 = vld [vmem:[#allocation20_spill] sm:$0xff]  ;;  %p2744_p12 = pnand %p2743_p11, %p5878_p7 }
 0x201   : > { %v804_v32 = vadd.f32 1.0, %v788_v51  ;;  %1484 = vmatprep.subr.mxu1 %v1012_v15  ;;  %1193 = vmatprep.mubr.f32.mxu0 %v3826_v49  ;;  %v803_v0 = vadd.f32 1.0, %v787_v39 }
 0x202   : > { %1306 = vmatprep.mubr.f32.mxu1 %v3826_v49  ;;  %1372 = vmatpush2.msra.mxu0 %v1009_v40  ;;  %p2745_p10 = pneg %p2744_p12 }
 0x203   : > { %1485 = vmatpush2.msra.mxu1 %v1011_v33  ;;  %1194 = vmatmul.mubr.f32.gmra.mxu0 %v3830_v43  ;;  %v3838_v18 = vmul.f32 %v820_v26, %v804_v32  ;;  %v835_v57 = vmul.f32 %v819_v25, %v803_v0 }
 0x204   : > { %1307 = vmatmul.mubr.f32.gmra.mxu1 %v3830_v43  ;;  %1373 = vmatprep.subr.mxu0 %v1002_v41 }
 0x205   : > { %1486 = vmatprep.subr.mxu1 %v1004_v36  ;;  %1374 = vmatpush2.msra.mxu0 %v1001_v62 }
 0x206   : > { %1487 = vmatpush2.msra.mxu1 %v1003_v59  ;;  %1375 = vmatprep.subr.mxu0 %v994_v50 }
 0x207   : > { %1488 = vmatprep.subr.mxu1 %v996_v42  ;;  %1376 = vmatpush2.msra.mxu0 %v993_v34 }
 0x208   : > { %1489 = vmatpush2.msra.mxu1 %v995_v6  ;;  %1377 = vmatprep.subr.mxu0 %v986_v8 }
 0x209   : > { %1490 = vmatprep.subr.mxu1 %v988_v11  ;;  %1199 = vmatprep.mubr.f32.mxu0 %v3838_v18 }
 0x20a   : > { %1312 = vmatprep.mubr.f32.mxu1 %v3838_v18  ;;  %1378 = vmatpush2.msra.mxu0 %v985_v56 }
 0x20b   : > { %1491 = vmatpush2.msra.mxu1 %v987_v55  ;;  %1200 = vmatmul.mubr.f32.gmra.mxu0 %v835_v57 }
 0x20c   : > { %1313 = vmatmul.mubr.f32.gmra.mxu1 %v835_v57  ;;  %1379 = vmatprep.subr.mxu0 %v978_v2 }
 0x20d   : > { %1492 = vmatprep.subr.mxu1 %v980_v23  ;;  %1380 = vmatpush2.msra.mxu0 %v977_v22 }
 0x20e   : > { %1383 = vmatprep.mubr.f32.mxu0 %v3518_v48  ;;  %1493 = vmatpush2.msra.mxu1 %v979_v52 }
 0x20f   : > { %1496 = vmatprep.mubr.f32.mxu1 %v3518_v48  ;;  %1381 = vmatprep.subr.mxu0 %v970_v44 }
 0x210   : > { %1494 = vmatprep.subr.mxu1 %v972_v20  ;;  %1382 = vmatpush2.msra.mxu0 %v969_v19 }
 0x211   : > { %1495 = vmatpush2.msra.mxu1 %v971_v45  ;;  %1384 = vmatmul.mubr.f32.vlgmr.msra.gmra.mxu0 %v5606_v12 }
 0x212   : > { %1497 = vmatmul.mubr.f32.vlgmr.msra.gmra.mxu1 %v5606_v12  ;;  %1389 = vmatprep.mubr.f32.mxu0 %v3707_v16 }
 0x213   : > { %1502 = vmatprep.mubr.f32.mxu1 %v3707_v16 }
 0x215   : > { %1390 = vmatmul.mubr.f32.gmra.mxu0 %v3714_v21 }
 0x216   : > { %1503 = vmatmul.mubr.f32.gmra.mxu1 %v3714_v21  ;;  %1395 = vmatprep.mubr.f32.mxu0 %v3736_v27 }
 0x217   : > { %1508 = vmatprep.mubr.f32.mxu1 %v3736_v27 }
 0x219   : > { %1396 = vmatmul.mubr.f32.gmra.mxu0 %v3738_v29 }
 0x21a   : > { %1509 = vmatmul.mubr.f32.gmra.mxu1 %v3738_v29  ;;  %1401 = vmatprep.mubr.f32.mxu0 %v3763_v54 }
 0x21b   : > { %1514 = vmatprep.mubr.f32.mxu1 %v3763_v54 }
 0x21d   : > { %1402 = vmatmul.mubr.f32.gmra.mxu0 %v3765_v28 }
 0x21e   : > { %1515 = vmatmul.mubr.f32.gmra.mxu1 %v3765_v28  ;;  %1407 = vmatprep.mubr.f32.mxu0 %v3789_v7 }
 0x21f   : > { %1520 = vmatprep.mubr.f32.mxu1 %v3789_v7 }
 0x221   : > { %1408 = vmatmul.mubr.f32.gmra.mxu0 %v3792_v58 }
 0x222   : > { %1521 = vmatmul.mubr.f32.gmra.mxu1 %v3792_v58  ;;  %1413 = vmatprep.mubr.f32.mxu0 %v3812_v5 }
 0x223   : > { %1526 = vmatprep.mubr.f32.mxu1 %v3812_v5 }
 0x225   : > { %1414 = vmatmul.mubr.f32.gmra.mxu0 %v3818_v4 }
 0x226   : > { %1527 = vmatmul.mubr.f32.gmra.mxu1 %v3818_v4  ;;  %1419 = vmatprep.mubr.f32.mxu0 %v3826_v49 }
 0x227   : > { %1532 = vmatprep.mubr.f32.mxu1 %v3826_v49 }
 0x229   : > { %1420 = vmatmul.mubr.f32.gmra.mxu0 %v3830_v43 }
 0x22a   : > { %1533 = vmatmul.mubr.f32.gmra.mxu1 %v3830_v43  ;;  %1425 = vmatprep.mubr.f32.mxu0 %v3838_v18 }
 0x22b   : > { %1538 = vmatprep.mubr.f32.mxu1 %v3838_v18 }
 0x22d   : > { %1426 = vmatmul.mubr.f32.gmra.mxu0 %v835_v57 }
 0x22e   : > { %1539 = vmatmul.mubr.f32.gmra.mxu1 %v835_v57 }
 0x27f   : > { %v1159_v48 = vpop.f32.mrf.mxu0  ;;  %v1272_v21 = vpop.f32.mrf.mxu1 }
 0x280   : > { %v3873_v16 = vmax.f32 %v1159_v48, 0.0  ;;  %v3877_v27 = vmax.f32 %v1272_v21, 0.0 }
 0x281   : > { %v1161_v29 = vpop.f32.mrf.mxu0  ;;  %v1274_v28 = vpop.f32.mrf.mxu1 }
 0x282   : > { %1609 = vrot.lane.b32.xlu1 %v3873_v16, %s2822_s30  ;;  %5607 = vst [vmem:[#allocation20_spill] sm:$0xff] %v3877_v27  ;;  %v3881_v54 = vmax.f32 %v1161_v29, 0.0  ;;  %v3885_v7 = vmax.f32 %v1274_v28, 0.0 }
 0x284   : > { %5608 = vst [vmem:[#allocation21_spill] sm:$0xff] %v3881_v54  ;;  %5609 = vst [vmem:[#allocation22_spill] sm:$0xff] %v3885_v7 }
 0x286   : > { %1641 = vrot.lane.b32.xlu1 %v3877_v27, %s2822_s30 }
 0x28a   : > { %1625 = vrot.lane.b32.xlu1 %v3881_v54, %s2822_s30 }
 0x28e   : > { %1657 = vrot.lane.b32.xlu1 %v3885_v7, %s2822_s30 }
 0x2ac   : > { %v1165_v58 = vpop.f32.mrf.mxu0  ;;  %v1278_v5 = vpop.f32.mrf.mxu1 }
 0x2ad   : > { %v3889_v60 = vmax.f32 %v1165_v58, 0.0  ;;  %v3893_v4 = vmax.f32 %v1278_v5, 0.0 }
 0x2ae   : > { %v1167_v1 = vpop.f32.mrf.mxu0  ;;  %v1280_v14 = vpop.f32.mrf.mxu1 }
 0x2af   : > { %5610 = vst [vmem:[#allocation23_spill] sm:$0xff] %v3889_v60  ;;  %1611 = vrot.lane.b32.xlu0 %v3889_v60, %s2822_s30  ;;  %5611 = vst [vmem:[#allocation24_spill] sm:$0xff] %v3893_v4  ;;  %v3901_v38 = vmax.f32 %v1167_v1, 0.0  ;;  %v3909_v9 = vmax.f32 %v1280_v14, 0.0 }
 0x2b1   : > { %v1171_v17 = vpop.f32.mrf.mxu0  ;;  %v1284_v47 = vpop.f32.mrf.mxu1  ;;  %5613 = vst [vmem:[#allocation26_spill] sm:$0xff] %v3901_v38  ;;  %5615 = vst [vmem:[#allocation28_spill] sm:$0xff] %v3909_v9 }
 0x2b2   : > { %v3895_v63 = vmax.f32 %v1171_v17, 0.0  ;;  %v3903_v53 = vmax.f32 %v1284_v47, 0.0 }
 0x2b3   : > { %v1173_v3 = vpop.f32.mrf.mxu0  ;;  %1643 = vrot.lane.b32.xlu0 %v3893_v4, %s2822_s30  ;;  %v1286_v37 = vpop.f32.mrf.mxu1 }
 0x2b4   : > { %5612 = vst [vmem:[#allocation25_spill] sm:$0xff] %v3895_v63  ;;  %1613 = vrot.lane.b32.xlu1 %v3895_v63, %s2822_s30  ;;  %5614 = vst [vmem:[#allocation27_spill] sm:$0xff] %v3903_v53  ;;  %v3911_v13 = vmax.f32 %v1173_v3, 0.0  ;;  %v3919_v49 = vmax.f32 %v1286_v37, 0.0 }
 0x2b5   : > { %v1177_v61 = vpop.f32.mrf.mxu0  ;;  %v1290_v10 = vpop.f32.mrf.mxu1 }
 0x2b6   : > { %5616 = vst [vmem:[#allocation29_spill] sm:$0xff] %v3911_v13  ;;  %v3917_v15 = vmax.f32 %v1177_v61, 0.0  ;;  %5618 = vst [vmem:[#allocation31_spill] sm:$0xff] %v3919_v49  ;;  %v3925_v40 = vmax.f32 %v1290_v10, 0.0 }
 0x2b7   : > { %1627 = vrot.lane.b32.xlu0 %v3901_v38, %s2822_s30  ;;  %v1179_v30 = vpop.f32.mrf.mxu0  ;;  %v1292_v39 = vpop.f32.mrf.mxu1 }
 0x2b8   : > { %1645 = vrot.lane.b32.xlu1 %v3903_v53, %s2822_s30  ;;  %5617 = vst [vmem:[#allocation30_spill] sm:$0xff] %v3917_v15  ;;  %5619 = vst [vmem:[#allocation32_spill] sm:$0xff] %v3925_v40  ;;  %v3933_v32 = vmax.f32 %v1179_v30, 0.0  ;;  %v3941_v0 = vmax.f32 %v1292_v39, 0.0 }
 0x2b9   : > { %v1183_v51 = vpop.f32.mrf.mxu0  ;;  %v1296_v33 = vpop.f32.mrf.mxu1 }
 0x2ba   : > { %v3927_v43 = vmax.f32 %v1183_v51, 0.0  ;;  %5621 = vst [vmem:[#allocation34_spill] sm:$0xff] %v3933_v32  ;;  %v3935_v41 = vmax.f32 %v1296_v33, 0.0  ;;  %5623 = vst [vmem:[#allocation36_spill] sm:$0xff] %v3941_v0 }
 0x2bb   : > { %1659 = vrot.lane.b32.xlu0 %v3909_v9, %s2822_s30  ;;  %v1185_v35 = vpop.f32.mrf.mxu0  ;;  %v1298_v36 = vpop.f32.mrf.mxu1 }
 0x2bc   : > { %1629 = vrot.lane.b32.xlu1 %v3911_v13, %s2822_s30  ;;  %5620 = vst [vmem:[#allocation33_spill] sm:$0xff] %v3927_v43  ;;  %5622 = vst [vmem:[#allocation35_spill] sm:$0xff] %v3935_v41  ;;  %v3943_v59 = vmax.f32 %v1185_v35, 0.0  ;;  %v3951_v42 = vmax.f32 %v1298_v36, 0.0 }
 0x2be   : > { %v1189_v62 = vpop.f32.mrf.mxu0  ;;  %5624 = vst [vmem:[#allocation37_spill] sm:$0xff] %v3943_v59  ;;  %v1302_v50 = vpop.f32.mrf.mxu1  ;;  %5626 = vst [vmem:[#allocation39_spill] sm:$0xff] %v3951_v42 }
 0x2bf   : > { %1615 = vrot.lane.b32.xlu0 %v3917_v15, %s2822_s30  ;;  %v3949_v26 = vmax.f32 %v1189_v62, 0.0  ;;  %v3957_v8 = vmax.f32 %v1302_v50, 0.0 }
 0x2c0   : > { %1661 = vrot.lane.b32.xlu1 %v3919_v49, %s2822_s30  ;;  %v1191_v31 = vpop.f32.mrf.mxu0  ;;  %v1304_v34 = vpop.f32.mrf.mxu1 }
 0x2c1   : > { %5625 = vst [vmem:[#allocation38_spill] sm:$0xff] %v3949_v26  ;;  %5627 = vst [vmem:[#allocation40_spill] sm:$0xff] %v3957_v8  ;;  %v3965_v25 = vmax.f32 %v1191_v31, 0.0  ;;  %v3973_v55 = vmax.f32 %v1304_v34, 0.0 }
 0x2c3   : > { %1647 = vrot.lane.b32.xlu0 %v3925_v40, %s2822_s30  ;;  %v1195_v6 = vpop.f32.mrf.mxu0  ;;  %5629 = vst [vmem:[#allocation42_spill] sm:$0xff] %v3965_v25  ;;  %5631 = vst [vmem:[#allocation44_spill] sm:$0xff] %v3973_v55 }
 0x2c4   : > { %1617 = vrot.lane.b32.xlu1 %v3927_v43, %s2822_s30  ;;  %v3959_v18 = vmax.f32 %v1195_v6, 0.0  ;;  %v1308_v24 = vpop.f32.mrf.mxu1 }
 0x2c5   : > { %v1197_v11 = vpop.f32.mrf.mxu0  ;;  %v3967_v56 = vmax.f32 %v1308_v24, 0.0 }
 0x2c6   : > { %5628 = vst [vmem:[#allocation41_spill] sm:$0xff] %v3959_v18  ;;  %v1310_v2 = vpop.f32.mrf.mxu1  ;;  %v3975_v23 = vmax.f32 %v1197_v11, 0.0 }
 0x2c7   : > { %1631 = vrot.lane.b32.xlu0 %v3933_v32, %s2822_s30  ;;  %5630 = vst [vmem:[#allocation43_spill] sm:$0xff] %v3967_v56  ;;  %v3983_v20 = vmax.f32 %v1310_v2, 0.0 }
 0x2c8   : > { %1649 = vrot.lane.b32.xlu1 %v3935_v41, %s2822_s30  ;;  %5632 = vst [vmem:[#allocation45_spill] sm:$0xff] %v3975_v23 }
 0x2c9   : > { %5634 = vst [vmem:[#allocation47_spill] sm:$0xff] %v3983_v20 }
 0x2cb   : > { %1663 = vrot.lane.b32.xlu0 %v3941_v0, %s2822_s30  ;;  %v1201_v57 = vpop.f32.mrf.mxu0 }
 0x2cc   : > { %1633 = vrot.lane.b32.xlu1 %v3943_v59, %s2822_s30  ;;  %v1314_v22 = vpop.f32.mrf.mxu1  ;;  %v3981_v44 = vmax.f32 %v1201_v57, 0.0 }
 0x2cd   : > { %v1203_v52 = vpop.f32.mrf.mxu0  ;;  %v3989_v12 = vmax.f32 %v1314_v22, 0.0 }
 0x2ce   : > { %5633 = vst [vmem:[#allocation46_spill] sm:$0xff] %v3981_v44  ;;  %v1316_v19 = vpop.f32.mrf.mxu1  ;;  %v3997_v28 = vmax.f32 %v1203_v52, 0.0 }
 0x2cf   : > { %1619 = vrot.lane.b32.xlu0 %v3949_v26, %s2822_s30  ;;  %5635 = vst [vmem:[#allocation48_spill] sm:$0xff] %v3989_v12  ;;  %v4005_v14 = vmax.f32 %v1316_v19, 0.0 }
 0x2d0   : > { %1665 = vrot.lane.b32.xlu1 %v3951_v42, %s2822_s30  ;;  %5636 = vst [vmem:[#allocation49_spill] sm:$0xff] %v3997_v28 }
 0x2d1   : > { %v1385_v45 = vpop.f32.mrf.mxu0  ;;  %5637 = vst [vmem:[#allocation50_spill] sm:$0xff] %v4005_v14 }
 0x2d2   : > { %v3991_v48 = vmax.f32 %v1385_v45, 0.0  ;;  %v1498_v21 = vpop.f32.mrf.mxu1 }
 0x2d3   : > { %1651 = vrot.lane.b32.xlu0 %v3957_v8, %s2822_s30  ;;  %v1387_v29 = vpop.f32.mrf.mxu0  ;;  %v3999_v58 = vmax.f32 %v1498_v21, 0.0 }
 0x2d4   : > { %1621 = vrot.lane.b32.xlu1 %v3959_v18, %s2822_s30  ;;  %v1500_v5 = vpop.f32.mrf.mxu1  ;;  %v4007_v17 = vmax.f32 %v1387_v29, 0.0 }
 0x2d5   : > { %v1391_v1 = vpop.f32.mrf.mxu0  ;;  %v4015_v61 = vmax.f32 %v1500_v5, 0.0 }
 0x2d6   : > { %5638 = vst [vmem:[#allocation51_spill] sm:$0xff] %v4007_v17  ;;  %v1504_v47 = vpop.f32.mrf.mxu1  ;;  %v4013_v37 = vmax.f32 %v1391_v1, 0.0 }
 0x2d7   : > { %1635 = vrot.lane.b32.xlu0 %v3965_v25, %s2822_s30  ;;  %v1393_v3 = vpop.f32.mrf.mxu0  ;;  %v4021_v39 = vmax.f32 %v1504_v47, 0.0 }
 0x2d8   : > { %1653 = vrot.lane.b32.xlu1 %v3967_v56, %s2822_s30  ;;  %5639 = vst [vmem:[#allocation52_spill] sm:$0xff] %v4013_v37  ;;  %v1506_v10 = vpop.f32.mrf.mxu1  ;;  %v4029_v36 = vmax.f32 %v1393_v3, 0.0 }
 0x2d9   : > { %v1397_v30 = vpop.f32.mrf.mxu0  ;;  %5640 = vst [vmem:[#allocation53_spill] sm:$0xff] %v4021_v39  ;;  %v4037_v34 = vmax.f32 %v1506_v10, 0.0 }
 0x2da   : > { %v4023_v51 = vmax.f32 %v1397_v30, 0.0  ;;  %v1510_v33 = vpop.f32.mrf.mxu1  ;;  %5642 = vst [vmem:[#allocation55_spill] sm:$0xff] %v4029_v36 }
 0x2db   : > { %1667 = vrot.lane.b32.xlu0 %v3973_v55, %s2822_s30  ;;  %v1399_v35 = vpop.f32.mrf.mxu0  ;;  %v4031_v62 = vmax.f32 %v1510_v33, 0.0 }
 0x2dc   : > { %1637 = vrot.lane.b32.xlu1 %v3975_v23, %s2822_s30  ;;  %5641 = vst [vmem:[#allocation54_spill] sm:$0xff] %v4023_v51  ;;  %v1512_v50 = vpop.f32.mrf.mxu1  ;;  %v4039_v6 = vmax.f32 %v1399_v35, 0.0 }
 0x2dd   : > { %5643 = vst [vmem:[#allocation56_spill] sm:$0xff] %v4031_v62  ;;  %v1403_v31 = vpop.f32.mrf.mxu0  ;;  %v4047_v2 = vmax.f32 %v1512_v50, 0.0 }
 0x2de   : > { %5644 = vst [vmem:[#allocation57_spill] sm:$0xff] %v4039_v6  ;;  %v1516_v24 = vpop.f32.mrf.mxu1  ;;  %v4045_v57 = vmax.f32 %v1403_v31, 0.0 }
 0x2df   : > { %1623 = vrot.lane.b32.xlu0 %v3981_v44, %s2822_s30  ;;  %v1405_v11 = vpop.f32.mrf.mxu0  ;;  %5646 = vst [vmem:[#allocation59_spill] sm:$0xff] %v4047_v2  ;;  %v4053_v19 = vmax.f32 %v1516_v24, 0.0 }
 0x2e0   : > { %1669 = vrot.lane.b32.xlu1 %v3983_v20, %s2822_s30  ;;  %5645 = vst [vmem:[#allocation58_spill] sm:$0xff] %v4045_v57  ;;  %v1518_v22 = vpop.f32.mrf.mxu1  ;;  %v4061_v5 = vmax.f32 %v1405_v11, 0.0 }
 0x2e1   : > { %v1409_v52 = vpop.f32.mrf.mxu0  ;;  %5647 = vst [vmem:[#allocation60_spill] sm:$0xff] %v4053_v19  ;;  %v4069_v10 = vmax.f32 %v1518_v22, 0.0 }
 0x2e2   : > { %v4055_v45 = vmax.f32 %v1409_v52, 0.0  ;;  %v1522_v21 = vpop.f32.mrf.mxu1  ;;  %5649 = vst [vmem:[#allocation62_spill] sm:$0xff] %v4061_v5 }
 0x2e3   : > { %1655 = vrot.lane.b32.xlu0 %v3989_v12, %s2822_s30  ;;  %v1411_v29 = vpop.f32.mrf.mxu0  ;;  %v4063_v1 = vmax.f32 %v1522_v21, 0.0  ;;  %5651 = vst [vmem:[#allocation64_spill] sm:$0xff] %v4069_v10 }
 0x2e4   : > { %1673 = vrot.lane.b32.xlu1 %v3991_v48, %s2822_s30  ;;  %5648 = vst [vmem:[#allocation61_spill] sm:$0xff] %v4055_v45  ;;  %v1524_v47 = vpop.f32.mrf.mxu1  ;;  %v4071_v30 = vmax.f32 %v1411_v29, 0.0 }
 0x2e5   : > { %5650 = vst [vmem:[#allocation63_spill] sm:$0xff] %v4063_v1  ;;  %v1415_v3 = vpop.f32.mrf.mxu0  ;;  %v4079_v31 = vmax.f32 %v1524_v47, 0.0 }
 0x2e6   : > { %5652 = vst [vmem:[#allocation65_spill] sm:$0xff] %v4071_v30  ;;  %v1528_v33 = vpop.f32.mrf.mxu1  ;;  %v4077_v50 = vmax.f32 %v1415_v3, 0.0 }
 0x2e7   : > { %1639 = vrot.lane.b32.xlu0 %v3997_v28, %s2822_s30  ;;  %v1417_v35 = vpop.f32.mrf.mxu0  ;;  %5654 = vst [vmem:[#allocation67_spill] sm:$0xff] %v4079_v31  ;;  %v4087_v52 = vmax.f32 %v1528_v33, 0.0 }
 0x2e8   : > { %1705 = vrot.lane.b32.xlu1 %v3999_v58, %s2822_s30  ;;  %5653 = vst [vmem:[#allocation66_spill] sm:$0xff] %v4077_v50  ;;  %v1530_v24 = vpop.f32.mrf.mxu1  ;;  %v4095_v47 = vmax.f32 %v1417_v35, 0.0 }
 0x2e9   : > { %v1421_v11 = vpop.f32.mrf.mxu0  ;;  %5655 = vst [vmem:[#allocation68_spill] sm:$0xff] %v4087_v52  ;;  %v4103_v33 = vmax.f32 %v1530_v24, 0.0 }
 0x2ea   : > { %v4089_v21 = vmax.f32 %v1421_v11, 0.0  ;;  %v1534_v29 = vpop.f32.mrf.mxu1  ;;  %5657 = vst [vmem:[#allocation70_spill] sm:$0xff] %v4095_v47 }
 0x2eb   : > { %1671 = vrot.lane.b32.xlu0 %v4005_v14, %s2822_s30  ;;  %v4097_v3 = vmax.f32 %v1534_v29, 0.0  ;;  %v1423_v44 = vpop.f32.mrf.mxu0  ;;  %5659 = vst [vmem:[#allocation72_spill] sm:$0xff] %v4103_v33 }
 0x2ec   : > { %1689 = vrot.lane.b32.xlu1 %v4007_v17, %s2822_s30  ;;  %5656 = vst [vmem:[#allocation69_spill] sm:$0xff] %v4089_v21  ;;  %v4105_v11 = vmax.f32 %v1423_v44, 0.0 }
 0x2ed   : > { %5658 = vst [vmem:[#allocation71_spill] sm:$0xff] %v4097_v3 }
 0x2ee   : > { %5660 = vst [vmem:[#allocation73_spill] sm:$0xff] %v4105_v11 }
 0x2ef   : > { %1675 = vrot.lane.b32.xlu0 %v4013_v37, %s2822_s30 }
 0x2f0   : > { %1721 = vrot.lane.b32.xlu1 %v4015_v61, %s2822_s30 }
 0x2f3   : > { %1707 = vrot.lane.b32.xlu0 %v4021_v39, %s2822_s30 }
 0x2f4   : > { %1677 = vrot.lane.b32.xlu1 %v4023_v51, %s2822_s30  ;;  %v4083_v22 = vpop.permute.xlu1 %1609 }
 0x2f7   : > { %1691 = vrot.lane.b32.xlu0 %v4029_v36, %s2822_s30 }
 0x2f8   : > { %1709 = vrot.lane.b32.xlu1 %v4031_v62, %s2822_s30  ;;  %v1642_v18 = vpop.permute.xlu1 %1641 }
 0x2fb   : > { %1723 = vrot.lane.b32.xlu0 %v4037_v34, %s2822_s30 }
 0x2fc   : > { %1693 = vrot.lane.b32.xlu1 %v4039_v6, %s2822_s30  ;;  %v1626_v35 = vpop.permute.xlu1 %1625 }
 0x2fd   : > { %v1785_v24 = vsel %vm434_vm2, %v4083_v22, %v1626_v35 }
 0x2ff   : > { %1679 = vrot.lane.b32.xlu0 %v4045_v57, %s2822_s30 }
 0x300   : > { %1725 = vrot.lane.b32.xlu1 %v4047_v2, %s2822_s30 }
 0x303   : > { %1711 = vrot.lane.b32.xlu0 %v4053_v19, %s2822_s30 }
 0x304   : > { %1681 = vrot.lane.b32.xlu1 %v4055_v45, %s2822_s30 }
 0x307   : > { %1695 = vrot.lane.b32.xlu0 %v4061_v5, %s2822_s30 }
 0x308   : > { %1713 = vrot.lane.b32.xlu1 %v4063_v1, %s2822_s30 }
 0x30b   : > { %1727 = vrot.lane.b32.xlu0 %v4069_v10, %s2822_s30 }
 0x30c   : > { %1697 = vrot.lane.b32.xlu1 %v4071_v30, %s2822_s30 }
 0x30f   : > { %1683 = vrot.lane.b32.xlu0 %v4077_v50, %s2822_s30 }
 0x310   : > { %1729 = vrot.lane.b32.xlu1 %v4079_v31, %s2822_s30  ;;  %v1427_v31 = vpop.f32.mrf.mxu0 }
 0x311   : > { %v4111_v29 = vmax.f32 %v1427_v31, 0.0  ;;  %v4127_v31 = vmax.f32 %v3881_v54, %v1785_v24 }
 0x313   : > { %1715 = vrot.lane.b32.xlu0 %v4087_v52, %s2822_s30  ;;  %v1536_v52 = vpop.f32.mrf.mxu1  ;;  %5661 = vst [vmem:[#allocation74_spill] sm:$0xff] %v4111_v29  ;;  %5664 = vst [vmem:[#allocation77_spill] sm:$0xff] %v4127_v31 }
 0x314   : > { %1685 = vrot.lane.b32.xlu1 %v4089_v21, %s2822_s30  ;;  %v4113_v21 = vmax.f32 %v1536_v52, 0.0  ;;  %v4129_v52 = vpop.permute.xlu1 %1657 }
 0x315   : > { %v1769_v54 = vsel %vm434_vm2, %v1642_v18, %v4129_v52 }
 0x316   : > { %5662 = vst [vmem:[#allocation75_spill] sm:$0xff] %v4113_v21 }
 0x317   : > { %1699 = vrot.lane.b32.xlu0 %v4095_v47, %s2822_s30  ;;  %v1540_v47 = vpop.f32.mrf.mxu1 }
 0x318   : > { %1717 = vrot.lane.b32.xlu1 %v4097_v3, %s2822_s30  ;;  %v4122_v44 = vmax.f32 %v1540_v47, 0.0 }
 0x31a   : > { %5663 = vst [vmem:[#allocation76_spill] sm:$0xff] %v4122_v44 }
 0x31b   : > { %1731 = vrot.lane.b32.xlu0 %v4103_v33, %s2822_s30  ;;  %v1777_v33 = vsel %vm434_vm2, %v1626_v35, %v1642_v18 }
 0x31c   : > { %1701 = vrot.lane.b32.xlu1 %v4105_v11, %s2822_s30  ;;  %v1429_v11 = vpop.f32.mrf.mxu0  ;;  %v4140_v26 = vmax.f32 %v3877_v27, %v1777_v33 }
 0x31e   : > { %5666 = vst [vmem:[#allocation79_spill] sm:$0xff] %v4140_v26 }
 0x31f   : > { %1687 = vrot.lane.b32.xlu0 %v4111_v29, %s2822_s30  ;;  %v1542_v29 = vpop.f32.mrf.mxu1 }
 0x320   : > { %1733 = vrot.lane.b32.xlu1 %v4113_v21, %s2822_s30  ;;  %v4137_v21 = vmax.f32 %v1429_v11, 0.0  ;;  %v4151_v35 = vmax.f32 %v1542_v29, 0.0 }
 0x321   : > { %v4124_v3 = vpop.permute.xlu0 %1611 }
 0x322   : > { %5665 = vst [vmem:[#allocation78_spill] sm:$0xff] %v4137_v21  ;;  %5667 = vst [vmem:[#allocation80_spill] sm:$0xff] %v4151_v35 }
 0x323   : > { %1719 = vrot.lane.b32.xlu0 %v4122_v44, %s2822_s30 }
 0x324   : > { %1881 = vrot.lane.b32.xlu1 %v4127_v31, %s2823_s27  ;;  %v4154_v31 = vmax.f32 %v3885_v7, %v1769_v54 }
 0x325   : > { %v1644_v47 = vpop.permute.xlu0 %1643 }
 0x326   : > { %v4142_v24 = vpop.permute.xlu1 %1613  ;;  %5668 = vst [vmem:[#allocation81_spill] sm:$0xff] %v4154_v31 }
 0x327   : > { %1703 = vrot.lane.b32.xlu0 %v4137_v21, %s2822_s30 }
 0x328   : > { %1897 = vrot.lane.b32.xlu1 %v4140_v26, %s2823_s27 }
 0x329   : > { %v1628_v11 = vpop.permute.xlu0 %1627 }
 0x32a   : > { %v1786_v33 = vsel %vm434_vm2, %v4124_v3, %v1628_v11  ;;  %v1646_v27 = vpop.permute.xlu1 %1645  ;;  %v1778_v54 = vsel %vm434_vm2, %v1628_v11, %v1644_v47 }
 0x32b   : > { %1735 = vrot.lane.b32.xlu0 %v4151_v35, %s2822_s30  ;;  %v4164_v18 = vmax.f32 %v3901_v38, %v1786_v33  ;;  %s2748_s30 = scalar_lea.vmem %s2747_s26, 16384 }
 0x32c   : > { %1913 = vrot.lane.b32.xlu1 %v4154_v31, %s2823_s27  ;;  %v4179_v31 = vmax.f32 %v3893_v4, %v1778_v54  ;;  %p2750_p13 = scmp.lt.s32.totalorder %s2748_s30, %s2742_s14 }
 0x32d   : > { %5669 = vst [vmem:[#allocation82_spill] sm:$0xff] %v4164_v18  ;;  %v4166_v29 = vpop.permute.xlu0 %1659 }
 0x32e   : > { %v1630_v7 = vpop.permute.xlu1 %1629  ;;  %5671 = vst [vmem:[#allocation84_spill] sm:$0xff] %v4179_v31  ;;  %v1770_v11 = vsel %vm434_vm2, %v1644_v47, %v4166_v29  ;;  %p2751_p0 = por %p2750_p13, %p2749_p2 }
 0x32f   : > { %v1787_v26 = vsel %vm434_vm2, %v4142_v24, %v1630_v7  ;;  %1883 = vrot.lane.b32.xlu0 %v4164_v18, %s2823_s27  ;;  %v1779_v33 = vsel %vm434_vm2, %v1630_v7, %v1646_v27  ;;  %v4198_v54 = vmax.f32 %v3909_v9, %v1770_v11 }
 0x330   : > { %v4176_v35 = vmax.f32 %v3911_v13, %v1787_v26  ;;  %v4195_v26 = vmax.f32 %v3903_v53, %v1779_v33  ;;  %p2752_p5 = pnand %p2751_p0, %p2745_p10 }
 0x331   : > { %v4183_v38 = vpop.permute.xlu0 %1615  ;;  %5672 = vst [vmem:[#allocation85_spill] sm:$0xff] %v4198_v54 }
 0x332   : > { %5670 = vst [vmem:[#allocation83_spill] sm:$0xff] %v4176_v35  ;;  %1885 = vrot.lane.b32.xlu1 %v4176_v35, %s2823_s27  ;;  %v4190_v44 = vpop.permute.xlu1 %1661 }
 0x333   : > { %1899 = vrot.lane.b32.xlu0 %v4179_v31, %s2823_s27  ;;  %v1771_v7 = vsel %vm434_vm2, %v1646_v27, %v4190_v44 }
 0x334   : > { %v4210_v4 = vmax.f32 %v3919_v49, %v1771_v7 }
 0x335   : > { %v1648_v13 = vpop.permute.xlu0 %1647 }
 0x336   : > { %1901 = vrot.lane.b32.xlu1 %v4195_v26, %s2823_s27  ;;  %v4205_v47 = vpop.permute.xlu1 %1617 }
 0x337   : > { %1915 = vrot.lane.b32.xlu0 %v4198_v54, %s2823_s27 }
 0x339   : > { %v1632_v33 = vpop.permute.xlu0 %1631 }
 0x33a   : > { %v1788_v11 = vsel %vm434_vm2, %v4183_v38, %v1632_v33  ;;  %1917 = vrot.lane.b32.xlu1 %v4210_v4, %s2823_s27  ;;  %v1650_v27 = vpop.permute.xlu1 %1649  ;;  %v1780_v9 = vsel %vm434_vm2, %v1632_v33, %v1648_v13 }
 0x33b   : > { %v4218_v53 = vmax.f32 %v3933_v32, %v1788_v11  ;;  %v4227_v49 = vmax.f32 %v3925_v40, %v1780_v9 }
 0x33d   : > { %5673 = vst [vmem:[#allocation86_spill] sm:$0xff] %v4218_v53  ;;  %v4222_v35 = vpop.permute.xlu0 %1663  ;;  %1887 = vrot.lane.b32.xlu0 %v4218_v53, %s2823_s27 }
 0x33e   : > { %v1634_v7 = vpop.permute.xlu1 %1633  ;;  %v1772_v11 = vsel %vm434_vm2, %v1648_v13, %v4222_v35 }
 0x33f   : > { %v1789_v18 = vsel %vm434_vm2, %v4205_v47, %v1634_v7  ;;  %v1781_v33 = vsel %vm434_vm2, %v1634_v7, %v1650_v27  ;;  %v4249_v40 = vmax.f32 %v3941_v0, %v1772_v11 }
 0x340   : > { %v4236_v32 = vmax.f32 %v3943_v59, %v1789_v18  ;;  %v4252_v13 = vmax.f32 %v3935_v41, %v1781_v33 }
 0x341   : > { %v4240_v54 = vpop.permute.xlu0 %1619  ;;  %1903 = vrot.lane.b32.xlu0 %v4227_v49, %s2823_s27 }
 0x342   : > { %5674 = vst [vmem:[#allocation87_spill] sm:$0xff] %v4236_v32  ;;  %1889 = vrot.lane.b32.xlu1 %v4236_v32, %s2823_s27  ;;  %v4246_v9 = vpop.permute.xlu1 %1665 }
 0x343   : > { %v1773_v18 = vsel %vm434_vm2, %v1650_v27, %v4246_v9 }
 0x344   : > { %v4264_v32 = vmax.f32 %v3951_v42, %v1773_v18 }
 0x345   : > { %v1652_v7 = vpop.permute.xlu0 %1651  ;;  %1919 = vrot.lane.b32.xlu0 %v4249_v40, %s2823_s27 }
 0x346   : > { %1905 = vrot.lane.b32.xlu1 %v4252_v13, %s2823_s27  ;;  %v4261_v59 = vpop.permute.xlu1 %1621  ;;  %5675 = vst [vmem:[#allocation88_spill] sm:$0xff] %v4264_v32 }
 0x349   : > { %v1636_v11 = vpop.permute.xlu0 %1635 }
 0x34a   : > { %v1790_v33 = vsel %vm434_vm2, %v4240_v54, %v1636_v11  ;;  %1921 = vrot.lane.b32.xlu1 %v4264_v32, %s2823_s27  ;;  %v1654_v27 = vpop.permute.xlu1 %1653  ;;  %v1782_v0 = vsel %vm434_vm2, %v1636_v11, %v1652_v7 }
 0x34b   : > { %v4272_v41 = vmax.f32 %v3965_v25, %v1790_v33  ;;  %v4281_v42 = vmax.f32 %v3957_v8, %v1782_v0 }
 0x34d   : > { %5676 = vst [vmem:[#allocation89_spill] sm:$0xff] %v4272_v41  ;;  %v4276_v53 = vpop.permute.xlu0 %1667  ;;  %1891 = vrot.lane.b32.xlu0 %v4272_v41, %s2823_s27 }
 0x34e   : > { %v1638_v18 = vpop.permute.xlu1 %1637  ;;  %v1774_v33 = vsel %vm434_vm2, %v1652_v7, %v4276_v53 }
 0x34f   : > { %v1791_v31 = vsel %vm434_vm2, %v4261_v59, %v1638_v18  ;;  %v1783_v11 = vsel %vm434_vm2, %v1638_v18, %v1654_v27  ;;  %v4303_v8 = vmax.f32 %v3973_v55, %v1774_v33 }
 0x350   : > { %v4290_v25 = vmax.f32 %v3975_v23, %v1791_v31  ;;  %v4306_v7 = vmax.f32 %v3967_v56, %v1783_v11 }
 0x351   : > { %v4294_v32 = vpop.permute.xlu0 %1623  ;;  %1907 = vrot.lane.b32.xlu0 %v4281_v42, %s2823_s27 }
 0x352   : > { %5677 = vst [vmem:[#allocation90_spill] sm:$0xff] %v4290_v25  ;;  %1893 = vrot.lane.b32.xlu1 %v4290_v25, %s2823_s27  ;;  %v4300_v0 = vpop.permute.xlu1 %1669  ;;  %5678 = vst [vmem:[#allocation91_spill] sm:$0xff] %v4306_v7 }
 0x353   : > { %v1775_v31 = vsel %vm434_vm2, %v1654_v27, %v4300_v0 }
 0x354   : > { %v4316_v25 = vmax.f32 %v3983_v20, %v1775_v31 }
 0x355   : > { %v1656_v18 = vpop.permute.xlu0 %1655  ;;  %1923 = vrot.lane.b32.xlu0 %v4303_v8, %s2823_s27 }
 0x356   : > { %1909 = vrot.lane.b32.xlu1 %v4306_v7, %s2823_s27  ;;  %v1674_v23 = vpop.permute.xlu1 %1673  ;;  %5679 = vst [vmem:[#allocation92_spill] sm:$0xff] %v4316_v25 }
 0x357   : > { %v1761_v33 = vsel %vm434_vm2, %v4129_v52, %v1674_v23 }
 0x358   : > { %v4330_v7 = vmax.f32 %v3991_v48, %v1761_v33 }
 0x359   : > { %v1640_v11 = vpop.permute.xlu0 %1639 }
 0x35a   : > { %v1792_v27 = vsel %vm434_vm2, %v4294_v32, %v1640_v11  ;;  %1925 = vrot.lane.b32.xlu1 %v4316_v25, %s2823_s27  ;;  %v1706_v56 = vpop.permute.xlu1 %1705  ;;  %v1784_v31 = vsel %vm434_vm2, %v1640_v11, %v1656_v18 }
 0x35b   : > { %v4327_v55 = vmax.f32 %v3997_v28, %v1792_v27  ;;  %v4341_v25 = vmax.f32 %v3989_v12, %v1784_v31 }
 0x35d   : > { %5680 = vst [vmem:[#allocation93_spill] sm:$0xff] %v4327_v55  ;;  %v4334_v20 = vpop.permute.xlu0 %1671  ;;  %1895 = vrot.lane.b32.xlu0 %v4327_v55, %s2823_s27  ;;  %5681 = vst [vmem:[#allocation94_spill] sm:$0xff] %v4341_v25 }
 0x35e   : > { %1929 = vrot.lane.b32.xlu1 %v4330_v7, %s2823_s27  ;;  %v1690_v52 = vpop.permute.xlu1 %1689  ;;  %v1776_v33 = vsel %vm434_vm2, %v1656_v18, %v4334_v20 }
 0x35f   : > { %v4349_v28 = vmax.f32 %v4005_v14, %v1776_v33  ;;  %v1753_v18 = vsel %vm434_vm2, %v1674_v23, %v1690_v52 }
 0x360   : > { %v4370_v14 = vmax.f32 %v4007_v17, %v1753_v18 }
 0x361   : > { %v1676_v27 = vpop.permute.xlu0 %1675  ;;  %1911 = vrot.lane.b32.xlu0 %v4341_v25, %s2823_s27  ;;  %5682 = vst [vmem:[#allocation95_spill] sm:$0xff] %v4349_v28 }
 0x362   : > { %v1722_v11 = vpop.permute.xlu1 %1721  ;;  %v1762_v31 = vsel %vm434_vm2, %v4166_v29, %v1676_v27 }
 0x363   : > { %v1793_v55 = vsel %vm434_vm2, %v1722_v11, %v4083_v22  ;;  %v4367_v22 = vmax.f32 %v4013_v37, %v1762_v31  ;;  %v1737_v31 = vsel %vm434_vm2, %v1706_v56, %v1722_v11 }
 0x364   : > { %v4358_v12 = vmax.f32 %v3873_v16, %v1793_v55  ;;  %v1745_v55 = vsel %vm434_vm2, %v1690_v52, %v1706_v56  ;;  %v4392_v17 = vmax.f32 %v4015_v61, %v1737_v31 }
 0x365   : > { %v1708_v41 = vpop.permute.xlu0 %1707  ;;  %1927 = vrot.lane.b32.xlu0 %v4349_v28, %s2823_s27  ;;  %v4379_v28 = vmax.f32 %v3999_v58, %v1745_v55 }
 0x366   : > { %1865 = vrot.lane.b32.xlu1 %v4358_v12, %s2823_s27  ;;  %v1678_v33 = vpop.permute.xlu1 %1677 }
 0x367   : > { %v1763_v56 = vsel %vm434_vm2, %v4190_v44, %v1678_v33 }
 0x368   : > { %v4407_v31 = vmax.f32 %v4023_v51, %v1763_v56 }
 0x369   : > { %v1692_v29 = vpop.permute.xlu0 %1691  ;;  %1931 = vrot.lane.b32.xlu0 %v4367_v22, %s2823_s27 }
 0x36a   : > { %1945 = vrot.lane.b32.xlu1 %v4370_v14, %s2823_s27  ;;  %v1710_v23 = vpop.permute.xlu1 %1709  ;;  %v1754_v55 = vsel %vm434_vm2, %v1676_v27, %v1692_v29  ;;  %v1746_v27 = vsel %vm434_vm2, %v1692_v29, %v1708_v41 }
 0x36d   : > { %v1724_v25 = vpop.permute.xlu0 %1723 }
 0x36e   : > { %v1794_v18 = vsel %vm434_vm2, %v1724_v25, %v4124_v3  ;;  %1961 = vrot.lane.b32.xlu1 %v4379_v28, %s2823_s27  ;;  %v1694_v52 = vpop.permute.xlu1 %1693  ;;  %v1738_v56 = vsel %vm434_vm2, %v1708_v41, %v1724_v25 }
 0x36f   : > { %v4389_v37 = vmax.f32 %v3889_v60, %v1794_v18  ;;  %v4404_v18 = vmax.f32 %v4029_v36, %v1754_v55  ;;  %v4419_v55 = vmax.f32 %v4021_v39, %v1746_v27  ;;  %v4433_v27 = vmax.f32 %v4037_v34, %v1738_v56 }
 0x370   : > { %v1747_v25 = vsel %vm434_vm2, %v1694_v52, %v1710_v23 }
 0x371   : > { %5683 = vst [vmem:[#allocation96_spill] sm:$0xff] %v4389_v37  ;;  %v1680_v11 = vpop.permute.xlu0 %1679  ;;  %1867 = vrot.lane.b32.xlu0 %v4389_v37, %s2823_s27 }
 0x372   : > { %1977 = vrot.lane.b32.xlu1 %v4392_v17, %s2823_s27  ;;  %v1726_v3 = vpop.permute.xlu1 %1725  ;;  %v1764_v41 = vsel %vm434_vm2, %v4222_v35, %v1680_v11 }
 0x373   : > { %v1795_v44 = vsel %vm434_vm2, %v1726_v3, %v4142_v24  ;;  %v1755_v24 = vsel %vm434_vm2, %v1678_v33, %v1694_v52  ;;  %v4448_v56 = vmax.f32 %v4045_v57, %v1764_v41  ;;  %v1739_v52 = vsel %vm434_vm2, %v1710_v23, %v1726_v3 }
 0x374   : > { %v4424_v29 = vmax.f32 %v3895_v63, %v1795_v44  ;;  %v4436_v39 = vmax.f32 %v4039_v6, %v1755_v24  ;;  %v4451_v24 = vmax.f32 %v4031_v62, %v1747_v25  ;;  %v4466_v25 = vmax.f32 %v4047_v2, %v1739_v52  ;;  %v5747_v2 = vld [vmem:[#allocation11_spill] sm:$0xff] }
 0x375   : > { %v1712_v60 = vpop.permute.xlu0 %1711  ;;  %1947 = vrot.lane.b32.xlu0 %v4404_v18, %s2823_s27 }
 0x376   : > { %1933 = vrot.lane.b32.xlu1 %v4407_v31, %s2823_s27  ;;  %v1682_v37 = vpop.permute.xlu1 %1681  ;;  %5684 = vst [vmem:[#allocation97_spill] sm:$0xff] %v4424_v29  ;;  %5686 = vst [vmem:[#allocation99_spill] sm:$0xff] %v4466_v25 }
 0x377   : > { %v1765_v23 = vsel %vm434_vm2, %v4246_v9, %v1682_v37 }
 0x378   : > { %v4481_v52 = vmax.f32 %v4055_v45, %v1765_v23 }
 0x379   : > { %v1696_v51 = vpop.permute.xlu0 %1695  ;;  %1963 = vrot.lane.b32.xlu0 %v4419_v55, %s2823_s27 }
 0x37a   : > { %1869 = vrot.lane.b32.xlu1 %v4424_v29, %s2823_s27  ;;  %v1714_v36 = vpop.permute.xlu1 %1713  ;;  %5688 = vst [vmem:[#allocation101_spill] sm:$0xff] %v4481_v52 }
 0x37d   : > { %v1728_v33 = vpop.permute.xlu0 %1727  ;;  %1979 = vrot.lane.b32.xlu0 %v4433_v27, %s2823_s27 }
 0x37e   : > { %1949 = vrot.lane.b32.xlu1 %v4436_v39, %s2823_s27  ;;  %v1698_v44 = vpop.permute.xlu1 %1697  ;;  %v1796_v35 = vsel %vm434_vm2, %v1728_v33, %v4183_v38  ;;  %v1756_v38 = vsel %vm434_vm2, %v1680_v11, %v1696_v51  ;;  %v1748_v11 = vsel %vm434_vm2, %v1696_v51, %v1712_v60  ;;  %v1740_v23 = vsel %vm434_vm2, %v1712_v60, %v1728_v33 }
 0x37f   : > { %v4463_v41 = vmax.f32 %v3917_v15, %v1796_v35  ;;  %v4478_v35 = vmax.f32 %v4061_v5, %v1756_v38  ;;  %v4493_v38 = vmax.f32 %v4053_v19, %v1748_v11  ;;  %v4507_v11 = vmax.f32 %v4069_v10, %v1740_v23 }
 0x381   : > { %v1684_v6 = vpop.permute.xlu0 %1683  ;;  %1935 = vrot.lane.b32.xlu0 %v4448_v56, %s2823_s27  ;;  %5685 = vst [vmem:[#allocation98_spill] sm:$0xff] %v4463_v41  ;;  %5687 = vst [vmem:[#allocation100_spill] sm:$0xff] %v4478_v35 }
 0x382   : > { %1965 = vrot.lane.b32.xlu1 %v4451_v24, %s2823_s27  ;;  %v1730_v63 = vpop.permute.xlu1 %1729  ;;  %5689 = vst [vmem:[#allocation102_spill] sm:$0xff] %v4493_v38  ;;  %5691 = vst [vmem:[#allocation104_spill] sm:$0xff] %v4507_v11  ;;  %v1766_v60 = vsel %vm434_vm2, %v4276_v53, %v1684_v6 }
 0x383   : > { %v1797_v9 = vsel %vm434_vm2, %v1730_v63, %v4205_v47  ;;  %v1757_v47 = vsel %vm434_vm2, %v1682_v37, %v1698_v44  ;;  %v1749_v37 = vsel %vm434_vm2, %v1698_v44, %v1714_v36  ;;  %v4522_v23 = vmax.f32 %v4077_v50, %v1766_v60  ;;  %v5695_v60 = vld [vmem:[#allocation38_spill] sm:$0xff] }
 0x384   : > { %v4498_v51 = vmax.f32 %v3927_v43, %v1797_v9  ;;  %v4510_v19 = vmax.f32 %v4071_v30, %v1757_v47  ;;  %v4525_v47 = vmax.f32 %v4063_v1, %v1749_v37  ;;  %v1741_v44 = vsel %vm434_vm2, %v1714_v36, %v1730_v63  ;;  %v5697_v37 = vld [vmem:[#allocation67_spill] sm:$0xff] }
 0x385   : > { %v1716_v3 = vpop.permute.xlu0 %1715  ;;  %1871 = vrot.lane.b32.xlu0 %v4463_v41, %s2823_s27  ;;  %5693 = vst [vmem:[#allocation106_spill] sm:$0xff] %v4522_v23  ;;  %v4542_v1 = vmax.f32 %v5697_v37, %v1741_v44  ;;  %v5701_v44 = vld [vmem:[#allocation69_spill] sm:$0xff] }
 0x386   : > { %1981 = vrot.lane.b32.xlu1 %v4466_v25, %s2823_s27  ;;  %v1686_v57 = vpop.permute.xlu1 %1685  ;;  %5690 = vst [vmem:[#allocation103_spill] sm:$0xff] %v4498_v51  ;;  %5692 = vst [vmem:[#allocation105_spill] sm:$0xff] %v4510_v19 }
 0x387   : > { %5694 = vst [vmem:[#allocation107_spill] sm:$0xff] %v4525_v47  ;;  %5698 = vst [vmem:[#allocation109_spill] sm:$0xff] %v4542_v1  ;;  %v1767_v63 = vsel %vm434_vm2, %v4300_v0, %v1686_v57 }
 0x388   : > { %v4559_v37 = vmax.f32 %v5701_v44, %v1767_v63  ;;  %v5705_v44 = vld [vmem:[#allocation41_spill] sm:$0xff] }
 0x389   : > { %v1700_v15 = vpop.permute.xlu0 %1699  ;;  %1951 = vrot.lane.b32.xlu0 %v4478_v35, %s2823_s27 }
 0x38a   : > { %1937 = vrot.lane.b32.xlu1 %v4481_v52, %s2823_s27  ;;  %v1718_v41 = vpop.permute.xlu1 %1717  ;;  %5702 = vst [vmem:[#allocation111_spill] sm:$0xff] %v4559_v37 }
 0x38d   : > { %v1732_v45 = vpop.permute.xlu0 %1731  ;;  %1967 = vrot.lane.b32.xlu0 %v4493_v38, %s2823_s27 }
 0x38e   : > { %1873 = vrot.lane.b32.xlu1 %v4498_v51, %s2823_s27  ;;  %v1702_v5 = vpop.permute.xlu1 %1701  ;;  %v1798_v53 = vsel %vm434_vm2, %v1732_v45, %v4240_v54  ;;  %v1758_v54 = vsel %vm434_vm2, %v1684_v6, %v1700_v15  ;;  %v1750_v6 = vsel %vm434_vm2, %v1700_v15, %v1716_v3  ;;  %v1742_v63 = vsel %vm434_vm2, %v1716_v3, %v1732_v45  ;;  %v5709_v45 = vld [vmem:[#allocation73_spill] sm:$0xff] }
 0x38f   : > { %v4539_v50 = vmax.f32 %v5695_v60, %v1798_v53  ;;  %v5699_v53 = vld [vmem:[#allocation70_spill] sm:$0xff] }
 0x390   : > { %v4556_v60 = vmax.f32 %v5699_v53, %v1758_v54 }
 0x391   : > { %v1688_v33 = vpop.permute.xlu0 %1687  ;;  %1983 = vrot.lane.b32.xlu0 %v4507_v11, %s2823_s27  ;;  %5696 = vst [vmem:[#allocation108_spill] sm:$0xff] %v4539_v50  ;;  %v5746_v11 = vld [vmem:[#allocation13_spill] sm:$0xff] }
 0x392   : > { %1953 = vrot.lane.b32.xlu1 %v4510_v19, %s2823_s27  ;;  %v1734_v9 = vpop.permute.xlu1 %1733  ;;  %5700 = vst [vmem:[#allocation110_spill] sm:$0xff] %v4556_v60  ;;  %v5745_v19 = vld [vmem:[#allocation81_spill] sm:$0xff] }
 0x393   : > { %v1799_v0 = vsel %vm434_vm2, %v1734_v9, %v4261_v59  ;;  %v1759_v59 = vsel %vm434_vm2, %v1686_v57, %v1702_v5  ;;  %v1751_v57 = vsel %vm434_vm2, %v1702_v5, %v1718_v41  ;;  %v1743_v5 = vsel %vm434_vm2, %v1718_v41, %v1734_v9 }
 0x394   : > { %v4576_v53 = vmax.f32 %v5705_v44, %v1799_v0  ;;  %v4592_v3 = vmax.f32 %v5709_v45, %v1759_v59  ;;  %v1768_v0 = vsel %vm434_vm2, %v4334_v20, %v1688_v33  ;;  %v5713_v45 = vld [vmem:[#allocation71_spill] sm:$0xff] }
 0x395   : > { %v1720_v30 = vpop.permute.xlu0 %1719  ;;  %1939 = vrot.lane.b32.xlu0 %v4522_v23, %s2823_s27 }
 0x396   : > { %1969 = vrot.lane.b32.xlu1 %v4525_v47, %s2823_s27  ;;  %v4536_v43 = vpop.permute.xlu1 %1881  ;;  %5706 = vst [vmem:[#allocation113_spill] sm:$0xff] %v4576_v53  ;;  %5710 = vst [vmem:[#allocation115_spill] sm:$0xff] %v4592_v3 }
 0x399   : > { %1875 = vrot.lane.b32.xlu0 %v4539_v50, %s2823_s27  ;;  %v1704_v36 = vpop.permute.xlu0 %1703 }
 0x39a   : > { %1985 = vrot.lane.b32.xlu1 %v4542_v1, %s2823_s27  ;;  %v4553_v51 = vpop.permute.xlu1 %1897  ;;  %v5703_v1 = vld [vmem:[#allocation68_spill] sm:$0xff]  ;;  %v1760_v41 = vsel %vm434_vm2, %v1688_v33, %v1704_v36 }
 0x39b   : > { %v4571_v54 = vmax.f32 %v5703_v1, %v1750_v6  ;;  %v5707_v6 = vld [vmem:[#allocation72_spill] sm:$0xff]  ;;  %v4651_v33 = vmax.f32 %v4137_v21, %v1760_v41 }
 0x39c   : > { %v4589_v1 = vmax.f32 %v5707_v6, %v1742_v63  ;;  %v5711_v63 = vld [vmem:[#allocation74_spill] sm:$0xff]  ;;  %v5723_v21 = vld [vmem:[#allocation80_spill] sm:$0xff] }
 0x39d   : > { %1955 = vrot.lane.b32.xlu0 %v4556_v60, %s2823_s27  ;;  %v1736_v50 = vpop.permute.xlu0 %1735  ;;  %5704 = vst [vmem:[#allocation112_spill] sm:$0xff] %v4571_v54  ;;  %v4608_v59 = vmax.f32 %v5711_v63, %v1768_v0  ;;  %5719 = vst [vmem:[#allocation120_spill] sm:$0xff] %v4651_v33 }
 0x39e   : > { %1941 = vrot.lane.b32.xlu1 %v4559_v37, %s2823_s27  ;;  %v4578_v15 = vpop.permute.xlu1 %1913  ;;  %5708 = vst [vmem:[#allocation114_spill] sm:$0xff] %v4589_v1  ;;  %v1800_v20 = vsel %vm434_vm2, %v1736_v50, %v4294_v32  ;;  %v5717_v32 = vld [vmem:[#allocation75_spill] sm:$0xff] }
 0x39f   : > { %5712 = vst [vmem:[#allocation116_spill] sm:$0xff] %v4608_v59 }
 0x3a1   : > { %1971 = vrot.lane.b32.xlu0 %v4571_v54, %s2823_s27  ;;  %v4584_v60 = vpop.permute.xlu0 %1883 }
 0x3a2   : > { %1877 = vrot.lane.b32.xlu1 %v4576_v53, %s2823_s27  ;;  %v4611_v53 = vmax.f32 %v5713_v45, %v1751_v57  ;;  %v4631_v45 = vmax.f32 %v5717_v32, %v1743_v5 }
 0x3a4   : > { %v4597_v44 = vpop.permute.xlu1 %1885  ;;  %5714 = vst [vmem:[#allocation117_spill] sm:$0xff] %v4611_v53  ;;  %5718 = vst [vmem:[#allocation119_spill] sm:$0xff] %v4631_v45 }
 0x3a5   : > { %1987 = vrot.lane.b32.xlu0 %v4589_v1, %s2823_s27  ;;  %v4603_v37 = vpop.permute.xlu0 %1899 }
 0x3a6   : > { %1957 = vrot.lane.b32.xlu1 %v4592_v3, %s2823_s27  ;;  %v5715_v3 = vld [vmem:[#allocation46_spill] sm:$0xff] }
 0x3a7   : > { %v4623_v0 = vmax.f32 %v5715_v3, %v1800_v20 }
 0x3a8   : > { %v1902_v6 = vpop.permute.xlu1 %1901 }
 0x3a9   : > { %1943 = vrot.lane.b32.xlu0 %v4608_v59, %s2823_s27  ;;  %5716 = vst [vmem:[#allocation118_spill] sm:$0xff] %v4623_v0  ;;  %v2035_v57 = vsel %vm499_vm5, %v4597_v44, %v1902_v6  ;;  %v4628_v63 = vpop.permute.xlu0 %1915 }
 0x3aa   : > { %1973 = vrot.lane.b32.xlu1 %v4611_v53, %s2823_s27  ;;  %v4643_v20 = vmax.f32 %v4195_v26, %v2035_v57  ;;  %v1744_v57 = vsel %vm434_vm2, %v1720_v30, %v1736_v50 }
 0x3ac   : > { %v4635_v9 = vpop.permute.xlu1 %1917 }
 0x3ad   : > { %v2027_v59 = vsel %vm499_vm5, %v1902_v6, %v4635_v9  ;;  %1879 = vrot.lane.b32.xlu0 %v4623_v0, %s2823_s27  ;;  %v1752_v6 = vsel %vm434_vm2, %v1704_v36, %v1720_v30  ;;  %v4676_v0 = vmax.f32 %v5723_v21, %v1744_v57 }
 0x3ae   : > { %v4646_v3 = vmax.f32 %v4210_v4, %v2027_v59  ;;  %1989 = vrot.lane.b32.xlu1 %v4631_v45, %s2823_s27  ;;  %v5720_v4 = vld [vmem:[#allocation76_spill] sm:$0xff] }
 0x3af   : > { %v4653_v5 = vpop.permute.xlu0 %1887  ;;  %v4664_v26 = vmax.f32 %v5720_v4, %v1752_v6  ;;  %5724 = vst [vmem:[#allocation123_spill] sm:$0xff] %v4676_v0 }
 0x3b0   : > { %v4659_v32 = vmax.f32 %v4646_v3, %v4643_v20 }
 0x3b1   : > { %1959 = vrot.lane.b32.xlu0 %v4651_v33, %s2823_s27  ;;  %5721 = vst [vmem:[#allocation121_spill] sm:$0xff] %v4664_v26 }
 0x3b3   : > { %v1904_v59 = vpop.permute.xlu0 %1903 }
 0x3b4   : > { %v4668_v41 = vpop.permute.xlu1 %1889  ;;  %v2036_v36 = vsel %vm499_vm5, %v4653_v5, %v1904_v59 }
 0x3b5   : > { %5722 = vst [vmem:[#allocation122_spill] sm:$0xff] %v4668_v41  ;;  %1975 = vrot.lane.b32.xlu0 %v4664_v26, %s2823_s27  ;;  %v4684_v30 = vmax.f32 %v4227_v49, %v2036_v36 }
 0x3b7   : > { %v4678_v33 = vpop.permute.xlu0 %1919  ;;  %5725 = vst [vmem:[#allocation124_spill] sm:$0xff] %v4684_v30 }
 0x3b8   : > { %v2028_v6 = vsel %vm499_vm5, %v1904_v59, %v4678_v33  ;;  %v1906_v4 = vpop.permute.xlu1 %1905  ;;  %v5729_v59 = vld [vmem:[#allocation88_spill] sm:$0xff] }
 0x3b9   : > { %v4687_v50 = vmax.f32 %v4249_v40, %v2028_v6  ;;  %1991 = vrot.lane.b32.xlu0 %v4676_v0, %s2823_s27  ;;  %v2037_v21 = vsel %vm499_vm5, %v4668_v41, %v1906_v4 }
 0x3ba   : > { %v4704_v40 = vmax.f32 %v4252_v13, %v2037_v21 }
 0x3bb   : > { %v4693_v57 = vmax.f32 %v4687_v50, %v4684_v30 }
 0x3bc   : > { %v4698_v26 = vpop.permute.xlu1 %1921  ;;  %5728 = vst [vmem:[#allocation127_spill] sm:$0xff] %v4704_v40 }
 0x3bd   : > { %5726 = vst [vmem:[#allocation125_spill] sm:$0xff] %v4693_v57  ;;  %5727 = vst [vmem:[#allocation126_spill] sm:$0xff] %v4698_v26  ;;  %v2029_v49 = vsel %vm499_vm5, %v1906_v4, %v4698_v26  ;;  %v5762_v26 = vld [vmem:[#allocation85_spill] sm:$0xff] }
 0x3be   : > { %v4707_v36 = vmax.f32 %v5729_v59, %v2029_v49 }
 0x3bf   : > { %v4709_v6 = vpop.permute.xlu0 %1891 }
 0x3c0   : > { %5730 = vst [vmem:[#allocation88_spill] sm:$0xff] %v4707_v36  ;;  %5731 = vst [vmem:[#allocation128_spill] sm:$0xff] %v4709_v6  ;;  %v4713_v0 = vmax.f32 %v4707_v36, %v4704_v40  ;;  %v5761_v36 = vld [vmem:[#allocation84_spill] sm:$0xff] }
 0x3c2   : > { %5732 = vst [vmem:[#allocation129_spill] sm:$0xff] %v4713_v0 }
 0x3c3   : > { %v1908_v45 = vpop.permute.xlu0 %1907 }
 0x3c4   : > { %v4715_v53 = vpop.permute.xlu1 %1893  ;;  %v2038_v1 = vsel %vm499_vm5, %v4709_v6, %v1908_v45 }
 0x3c5   : > { %5733 = vst [vmem:[#allocation130_spill] sm:$0xff] %v4715_v53  ;;  %v4728_v49 = vmax.f32 %v4281_v42, %v2038_v1 }
 0x3c7   : > { %v4720_v4 = vpop.permute.xlu0 %1923  ;;  %5736 = vst [vmem:[#allocation133_spill] sm:$0xff] %v4728_v49 }
 0x3c8   : > { %5734 = vst [vmem:[#allocation131_spill] sm:$0xff] %v4720_v4  ;;  %v2030_v21 = vsel %vm499_vm5, %v1908_v45, %v4720_v4  ;;  %v4725_v13 = vpop.permute.xlu1 %1909 }
 0x3c9   : > { %5735 = vst [vmem:[#allocation132_spill] sm:$0xff] %v4725_v13  ;;  %v4731_v59 = vmax.f32 %v4303_v8, %v2030_v21  ;;  %v2033_v21 = vsel %vm499_vm5, %v4536_v43, %v4553_v51 }
 0x3cb   : > { %5737 = vst [vmem:[#allocation134_spill] sm:$0xff] %v4731_v59  ;;  %v4735_v53 = vmax.f32 %v4731_v59, %v4728_v49  ;;  %v5744_v59 = vld [vmem:[#allocation79_spill] sm:$0xff] }
 0x3cc   : > { %v4737_v54 = vpop.permute.xlu1 %1925  ;;  %v2059_v23 = vmax.f32 %v5744_v59, %v2033_v21  ;;  %v5875_v59 = vld [vmem:[#allocation78_spill] sm:$0xff] }
 0x3cd   : > { %5738 = vst [vmem:[#allocation135_spill] sm:$0xff] %v4735_v53  ;;  %5739 = vst [vmem:[#allocation136_spill] sm:$0xff] %v4737_v54 }
 0x3cf   : > { %v4739_v10 = vpop.permute.xlu0 %1895 }
 0x3d0   : > { %5740 = vst [vmem:[#allocation137_spill] sm:$0xff] %v4739_v10  ;;  %v1930_v47 = vpop.permute.xlu1 %1929  ;;  %v5743_v10 = vld [vmem:[#allocation77_spill] sm:$0xff] }
 0x3d1   : > { %v2017_v1 = vsel %vm499_vm5, %v4578_v15, %v1930_v47 }
 0x3d2   : > { %v2061_v13 = vmax.f32 %v4330_v7, %v2017_v1  ;;  %v5751_v7 = vld [vmem:[#allocation12_spill] sm:$0xff]  ;;  %v2026_v1 = vsel %vm499_vm5, %v4603_v37, %v4628_v63 }
 0x3d3   : > { %v4741_v6 = vpop.permute.xlu0 %1911 }
 0x3d4   : > { %5741 = vst [vmem:[#allocation138_spill] sm:$0xff] %v4741_v6 }
 0x3d7   : > { %v4743_v0 = vpop.permute.xlu0 %1927 }
 0x3d8   : > { %v1866_v45 = vpop.permute.xlu1 %1865  ;;  %5742 = vst [vmem:[#allocation139_spill] sm:$0xff] %v4743_v0  ;;  %v2025_v0 = vsel %vm499_vm5, %v4553_v51, %v4578_v15  ;;  %v5748_v51 = vrot.slane %v5746_v11, %v5747_v2  ;;  %v5752_v15 = vrot.slane %v5746_v11, %v5751_v7  ;;  %v5759_v11 = vld [vmem:[#allocation18_spill] sm:$0xff] }
 0x3d9   : > { %v2041_v42 = vsel %vm499_vm5, %v1866_v45, %v4536_v43  ;;  %vm2322_vm12 = vcmp.eq.s32.totalorder %v5759_v11, 1 }
 0x3da   : > { %v2058_v6 = vmax.f32 %v5743_v10, %v2041_v42  ;;  %vm4772_vm6 = vcmp.eq.s32.totalorder %v5748_v51, 1  ;;  %vm4779_vm7 = vcmp.eq.s32.totalorder %v5752_v15, 1  ;;  %v5758_v42 = vld [vmem:[#allocation17_spill] sm:$0xff] }
 0x3db   : > { %v1932_v54 = vpop.permute.xlu0 %1931  ;;  %vm2321_vm11 = vcmp.eq.s32.totalorder %v5758_v42, 1 }
 0x3dc   : > { %v1946_v8 = vpop.permute.xlu1 %1945  ;;  %v2123_v2 = vmax.f32 %v2059_v23, %v2058_v6 }
 0x3dd   : > { %v2009_v53 = vsel %vm499_vm5, %v1930_v47, %v1946_v8  ;;  %v2060_v47 = vmax.f32 %v5745_v19, %v2025_v0  ;;  %v5757_v0 = vld [vmem:[#allocation15_spill] sm:$0xff] }
 0x3de   : > { %v2062_v4 = vmax.f32 %v4370_v14, %v2009_v53  ;;  %v5755_v14 = vld [vmem:[#allocation14_spill] sm:$0xff]  ;;  %v5756_v53 = vld [vmem:[#allocation16_spill] sm:$0xff]  ;;  %vm2319_vm10 = vcmp.eq.s32.totalorder %v5757_v0, 1 }
 0x3df   : > { %vm2318_vm8 = vcmp.eq.s32.totalorder %v5755_v14, 1  ;;  %vm2320_vm9 = vcmp.eq.s32.totalorder %v5756_v53, 1  ;;  %v2125_v21 = vmax.f32 %v2061_v13, %v2060_v47  ;;  %v5876_v14 = vld [vmem:[#allocation76_spill] sm:$0xff] }
 0x3e0   : > { %v1962_v49 = vpop.permute.xlu1 %1961  ;;  %v2126_v15 = vmax.f32 %v2062_v4, %v2061_v13  ;;  %v5763_v13 = vld [vmem:[#allocation82_spill] sm:$0xff] }
 0x3e1   : > { %v2001_v43 = vsel %vm499_vm5, %v1946_v8, %v1962_v49  ;;  %v5760_v8 = vld [vmem:[#allocation19_spill] sm:$0xff]  ;;  %v2189_v35 = vmax.f32 %v2125_v21, %v2123_v2 }
 0x3e2   : > { %v2063_v40 = vmax.f32 %v4379_v28, %v2001_v43  ;;  %v2034_v28 = vsel %vm499_vm5, %v4584_v60, %v4603_v37  ;;  %vm2323_vm13 = vcmp.eq.s32.totalorder %v5760_v8, 1  ;;  %v2018_v43 = vsel %vm499_vm5, %v4628_v63, %v1932_v54 }
 0x3e3   : > { %v4789_v19 = vpop.permute.xlu0 %1867  ;;  %v2124_v37 = vmax.f32 %v2060_v47, %v2059_v23  ;;  %v4811_v57 = vmax.f32 %v5761_v36, %v2034_v28 }
 0x3e4   : > { %v2042_v51 = vsel %vm499_vm5, %v4789_v19, %v4584_v60  ;;  %v1978_v7 = vpop.permute.xlu1 %1977  ;;  %v2127_v62 = vmax.f32 %v2063_v40, %v2062_v4  ;;  %v2068_v60 = vmax.f32 %v5762_v26, %v2026_v1  ;;  %v2069_v4 = vmax.f32 %v4367_v22, %v2018_v43 }
 0x3e5   : > { %v1993_v41 = vsel %vm499_vm5, %v1962_v49, %v1978_v7  ;;  %v2049_v38 = vsel %vm499_vm5, %v1978_v7, %v1866_v45  ;;  %v2066_v30 = vmax.f32 %v5763_v13, %v2042_v51  ;;  %v2190_v47 = vmax.f32 %v2126_v15, %v2124_v37  ;;  %v5764_v7 = vld [vmem:[#allocation21_spill] sm:$0xff] }
 0x3e6   : > { %v2057_v63 = vmax.f32 %v4358_v12, %v2049_v38  ;;  %v2064_v52 = vmax.f32 %v4392_v17, %v1993_v41  ;;  %v2191_v28 = vmax.f32 %v2127_v62, %v2125_v21  ;;  %v4825_v1 = vmax.f32 %v2069_v4, %v2068_v60 }
 0x3e7   : > { %v1948_v49 = vpop.permute.xlu0 %1947 }
 0x3e8   : > { %v2121_v25 = vmax.f32 %v2057_v63, %v2064_v52  ;;  %v2122_v29 = vmax.f32 %v2058_v6, %v2057_v63  ;;  %v2128_v45 = vmax.f32 %v2064_v52, %v2063_v40  ;;  %v2010_v23 = vsel %vm499_vm5, %v1932_v54, %v1948_v49  ;;  %v1934_v36 = vpop.permute.xlu1 %1933 }
 0x3e9   : > { %v2070_v12 = vmax.f32 %v4404_v18, %v2010_v23  ;;  %v2019_v17 = vsel %vm499_vm5, %v4635_v9, %v1934_v36  ;;  %v4828_v52 = vmax.f32 %v4811_v57, %v2066_v30 }
 0x3ea   : > { %v2185_v22 = vmax.f32 %v2121_v25, %v2127_v62  ;;  %v2186_v38 = vmax.f32 %v2122_v29, %v2128_v45  ;;  %v2187_v26 = vmax.f32 %v2123_v2, %v2121_v25  ;;  %v2188_v41 = vmax.f32 %v2124_v37, %v2122_v29 }
 0x3eb   : > { %v2192_v54 = vmax.f32 %v2128_v45, %v2126_v15  ;;  %v2077_v40 = vmax.f32 %v4407_v31, %v2019_v17  ;;  %v1964_v6 = vpop.permute.xlu0 %1963  ;;  %v2134_v25 = vmax.f32 %v2070_v12, %v2069_v4  ;;  %v5765_v15 = vld [vmem:[#allocation20_spill] sm:$0xff]  ;;  %v5767_v4 = vld [vmem:[#allocation51_spill] sm:$0xff] }
 0x3ec   : > { %v2249_v21 = vmax.f32 %v2185_v22, %v2189_v35  ;;  %v2250_v43 = vmax.f32 %v2186_v38, %v2190_v47  ;;  %v2251_v18 = vmax.f32 %v2187_v26, %v2191_v28  ;;  %v2002_v51 = vsel %vm499_vm5, %v1948_v49, %v1964_v6  ;;  %v4833_v9 = vpop.permute.xlu1 %1869  ;;  %v5768_v28 = vld [vmem:[#allocation83_spill] sm:$0xff]  ;;  %v5769_v22 = vld [vmem:[#allocation96_spill] sm:$0xff] }
 0x3ed   : > { %v2252_v62 = vmax.f32 %v2188_v41, %v2192_v54  ;;  %v4836_v29 = vmax.f32 %v2077_v40, %v4646_v3  ;;  %v2071_v2 = vmax.f32 %v4419_v55, %v2002_v51  ;;  %v5766_v3 = vld [vmem:[#allocation22_spill] sm:$0xff]  ;;  %v2197_v41 = vmax.f32 %v4825_v1, %v4828_v52 }
 0x3ee   : > { %v2324_v31 = vsel %vm4772_vm6, %v2249_v21, %v3873_v16  ;;  %v2325_v35 = vsel %vm4779_vm7, %v2250_v43, %v5764_v7  ;;  %v2326_v37 = vsel %vm2318_vm8, %v2251_v18, %v5765_v15  ;;  %v2328_v63 = vsel %vm2320_vm9, %v2249_v21, %v3991_v48 }
 0x3ef   : > { %v2327_v55 = vsel %vm2319_vm10, %v2252_v62, %v5766_v3  ;;  %v2329_v16 = vsel %vm2321_vm11, %v2250_v43, %v5767_v4  ;;  %v2330_v13 = vsel %vm2322_vm12, %v2251_v18, %v3999_v58  ;;  %v2331_v49 = vsel %vm2323_vm13, %v2252_v62, %v4015_v61  ;;  %2388 = vst [vmem:[%s4863_s10] sm:$0xff] %v2324_v31  ;;  %v1980_v48 = vpop.permute.xlu0 %1979 }
 0x3f0   : > { %2389 = vst [vmem:[%s4863_s10 + $0x8] sm:$0xff] %v2325_v35  ;;  %2390 = vst [vmem:[%s4863_s10 + $0x10] sm:$0xff] %v2326_v37  ;;  %v2135_v58 = vmax.f32 %v2071_v2, %v2070_v12  ;;  %v2043_v61 = vsel %vm499_vm5, %v4833_v9, %v4597_v44  ;;  %v1994_v45 = vsel %vm499_vm5, %v1964_v6, %v1980_v48  ;;  %v1950_v47 = vpop.permute.xlu1 %1949 }
 0x3f1   : > { %2392 = vst [vmem:[%s4863_s10 + $0x20] sm:$0xff] %v2328_v63  ;;  %2391 = vst [vmem:[%s4863_s10 + $0x18] sm:$0xff] %v2327_v55  ;;  %v2050_v23 = vsel %vm499_vm5, %v1980_v48, %v4789_v19  ;;  %v4883_v17 = vmax.f32 %v5768_v28, %v2043_v61  ;;  %v2072_v12 = vmax.f32 %v4433_v27, %v1994_v45  ;;  %v5770_v55 = vld [vmem:[#allocation23_spill] sm:$0xff] }
 0x3f2   : > { %2393 = vst [vmem:[%s4863_s10 + $0x28] sm:$0xff] %v2329_v16  ;;  %2394 = vst [vmem:[%s4863_s10 + $0x30] sm:$0xff] %v2330_v13  ;;  %v2065_v38 = vmax.f32 %v5769_v22, %v2050_v23  ;;  %v2011_v26 = vsel %vm499_vm5, %v1934_v36, %v1950_v47  ;;  %v2132_v44 = vmax.f32 %v2068_v60, %v4811_v57  ;;  %v5771_v16 = vld [vmem:[#allocation26_spill] sm:$0xff]  ;;  %v5772_v13 = vld [vmem:[#allocation24_spill] sm:$0xff] }
 0x3f3   : > { %2395 = vst [vmem:[%s4863_s10 + $0x38] sm:$0xff] %v2331_v49  ;;  %v2078_v54 = vmax.f32 %v4436_v39, %v2011_v26  ;;  %v4895_v19 = vmax.f32 %v4643_v20, %v4883_v17  ;;  %v2136_v43 = vmax.f32 %v2072_v12, %v2071_v2  ;;  %v1936_v18 = vpop.permute.xlu0 %1935  ;;  %v2199_v27 = vmax.f32 %v2135_v58, %v4825_v1  ;;  %v5773_v49 = vld [vmem:[#allocation52_spill] sm:$0xff]  ;;  %v5775_v61 = vld [vmem:[#allocation55_spill] sm:$0xff]  ;;  %v5776_v23 = vld [vmem:[#allocation53_spill] sm:$0xff] }
 0x3f4   : > { %v2129_v6 = vmax.f32 %v2065_v38, %v2072_v12  ;;  %v2130_v21 = vmax.f32 %v2066_v30, %v2065_v38  ;;  %v2198_v51 = vmax.f32 %v2134_v25, %v2132_v44  ;;  %v2020_v57 = vsel %vm499_vm5, %v4678_v33, %v1936_v18  ;;  %v1966_v60 = vpop.permute.xlu1 %1965  ;;  %v5777_v38 = vld [vmem:[#allocation86_spill] sm:$0xff] }
 0x3f5   : > { %v4898_v62 = vmax.f32 %v2078_v54, %v2077_v40  ;;  %v2205_v39 = vmax.f32 %v4836_v29, %v4895_v19  ;;  %v2200_v2 = vmax.f32 %v2136_v43, %v2134_v25  ;;  %v2085_v1 = vmax.f32 %v4448_v56, %v2020_v57 }
 0x3f6   : > { %v2193_v36 = vmax.f32 %v2129_v6, %v2135_v58  ;;  %v2194_v20 = vmax.f32 %v2130_v21, %v2136_v43  ;;  %v2195_v31 = vmax.f32 %v4828_v52, %v2129_v6  ;;  %v2196_v30 = vmax.f32 %v2132_v44, %v2130_v21  ;;  %v5779_v21 = vld [vmem:[#allocation99_spill] sm:$0xff] }
 0x3f7   : > { %v2206_v7 = vmax.f32 %v4898_v62, %v4659_v32  ;;  %v2003_v33 = vsel %vm499_vm5, %v1950_v47, %v1966_v60  ;;  %v4911_v37 = vpop.permute.xlu0 %1871  ;;  %v4914_v52 = vmax.f32 %v2085_v1, %v4687_v50 }
 0x3f8   : > { %v2253_v40 = vmax.f32 %v2193_v36, %v2197_v41  ;;  %v2254_v35 = vmax.f32 %v2194_v20, %v2198_v51  ;;  %v2255_v15 = vmax.f32 %v2195_v31, %v2199_v27  ;;  %v2256_v63 = vmax.f32 %v2196_v30, %v2200_v2  ;;  %v1982_v3 = vpop.permute.xlu1 %1981  ;;  %v5778_v41 = vld [vmem:[#allocation97_spill] sm:$0xff]  ;;  %v5781_v36 = vld [vmem:[#allocation100_spill] sm:$0xff] }
 0x3f9   : > { %v2079_v25 = vmax.f32 %v4451_v24, %v2003_v33  ;;  %v2044_v56 = vsel %vm499_vm5, %v4911_v37, %v4653_v5  ;;  %v5774_v5 = vld [vmem:[#allocation28_spill] sm:$0xff]  ;;  %v1995_v26 = vsel %vm499_vm5, %v1966_v60, %v1982_v3  ;;  %v2051_v44 = vsel %vm499_vm5, %v1982_v3, %v4833_v9  ;;  %v5782_v60 = vld [vmem:[#allocation126_spill] sm:$0xff] }
 0x3fa   : > { %v2332_v4 = vsel %vm4772_vm6, %v2253_v40, %v5770_v55  ;;  %v2333_v50 = vsel %vm4779_vm7, %v2254_v35, %v5771_v16  ;;  %v2334_v24 = vsel %vm2318_vm8, %v2255_v15, %v5772_v13  ;;  %v2336_v48 = vsel %vm2320_vm9, %v2253_v40, %v5773_v49  ;;  %v5783_v40 = vld [vmem:[#allocation101_spill] sm:$0xff]  ;;  %v5785_v13 = vld [vmem:[#allocation88_spill] sm:$0xff] }
 0x3fb   : > { %v2335_v58 = vsel %vm2319_vm10, %v2256_v63, %v5774_v5  ;;  %v2337_v45 = vsel %vm2321_vm11, %v2254_v35, %v5775_v61  ;;  %v2338_v47 = vsel %vm2322_vm12, %v2255_v15, %v5776_v23  ;;  %v2339_v28 = vsel %vm2323_vm13, %v2256_v63, %v4037_v34  ;;  %2396 = vst [vmem:[%s4863_s10 + $0x40] sm:$0xff] %v2332_v4  ;;  %v1952_v34 = vpop.permute.xlu0 %1951  ;;  %v5786_v5 = vld [vmem:[#allocation102_spill] sm:$0xff] }
 0x3fc   : > { %2397 = vst [vmem:[%s4863_s10 + $0x48] sm:$0xff] %v2333_v50  ;;  %2398 = vst [vmem:[%s4863_s10 + $0x50] sm:$0xff] %v2334_v24  ;;  %v2143_v22 = vmax.f32 %v2079_v25, %v2078_v54  ;;  %v4954_v12 = vmax.f32 %v5777_v38, %v2044_v56  ;;  %v2073_v6 = vmax.f32 %v5778_v41, %v2051_v44  ;;  %v1938_v27 = vpop.permute.xlu1 %1937  ;;  %v5780_v54 = vld [vmem:[#allocation124_spill] sm:$0xff]  ;;  %v5787_v61 = vld [vmem:[#allocation122_spill] sm:$0xff] }
 0x3fd   : > { %2400 = vst [vmem:[%s4863_s10 + $0x60] sm:$0xff] %v2336_v48  ;;  %2399 = vst [vmem:[%s4863_s10 + $0x58] sm:$0xff] %v2335_v58  ;;  %v2080_v43 = vmax.f32 %v5779_v21, %v1995_v26  ;;  %v2012_v51 = vsel %vm499_vm5, %v1936_v18, %v1952_v34  ;;  %v2021_v31 = vsel %vm499_vm5, %v5782_v60, %v1938_v27  ;;  %v5792_v44 = vld [vmem:[#allocation31_spill] sm:$0xff]  ;;  %v5793_v41 = vld [vmem:[#allocation57_spill] sm:$0xff] }
 0x3fe   : > { %2401 = vst [vmem:[%s4863_s10 + $0x68] sm:$0xff] %v2337_v45  ;;  %2402 = vst [vmem:[%s4863_s10 + $0x70] sm:$0xff] %v2338_v47  ;;  %v4967_v57 = vmax.f32 %v5780_v54, %v4954_v12  ;;  %v2086_v20 = vmax.f32 %v5781_v36, %v2012_v51  ;;  %v2138_v30 = vmax.f32 %v4883_v17, %v2073_v6  ;;  %v5788_v47 = vld [vmem:[#allocation25_spill] sm:$0xff]  ;;  %v5794_v21 = vld [vmem:[#allocation56_spill] sm:$0xff] }
 0x3ff   : > { %2403 = vst [vmem:[%s4863_s10 + $0x78] sm:$0xff] %v2339_v28  ;;  %v2137_v9 = vmax.f32 %v2073_v6, %v2080_v43  ;;  %v2144_v2 = vmax.f32 %v2080_v43, %v2079_v25  ;;  %v2093_v35 = vmax.f32 %v5783_v40, %v2021_v31  ;;  %v2207_v15 = vmax.f32 %v2143_v22, %v4836_v29  ;;  %v1968_v63 = vpop.permute.xlu0 %1967  ;;  %v5784_v25 = vld [vmem:[#allocation125_spill] sm:$0xff]  ;;  %v5795_v51 = vld [vmem:[#allocation59_spill] sm:$0xff] }
 0x400   : > { %v2213_v18 = vmax.f32 %v4914_v52, %v4967_v57  ;;  %v4978_v33 = vmax.f32 %v2086_v20, %v2085_v1  ;;  %v2204_v4 = vmax.f32 %v4659_v32, %v2138_v30  ;;  %v4982_v16 = vpop.permute.xlu1 %1873  ;;  %v2004_v1 = vsel %vm499_vm5, %v1952_v34, %v1968_v63  ;;  %v5796_v60 = vld [vmem:[#allocation87_spill] sm:$0xff] }
 0x401   : > { %v2201_v56 = vmax.f32 %v2137_v9, %v2143_v22  ;;  %v2202_v3 = vmax.f32 %v2138_v30, %v2144_v2  ;;  %v2203_v55 = vmax.f32 %v4895_v19, %v2137_v9  ;;  %v2208_v17 = vmax.f32 %v2144_v2, %v4898_v62  ;;  %v5789_v19 = vld [vmem:[#allocation29_spill] sm:$0xff]  ;;  %v5791_v22 = vld [vmem:[#allocation54_spill] sm:$0xff] }
 0x402   : > { %v2214_v50 = vmax.f32 %v4978_v33, %v5784_v25  ;;  %v4988_v24 = vmax.f32 %v2093_v35, %v5785_v13  ;;  %v2087_v62 = vmax.f32 %v5786_v5, %v2004_v1  ;;  %v2045_v45 = vsel %vm499_vm5, %v4982_v16, %v5787_v61  ;;  %v5797_v2 = vld [vmem:[#allocation98_spill] sm:$0xff]  ;;  %v5801_v1 = vld [vmem:[#allocation131_spill] sm:$0xff] }
 0x403   : > { %v2257_v49 = vmax.f32 %v2201_v56, %v2205_v39  ;;  %v2258_v48 = vmax.f32 %v2202_v3, %v2206_v7  ;;  %v2259_v32 = vmax.f32 %v2203_v55, %v2207_v15  ;;  %v2260_v58 = vmax.f32 %v2204_v4, %v2208_v17  ;;  %v1984_v23 = vpop.permute.xlu0 %1983  ;;  %v5790_v7 = vld [vmem:[#allocation27_spill] sm:$0xff]  ;;  %v5798_v15 = vld [vmem:[#allocation104_spill] sm:$0xff]  ;;  %v5800_v17 = vld [vmem:[#allocation105_spill] sm:$0xff] }
 0x404   : > { %v1954_v26 = vpop.permute.xlu1 %1953  ;;  %v2151_v36 = vmax.f32 %v2087_v62, %v2086_v20  ;;  %v5033_v31 = vmax.f32 %v5796_v60, %v2045_v45  ;;  %v1996_v9 = vsel %vm499_vm5, %v1968_v63, %v1984_v23  ;;  %v2052_v30 = vsel %vm499_vm5, %v1984_v23, %v4911_v37  ;;  %v5799_v20 = vld [vmem:[#allocation127_spill] sm:$0xff]  ;;  %v5802_v5 = vld [vmem:[#allocation106_spill] sm:$0xff] }
 0x405   : > { %v2340_v29 = vsel %vm4772_vm6, %v2257_v49, %v5788_v47  ;;  %v2341_v39 = vsel %vm4779_vm7, %v2258_v48, %v5789_v19  ;;  %v2342_v28 = vsel %vm2318_vm8, %v2259_v32, %v5790_v7  ;;  %v2344_v38 = vsel %vm2320_vm9, %v2257_v49, %v5791_v22  ;;  %v5803_v7 = vld [vmem:[#allocation129_spill] sm:$0xff]  ;;  %v5804_v22 = vld [vmem:[#allocation134_spill] sm:$0xff] }
 0x406   : > { %v2343_v34 = vsel %vm2319_vm10, %v2260_v58, %v5792_v44  ;;  %v2345_v6 = vsel %vm2321_vm11, %v2258_v48, %v5793_v41  ;;  %v2346_v43 = vsel %vm2322_vm12, %v2259_v32, %v5794_v21  ;;  %v2347_v54 = vsel %vm2323_vm13, %v2260_v58, %v5795_v51  ;;  %2404 = vst [vmem:[%s4863_s10 + $0x80] sm:$0xff] %v2340_v29 }
 0x407   : > { %2405 = vst [vmem:[%s4863_s10 + $0x88] sm:$0xff] %v2341_v39  ;;  %2406 = vst [vmem:[%s4863_s10 + $0x90] sm:$0xff] %v2342_v28  ;;  %v2081_v40 = vmax.f32 %v5797_v2, %v2052_v30  ;;  %v2088_v56 = vmax.f32 %v5798_v15, %v1996_v9  ;;  %v2013_v3 = vsel %vm499_vm5, %v1938_v27, %v1954_v26  ;;  %v1940_v55 = vpop.permute.xlu0 %1939  ;;  %v5811_v9 = vld [vmem:[#allocation58_spill] sm:$0xff] }
 0x408   : > { %2408 = vst [vmem:[%s4863_s10 + $0xa0] sm:$0xff] %v2344_v38  ;;  %2407 = vst [vmem:[%s4863_s10 + $0x98] sm:$0xff] %v2343_v34  ;;  %v5046_v4 = vmax.f32 %v5799_v20, %v5033_v31  ;;  %v2094_v13 = vmax.f32 %v5800_v17, %v2013_v3  ;;  %v2022_v63 = vsel %vm499_vm5, %v5801_v1, %v1940_v55  ;;  %v1970_v49 = vpop.permute.xlu1 %1969  ;;  %v5814_v20 = vld [vmem:[#allocation60_spill] sm:$0xff] }
 0x409   : > { %2409 = vst [vmem:[%s4863_s10 + $0xa8] sm:$0xff] %v2345_v6  ;;  %2410 = vst [vmem:[%s4863_s10 + $0xb0] sm:$0xff] %v2346_v43  ;;  %v2145_v37 = vmax.f32 %v2081_v40, %v2088_v56  ;;  %v2146_v48 = vmax.f32 %v4954_v12, %v2081_v40  ;;  %v2152_v32 = vmax.f32 %v2088_v56, %v2087_v62  ;;  %v5806_v6 = vld [vmem:[#allocation128_spill] sm:$0xff]  ;;  %v5807_v43 = vld [vmem:[#allocation89_spill] sm:$0xff] }
 0x40a   : > { %2411 = vst [vmem:[%s4863_s10 + $0xb8] sm:$0xff] %v2347_v54  ;;  %v2101_v58 = vmax.f32 %v5802_v5, %v2022_v63  ;;  %v2215_v27 = vmax.f32 %v2151_v36, %v4914_v52  ;;  %v2221_v61 = vmax.f32 %v4988_v24, %v5046_v4  ;;  %v5057_v45 = vmax.f32 %v2094_v13, %v2093_v35  ;;  %v5805_v35 = vld [vmem:[#allocation107_spill] sm:$0xff]  ;;  %v5812_v40 = vld [vmem:[#allocation36_spill] sm:$0xff]  ;;  %v5813_v56 = vld [vmem:[#allocation62_spill] sm:$0xff] }
 0x40b   : > { %v2005_v23 = vsel %vm499_vm5, %v1954_v26, %v1970_v49  ;;  %v2209_v47 = vmax.f32 %v2145_v37, %v2151_v36  ;;  %v2210_v29 = vmax.f32 %v2146_v48, %v2152_v32  ;;  %v2211_v19 = vmax.f32 %v4967_v57, %v2145_v37  ;;  %v5063_v12 = vpop.permute.xlu0 %1875  ;;  %v5808_v57 = vld [vmem:[#allocation30_spill] sm:$0xff]  ;;  %v5810_v36 = vld [vmem:[#allocation32_spill] sm:$0xff] }
 0x40c   : > { %v2212_v39 = vmax.f32 %v5784_v25, %v2146_v48  ;;  %v2216_v62 = vmax.f32 %v2152_v32, %v4978_v33  ;;  %v2222_v28 = vmax.f32 %v5057_v45, %v5803_v7  ;;  %v5069_v38 = vmax.f32 %v2101_v58, %v5804_v22  ;;  %v1986_v34 = vpop.permute.xlu1 %1985  ;;  %v5815_v1 = vld [vmem:[#allocation64_spill] sm:$0xff]  ;;  %v5816_v48 = vld [vmem:[#allocation133_spill] sm:$0xff] }
 0x40d   : > { %v2095_v44 = vmax.f32 %v5805_v35, %v2005_v23  ;;  %v2261_v26 = vmax.f32 %v2209_v47, %v2213_v18  ;;  %v2262_v41 = vmax.f32 %v2210_v29, %v2214_v50  ;;  %v2263_v25 = vmax.f32 %v2211_v19, %v2215_v27  ;;  %v5809_v50 = vld [vmem:[#allocation34_spill] sm:$0xff]  ;;  %v5817_v27 = vld [vmem:[#allocation109_spill] sm:$0xff]  ;;  %v5818_v47 = vld [vmem:[#allocation103_spill] sm:$0xff] }
 0x40e   : > { %v2046_v33 = vsel %vm499_vm5, %v5063_v12, %v5806_v6  ;;  %v2264_v21 = vmax.f32 %v2212_v39, %v2216_v62  ;;  %v1997_v52 = vsel %vm499_vm5, %v1970_v49, %v1986_v34  ;;  %v2053_v5 = vsel %vm499_vm5, %v1986_v34, %v4982_v16 }
 0x40f   : > { %v5080_v51 = vmax.f32 %v5807_v43, %v2046_v33  ;;  %v2348_v18 = vsel %vm4772_vm6, %v2261_v26, %v5808_v57  ;;  %v2349_v54 = vsel %vm4779_vm7, %v2262_v41, %v5809_v50  ;;  %v2350_v60 = vsel %vm2318_vm8, %v2263_v25, %v5810_v36  ;;  %v1956_v2 = vpop.permute.xlu0 %1955  ;;  %v5820_v33 = vld [vmem:[#allocation112_spill] sm:$0xff]  ;;  %v5825_v36 = vld [vmem:[#allocation137_spill] sm:$0xff] }
 0x410   : > { %v2352_v30 = vsel %vm2320_vm9, %v2261_v26, %v5811_v9  ;;  %v2351_v15 = vsel %vm2319_vm10, %v2264_v21, %v5812_v40  ;;  %v2353_v3 = vsel %vm2321_vm11, %v2262_v41, %v5813_v56  ;;  %v2354_v17 = vsel %vm2322_vm12, %v2263_v25, %v5814_v20  ;;  %2412 = vst [vmem:[%s4863_s10 + $0xc0] sm:$0xff] %v2348_v18  ;;  %v5112_v49 = vpop.permute.xlu1 %1941  ;;  %v5822_v18 = vld [vmem:[#allocation130_spill] sm:$0xff]  ;;  %v5826_v9 = vld [vmem:[#allocation135_spill] sm:$0xff] }
 0x411   : > { %v2355_v63 = vsel %vm2323_vm13, %v2264_v21, %v5815_v1  ;;  %2413 = vst [vmem:[%s4863_s10 + $0xc8] sm:$0xff] %v2349_v54  ;;  %2414 = vst [vmem:[%s4863_s10 + $0xd0] sm:$0xff] %v2350_v60  ;;  %v2159_v37 = vmax.f32 %v2095_v44, %v2094_v13  ;;  %v5120_v32 = vmax.f32 %v5816_v48, %v5080_v51  ;;  %v5819_v13 = vld [vmem:[#allocation110_spill] sm:$0xff]  ;;  %v5823_v54 = vld [vmem:[#allocation136_spill] sm:$0xff] }
 0x412   : > { %2416 = vst [vmem:[%s4863_s10 + $0xe0] sm:$0xff] %v2352_v30  ;;  %2415 = vst [vmem:[%s4863_s10 + $0xd8] sm:$0xff] %v2351_v15  ;;  %v2096_v23 = vmax.f32 %v5817_v27, %v1997_v52  ;;  %v2089_v29 = vmax.f32 %v5818_v47, %v2053_v5  ;;  %v2014_v19 = vsel %vm499_vm5, %v1940_v55, %v1956_v2  ;;  %v5830_v5 = vld [vmem:[#allocation39_spill] sm:$0xff]  ;;  %v5832_v47 = vld [vmem:[#allocation65_spill] sm:$0xff] }
 0x413   : > { %2417 = vst [vmem:[%s4863_s10 + $0xe8] sm:$0xff] %v2353_v3  ;;  %2418 = vst [vmem:[%s4863_s10 + $0xf0] sm:$0xff] %v2354_v17  ;;  %v2229_v39 = vmax.f32 %v5069_v38, %v5120_v32  ;;  %v2102_v22 = vmax.f32 %v5819_v13, %v2014_v19  ;;  %v1972_v35 = vpop.permute.xlu0 %1971  ;;  %v2223_v25 = vmax.f32 %v2159_v37, %v4988_v24  ;;  %v5833_v19 = vld [vmem:[#allocation63_spill] sm:$0xff] }
 0x414   : > { %2419 = vst [vmem:[%s4863_s10 + $0xf8] sm:$0xff] %v2355_v63  ;;  %v2160_v62 = vmax.f32 %v2096_v23, %v2095_v44  ;;  %v2153_v26 = vmax.f32 %v2089_v29, %v2096_v23  ;;  %v2154_v41 = vmax.f32 %v5033_v31, %v2089_v29  ;;  %v2006_v16 = vsel %vm499_vm5, %v1956_v2, %v1972_v35  ;;  %v5135_v34 = vpop.permute.xlu1 %1877  ;;  %v5821_v31 = vld [vmem:[#allocation132_spill] sm:$0xff]  ;;  %v5834_v13 = vld [vmem:[#allocation67_spill] sm:$0xff] }
 0x415   : > { %v5139_v55 = vmax.f32 %v2102_v22, %v2101_v58  ;;  %v2103_v21 = vmax.f32 %v5820_v33, %v2006_v16  ;;  %v2039_v50 = vsel %vm499_vm5, %v5822_v18, %v5821_v31  ;;  %v5824_v58 = vld [vmem:[#allocation138_spill] sm:$0xff]  ;;  %v2047_v17 = vsel %vm499_vm5, %v5135_v34, %v5822_v18  ;;  %v5836_v16 = vld [vmem:[#allocation108_spill] sm:$0xff] }
 0x416   : > { %v2224_v6 = vmax.f32 %v2160_v62, %v5057_v45  ;;  %v2217_v44 = vmax.f32 %v2153_v26, %v2159_v37  ;;  %v2218_v43 = vmax.f32 %v2154_v41, %v2160_v62  ;;  %v2219_v52 = vmax.f32 %v5046_v4, %v2153_v26  ;;  %v5827_v4 = vld [vmem:[#allocation33_spill] sm:$0xff]  ;;  %v5829_v37 = vld [vmem:[#allocation35_spill] sm:$0xff] }
 0x417   : > { %v2220_v57 = vmax.f32 %v5803_v7, %v2154_v41  ;;  %v2031_v45 = vsel %vm499_vm5, %v5821_v31, %v5823_v54  ;;  %v2040_v60 = vsel %vm499_vm5, %v5825_v36, %v5824_v58  ;;  %v2230_v30 = vmax.f32 %v5139_v55, %v5826_v9  ;;  %v1988_v2 = vpop.permute.xlu0 %1987  ;;  %v5835_v26 = vld [vmem:[#allocation139_spill] sm:$0xff]  ;;  %v5839_v31 = vld [vmem:[#allocation92_spill] sm:$0xff] }
 0x418   : > { %v2265_v7 = vmax.f32 %v2217_v44, %v2221_v61  ;;  %v2266_v40 = vmax.f32 %v2218_v43, %v2222_v28  ;;  %v2267_v15 = vmax.f32 %v2219_v52, %v2223_v25  ;;  %v1958_v3 = vpop.permute.xlu1 %1957  ;;  %v2167_v20 = vmax.f32 %v2103_v21, %v2102_v22  ;;  %v5828_v28 = vld [vmem:[#allocation37_spill] sm:$0xff]  ;;  %v5838_v52 = vld [vmem:[#allocation91_spill] sm:$0xff] }
 0x419   : > { %v2268_v56 = vmax.f32 %v2220_v57, %v2224_v6  ;;  %v1998_v1 = vsel %vm499_vm5, %v1972_v35, %v1988_v2  ;;  %v2054_v24 = vsel %vm499_vm5, %v1988_v2, %v5063_v12  ;;  %v5831_v12 = vld [vmem:[#allocation61_spill] sm:$0xff]  ;;  %v2032_v41 = vsel %vm499_vm5, %v5824_v58, %v5835_v26  ;;  %v5837_v6 = vld [vmem:[#allocation114_spill] sm:$0xff] }
 0x41a   : > { %v2356_v61 = vsel %vm4772_vm6, %v2265_v7, %v5827_v4  ;;  %v2357_v63 = vsel %vm4779_vm7, %v2266_v40, %v5828_v28  ;;  %v2358_v48 = vsel %vm2318_vm8, %v2267_v15, %v5829_v37  ;;  %v2360_v23 = vsel %vm2320_vm9, %v2265_v7, %v5831_v12  ;;  %v5840_v2 = vld [vmem:[#allocation94_spill] sm:$0xff]  ;;  %v5842_v4 = vld [vmem:[#allocation95_spill] sm:$0xff] }
 0x41b   : > { %v2359_v27 = vsel %vm2319_vm10, %v2268_v56, %v5830_v5  ;;  %v2361_v29 = vsel %vm2321_vm11, %v2266_v40, %v5832_v47  ;;  %v2362_v62 = vsel %vm2322_vm12, %v2267_v15, %v5833_v19  ;;  %v2363_v22 = vsel %vm2323_vm13, %v2268_v56, %v5834_v13  ;;  %2420 = vst [vmem:[%s4863_s10 + $0x100] sm:$0xff] %v2356_v61  ;;  %v5198_v35 = vpop.permute.xlu0 %1943  ;;  %v5841_v58 = vld [vmem:[#allocation90_spill] sm:$0xff]  ;;  %v5845_v47 = vld [vmem:[#allocation117_spill] sm:$0xff] }
 0x41c   : > { %2421 = vst [vmem:[%s4863_s10 + $0x108] sm:$0xff] %v2357_v63  ;;  %2422 = vst [vmem:[%s4863_s10 + $0x110] sm:$0xff] %v2358_v48  ;;  %v2097_v25 = vmax.f32 %v5836_v16, %v2054_v24  ;;  %v2104_v33 = vmax.f32 %v5837_v6, %v1998_v1  ;;  %v2015_v44 = vsel %vm499_vm5, %v5112_v49, %v1958_v3  ;;  %v1974_v43 = vpop.permute.xlu1 %1973  ;;  %v5850_v16 = vld [vmem:[#allocation44_spill] sm:$0xff]  ;;  %v5851_v6 = vld [vmem:[#allocation70_spill] sm:$0xff] }
 0x41d   : > { %2423 = vst [vmem:[%s4863_s10 + $0x118] sm:$0xff] %v2359_v27  ;;  %2424 = vst [vmem:[%s4863_s10 + $0x120] sm:$0xff] %v2360_v23  ;;  %v2107_v57 = vmax.f32 %v5838_v52, %v2039_v50  ;;  %v2108_v18 = vmax.f32 %v5839_v31, %v2031_v45  ;;  %v5216_v7 = vmax.f32 %v5840_v2, %v2040_v60  ;;  %v5843_v45 = vld [vmem:[#allocation115_spill] sm:$0xff]  ;;  %v5853_v52 = vld [vmem:[#allocation72_spill] sm:$0xff] }
 0x41e   : > { %2425 = vst [vmem:[%s4863_s10 + $0x128] sm:$0xff] %v2361_v29  ;;  %2426 = vst [vmem:[%s4863_s10 + $0x130] sm:$0xff] %v2362_v62  ;;  %v2106_v40 = vmax.f32 %v5841_v58, %v2047_v17  ;;  %v2023_v15 = vsel %vm499_vm5, %v5823_v54, %v5112_v49  ;;  %v2161_v56 = vmax.f32 %v2097_v25, %v2104_v33  ;;  %v5847_v62 = vld [vmem:[#allocation42_spill] sm:$0xff] }
 0x41f   : > { %2427 = vst [vmem:[%s4863_s10 + $0x138] sm:$0xff] %v2363_v22  ;;  %v2162_v1 = vmax.f32 %v5080_v51, %v2097_v25  ;;  %v2168_v24 = vmax.f32 %v2104_v33, %v2103_v21  ;;  %v5225_v61 = vmax.f32 %v5842_v4, %v2032_v41  ;;  %v2231_v50 = vmax.f32 %v2167_v20, %v5069_v38  ;;  %v5231_v17 = vpop.permute.xlu0 %1879  ;;  %v5844_v21 = vld [vmem:[#allocation111_spill] sm:$0xff]  ;;  %v5848_v22 = vld [vmem:[#allocation40_spill] sm:$0xff] }
 0x420   : > { %v2110_v28 = vmax.f32 %v5843_v45, %v2015_v44  ;;  %v2007_v60 = vsel %vm499_vm5, %v1958_v3, %v1974_v43  ;;  %v2225_v63 = vmax.f32 %v2161_v56, %v2167_v20  ;;  %v2227_v49 = vmax.f32 %v5120_v32, %v2161_v56  ;;  %v1990_v51 = vpop.permute.xlu1 %1989  ;;  %v5852_v44 = vld [vmem:[#allocation68_spill] sm:$0xff]  ;;  %v5854_v56 = vld [vmem:[#allocation119_spill] sm:$0xff] }
 0x421   : > { %v2226_v37 = vmax.f32 %v2162_v1, %v2168_v24  ;;  %v2228_v54 = vmax.f32 %v5826_v9, %v2162_v1  ;;  %v2109_v48 = vmax.f32 %v5844_v21, %v2023_v15  ;;  %v2171_v5 = vmax.f32 %v2107_v57, %v2106_v40 }
 0x422   : > { %v2232_v27 = vmax.f32 %v2168_v24, %v5139_v55  ;;  %v2024_v12 = vsel %vm499_vm5, %v5835_v26, %v5198_v35  ;;  %v2269_v3 = vmax.f32 %v2225_v63, %v2229_v39  ;;  %v2271_v23 = vmax.f32 %v2227_v49, %v2231_v50  ;;  %v5846_v39 = vld [vmem:[#allocation38_spill] sm:$0xff]  ;;  %v5855_v50 = vld [vmem:[#allocation113_spill] sm:$0xff]  ;;  %v5856_v63 = vld [vmem:[#allocation116_spill] sm:$0xff] }
 0x423   : > { %v2270_v20 = vmax.f32 %v2226_v37, %v2230_v30  ;;  %v2111_v9 = vmax.f32 %v5845_v47, %v2007_v60  ;;  %v2174_v19 = vmax.f32 %v2110_v28, %v2109_v48  ;;  %v2048_v55 = vsel %vm499_vm5, %v5231_v17, %v5825_v36  ;;  %v1960_v32 = vpop.permute.xlu0 %1959  ;;  %v5849_v26 = vld [vmem:[#allocation66_spill] sm:$0xff]  ;;  %v5857_v37 = vld [vmem:[#allocation93_spill] sm:$0xff] }
 0x424   : > { %v2272_v29 = vmax.f32 %v2228_v54, %v2232_v27  ;;  %v1999_v38 = vsel %vm499_vm5, %v1974_v43, %v1990_v51  ;;  %v2364_v30 = vsel %vm4772_vm6, %v2269_v3, %v5846_v39  ;;  %v2366_v36 = vsel %vm2318_vm8, %v2271_v23, %v5848_v22  ;;  %v5859_v47 = vld [vmem:[#allocation121_spill] sm:$0xff] }
 0x425   : > { %v2365_v13 = vsel %vm4779_vm7, %v2270_v20, %v5847_v62  ;;  %v2368_v41 = vsel %vm2320_vm9, %v2269_v3, %v5849_v26  ;;  %v2369_v33 = vsel %vm2321_vm11, %v2270_v20, %v5851_v6  ;;  %v2370_v43 = vsel %vm2322_vm12, %v2271_v23, %v5852_v44  ;;  %2428 = vst [vmem:[%s4863_s10 + $0x140] sm:$0xff] %v2364_v30  ;;  %v5858_v20 = vld [vmem:[#allocation120_spill] sm:$0xff]  ;;  %v5861_v26 = vld [vmem:[#allocation123_spill] sm:$0xff] }
 0x426   : > { %v2367_v25 = vsel %vm2319_vm10, %v2272_v29, %v5850_v16  ;;  %v2371_v31 = vsel %vm2323_vm13, %v2272_v29, %v5853_v52  ;;  %2429 = vst [vmem:[%s4863_s10 + $0x148] sm:$0xff] %v2365_v13  ;;  %2430 = vst [vmem:[%s4863_s10 + $0x150] sm:$0xff] %v2366_v36  ;;  %v2172_v2 = vmax.f32 %v2108_v18, %v2107_v57  ;;  %v5860_v36 = vld [vmem:[#allocation118_spill] sm:$0xff]  ;;  %v5862_v16 = vld [vmem:[#allocation41_spill] sm:$0xff] }
 0x427   : > { %2432 = vst [vmem:[%s4863_s10 + $0x160] sm:$0xff] %v2368_v41  ;;  %2431 = vst [vmem:[%s4863_s10 + $0x158] sm:$0xff] %v2367_v25  ;;  %v2175_v58 = vmax.f32 %v2111_v9, %v2110_v28  ;;  %v2055_v15 = vsel %vm499_vm5, %v1990_v51, %v5135_v34  ;;  %v2112_v1 = vmax.f32 %v5854_v56, %v1999_v38  ;;  %v1976_v60 = vpop.permute.xlu0 %1975  ;;  %v5864_v6 = vld [vmem:[#allocation43_spill] sm:$0xff]  ;;  %v5866_v52 = vld [vmem:[#allocation69_spill] sm:$0xff] }
 0x428   : > { %2433 = vst [vmem:[%s4863_s10 + $0x168] sm:$0xff] %v2369_v33  ;;  %2434 = vst [vmem:[%s4863_s10 + $0x170] sm:$0xff] %v2370_v43  ;;  %v5289_v24 = vmax.f32 %v5225_v61, %v5216_v7  ;;  %v2173_v4 = vmax.f32 %v2109_v48, %v2108_v18  ;;  %v2105_v45 = vmax.f32 %v5855_v50, %v2055_v15  ;;  %v5865_v44 = vld [vmem:[#allocation47_spill] sm:$0xff] }
 0x429   : > { %2435 = vst [vmem:[%s4863_s10 + $0x178] sm:$0xff] %v2371_v31  ;;  %v2016_v57 = vsel %vm499_vm5, %v5198_v35, %v1960_v32  ;;  %v2117_v28 = vmax.f32 %v5856_v63, %v2024_v12  ;;  %v2114_v49 = vmax.f32 %v5857_v37, %v2048_v55  ;;  %v2176_v54 = vmax.f32 %v2112_v1, %v2111_v9  ;;  %v5868_v15 = vld [vmem:[#allocation71_spill] sm:$0xff] }
 0x42a   : > { %v2008_v34 = vsel %vm499_vm5, %v1960_v32, %v1976_v60  ;;  %v2237_v51 = vmax.f32 %v2173_v4, %v2171_v5  ;;  %v2238_v21 = vmax.f32 %v2174_v19, %v2172_v2  ;;  %v2169_v27 = vmax.f32 %v2105_v45, %v2112_v1  ;;  %v5869_v1 = vld [vmem:[#allocation75_spill] sm:$0xff] }
 0x42b   : > { %v2170_v3 = vmax.f32 %v2106_v40, %v2105_v45  ;;  %v2239_v18 = vmax.f32 %v2175_v58, %v2173_v4  ;;  %v2240_v48 = vmax.f32 %v2176_v54, %v2174_v19  ;;  %v2118_v23 = vmax.f32 %v5858_v20, %v2016_v57  ;;  %v1992_v30 = vpop.permute.xlu0 %1991  ;;  %v5871_v20 = vld [vmem:[#allocation49_spill] sm:$0xff] }
 0x42c   : > { %v2119_v29 = vmax.f32 %v5859_v47, %v2008_v34  ;;  %v2233_v35 = vmax.f32 %v2169_v27, %v2175_v58  ;;  %v2235_v39 = vmax.f32 %v2171_v5, %v2169_v27  ;;  %v2181_v9 = vmax.f32 %v2117_v28, %v5225_v61  ;;  %v5872_v47 = vld [vmem:[#allocation48_spill] sm:$0xff] }
 0x42d   : > { %v2234_v38 = vmax.f32 %v2170_v3, %v2176_v54  ;;  %v2236_v12 = vmax.f32 %v2172_v2, %v2170_v3  ;;  %v2179_v55 = vmax.f32 %v5216_v7, %v2114_v49  ;;  %v2000_v32 = vsel %vm499_vm5, %v1976_v60, %v1992_v30  ;;  %v5867_v2 = vld [vmem:[#allocation73_spill] sm:$0xff] }
 0x42e   : > { %v2056_v40 = vsel %vm499_vm5, %v1992_v30, %v5231_v17  ;;  %v2273_v19 = vmax.f32 %v2233_v35, %v2237_v51  ;;  %v2275_v13 = vmax.f32 %v2235_v39, %v2239_v18  ;;  %v2182_v22 = vmax.f32 %v2118_v23, %v2117_v28  ;;  %v5863_v17 = vld [vmem:[#allocation45_spill] sm:$0xff]  ;;  %v5873_v35 = vld [vmem:[#allocation74_spill] sm:$0xff] }
 0x42f   : > { %v2274_v62 = vmax.f32 %v2234_v38, %v2238_v21  ;;  %v2276_v5 = vmax.f32 %v2236_v12, %v2240_v48  ;;  %v2183_v61 = vmax.f32 %v2119_v29, %v2118_v23  ;;  %v2113_v7 = vmax.f32 %v5860_v36, %v2056_v40  ;;  %v5870_v48 = vld [vmem:[#allocation46_spill] sm:$0xff] }
 0x430   : > { %v2120_v41 = vmax.f32 %v5861_v26, %v2000_v32  ;;  %v2372_v46 = vsel %vm4772_vm6, %v2273_v19, %v5862_v16  ;;  %v2374_v33 = vsel %vm2318_vm8, %v2275_v13, %v5864_v6  ;;  %v2376_v31 = vsel %vm2320_vm9, %v2273_v19, %v5866_v52  ;;  %v5874_v39 = vld [vmem:[#allocation50_spill] sm:$0xff] }
 0x431   : > { %v2373_v25 = vsel %vm4779_vm7, %v2274_v62, %v5863_v17  ;;  %v2375_v43 = vsel %vm2319_vm10, %v2276_v5, %v5865_v44  ;;  %v2377_v58 = vsel %vm2321_vm11, %v2274_v62, %v5867_v2  ;;  %v2378_v56 = vsel %vm2322_vm12, %v2275_v13, %v5868_v15  ;;  %2436 = vst [vmem:[%s4863_s10 + $0x180] sm:$0xff] %v2372_v46 }
 0x432   : > { %v2379_v4 = vsel %vm2323_vm13, %v2276_v5, %v5869_v1  ;;  %2437 = vst [vmem:[%s4863_s10 + $0x188] sm:$0xff] %v2373_v25  ;;  %2438 = vst [vmem:[%s4863_s10 + $0x190] sm:$0xff] %v2374_v33  ;;  %v2177_v50 = vmax.f32 %v2113_v7, %v2120_v41  ;;  %v2178_v45 = vmax.f32 %v2114_v49, %v2113_v7 }
 0x433   : > { %2439 = vst [vmem:[%s4863_s10 + $0x198] sm:$0xff] %v2375_v43  ;;  %2440 = vst [vmem:[%s4863_s10 + $0x1a0] sm:$0xff] %v2376_v31  ;;  %v2184_v57 = vmax.f32 %v2120_v41, %v2119_v29  ;;  %v2245_v60 = vmax.f32 %v2181_v9, %v2179_v55  ;;  %v2246_v63 = vmax.f32 %v2182_v22, %v5289_v24 }
 0x434   : > { %2441 = vst [vmem:[%s4863_s10 + $0x1a8] sm:$0xff] %v2377_v58  ;;  %2442 = vst [vmem:[%s4863_s10 + $0x1b0] sm:$0xff] %v2378_v56  ;;  %v2247_v28 = vmax.f32 %v2183_v61, %v2181_v9  ;;  %v2241_v37 = vmax.f32 %v2177_v50, %v2183_v61  ;;  %v2243_v34 = vmax.f32 %v2179_v55, %v2177_v50  ;;  %v5877_v9 = vld [vmem:[#allocation80_spill] sm:$0xff] }
 0x435   : > { %2443 = vst [vmem:[%s4863_s10 + $0x1b8] sm:$0xff] %v2379_v4  ;;  %v2242_v54 = vmax.f32 %v2178_v45, %v2184_v57  ;;  %v2244_v51 = vmax.f32 %v5289_v24, %v2178_v45  ;;  %v2248_v21 = vmax.f32 %v2184_v57, %v2182_v22 }
 0x436   : > { %v2277_v27 = vmax.f32 %v2241_v37, %v2245_v60  ;;  %v2279_v49 = vmax.f32 %v2243_v34, %v2247_v28 }
 0x437   : > { %v2278_v3 = vmax.f32 %v2242_v54, %v2246_v63  ;;  %v2280_v18 = vmax.f32 %v2244_v51, %v2248_v21 }
 0x438   : > { %v2380_v24 = vsel %vm4772_vm6, %v2277_v27, %v5870_v48  ;;  %v2382_v29 = vsel %vm2318_vm8, %v2279_v49, %v5872_v47  ;;  %v2384_v38 = vsel %vm2320_vm9, %v2277_v27, %v5873_v35  ;;  %v2386_v30 = vsel %vm2322_vm12, %v2279_v49, %v5876_v14 }
 0x439   : > { %v2381_v23 = vsel %vm4779_vm7, %v2278_v3, %v5871_v20  ;;  %v2383_v10 = vsel %vm2319_vm10, %v2280_v18, %v5874_v39  ;;  %v2385_v12 = vsel %vm2321_vm11, %v2278_v3, %v5875_v59  ;;  %v2387_v53 = vsel %vm2323_vm13, %v2280_v18, %v5877_v9  ;;  %2444 = vst [vmem:[%s4863_s10 + $0x1c0] sm:$0xff] %v2380_v24 }
 0x43a   : > { %2445 = vst [vmem:[%s4863_s10 + $0x1c8] sm:$0xff] %v2381_v23  ;;  %2446 = vst [vmem:[%s4863_s10 + $0x1d0] sm:$0xff] %v2382_v29 }
 0x43b   : > { %2448 = vst [vmem:[%s4863_s10 + $0x1e0] sm:$0xff] %v2384_v38  ;;  %2447 = vst [vmem:[%s4863_s10 + $0x1d8] sm:$0xff] %v2383_v10 }
 0x43c   : > { %2449 = vst [vmem:[%s4863_s10 + $0x1e8] sm:$0xff] %v2385_v12  ;;  %2450 = vst [vmem:[%s4863_s10 + $0x1f0] sm:$0xff] %v2386_v30 }
 0x43d   : > { %2451 = vst [vmem:[%s4863_s10 + $0x1f8] sm:$0xff] %v2387_v53 }
 0x43e   : > { %2755 = shalt.err (!%p2752_p5)
}
 0x43f   : > { %s2756_s29 = scalar_lea.hbm %s5349_s15, 8192  ;;  %s2760_s10 = scalar_lea.hbm %s5433_s6, 16384 }
 0x440   : > { %p2757_p9 = scmp.ne.s32.totalorder %s5349_s15, %s2756_s29  ;;  %p2761_p6 = scmp.lt.s32.totalorder %s5349_s15, %s5433_s6 }
 0x441   : > { %p2762_p8 = scmp.lt.s32.totalorder %s2760_s10, %s2756_s29 }
 0x442   : > { %p2758_p1 = pnand %p2757_p9, %p5878_p7 }
 0x443   : > { %p2763_p3 = por %p2762_p8, %p2761_p6 }
 0x444   : > { %p2759_p4 = pneg %p2758_p1 }
 0x446   : > { %p2764_p11 = pnand %p2763_p3, %p2759_p4 }
 0x448   : > { %2767 = shalt.err (!%p2764_p11)
}
 0x449   : > { %s2825_s7 = smov 1024  }
 0x44a   : > { %2608 = dma.vmem_to_hbm [thread:$0]  (%p5878_p7), %s5363_s13, 8192, %s5349_s15, %s2453_s25, %s2825_s7, %s2825_s7, %s2823_s27  }
 0x44b PF: > { %s2482_s14 = sand.u32 1, %s2798_s21   ;;  %p5879_p12 = scmp.ne.s32.totalorder %s5586_s28, 0 }
 0x44c   : > { %p5880_p10 = scmp.ge.s32.totalorder %s2810_s24, 2  ;;  %s2483_s16 = scalar_lea.sflag [#allocation4], %s2482_s14 }
 0x44e   : > { %p2619_p2 = pnand %p5880_p10, %p5879_p12 }
 0x450   : > { %p2620_p13 = pneg %p2619_p2 }
 0x452   : > { %2793 = dma.done.wait (%p2620_p13), %s2483_s16, 8192  }
 0x453   : > { %2795 = vsyncadd (%p2620_p13), %s2483_s16, 4294959104  ;;  %p20_p0 = scmp.ge.s32.totalorder %s2915_s9, 4   ;;  %s5881_s21 = smov %s2802_s22 }
 0x454   : > { %s5882_s22 = smov %s2806_s23  ;;  %s5883_s23 = smov %s2932_s17 }
 0x455   : > { %s5884_s24 = smov %s2915_s9  ;;  %22 = sbr.rel (!%p20_p0) target bundleno = 6 (0x6), region = 96 }
 0x45a   :  { %2488 = vsyncpa [#allocation3], 1 }
 0x45b   :  { %2490 = vsyncpa [#allocation3 + $0x1], 1 }
 0x45c   :  { %2491 = vsyncpa [#allocation6], 1 }
 0x45d   :  { %2492 = vsyncpa [#allocation4], 1 }
 0x45e   :  { %2494 = vsyncpa [#allocation4 + $0x1], 1 }

</bundles_post_ra>
